<compile_context>
chip_gen: v5e
topology: v5e:2x2
jax: 0.10.0
libtpu: 0.0.40
codegen_flags: <defaults>
</compile_context>

<pallas_src>
import functools

import numpy as np
import jax
import jax.numpy as jnp
from jax import lax
from jax.experimental import pallas as pl
from jax.experimental.pallas import tpu as pltpu

BN_EPS = 1e-5
POOL_OUT = 16
C1, K1, S1, P1 = 16, 32, 4, 8      # conv1: 1 -> 16, k=32, s=4, pad=8
C2, K2, S2, P2 = 32, 16, 2, 4      # conv2: 16 -> 32, k=16, s=2, pad=4
N_OUT = 2
DATA_OFF = 16                      # 16-aligned start of the h1 data inside each batch region


def _round_up(x, m):
    return ((x + m - 1) // m) * m


def _geom(input_size):
    # Parity decomposition of the stride-2 conv2 is hard-wired to S2 == 2, even P2, even K2.
    assert S2 == 2 and P2 % 2 == 0 and K2 % 2 == 0
    l1 = (input_size + 2 * P1 - K1) // S1 + 1
    l2 = (l1 + 2 * P2 - K2) // S2 + 1
    n_even = (l1 + 1) // 2
    n_odd = l1 // 2
    off = DATA_OFF - P2 // 2                                        # tap-slice base offset
    buf = _round_up(max(off + K2 // 2 + l2 - 1, DATA_OFF + n_even), 16)
    ext = _round_up(off + K2 // 2 - 1, 8)                           # tail so shifted taps stay in bounds
    return dict(l1=l1, l2=l2, n_even=n_even, n_odd=n_odd, off=off, buf=buf, ext=ext)


# ------------------------------ fused kernel ------------------------------- #
def _fused_kernel(p1_ref, w1_ref, w2_ref, wcb_ref, aux_ref, o_ref, ev_ref, od_ref, *,
                  B, L1, L2, BUF, EXT, OFF, N_EVEN, N_ODD):
    M1 = B * L1
    M2 = B * L2
    ROWS = B * BUF

    aux = aux_ref[...]
    sel = aux[0:B, 0:ROWS]                       # (B, ROWS) 0/1 per-batch valid-row selector
    g1, be1 = aux[B:B + 1, 0:C1], aux[B + 1:B + 2, 0:C1]
    g2, be2 = aux[B + 2:B + 3, 0:C2], aux[B + 3:B + 4, 0:C2]
    bfc = aux[B + 4:B + 5, 0:N_OUT]

    # ---- stage 1: conv1 (im2col matmul, bf16 -> f32 acc) + BN1 (batch stats) + ReLU ----
    # conv bias dropped: training-mode BN subtracts the batch mean right after, cancels exactly.
    acc1 = jnp.dot(p1_ref[...], w1_ref[...], preferred_element_type=jnp.float32)   # (M1, C1)
    mu1 = jnp.sum(acc1, axis=0, keepdims=True) * (1.0 / M1)
    var1 = jnp.maximum(
        jnp.sum(acc1 * acc1, axis=0, keepdims=True) * (1.0 / M1) - mu1 * mu1, 0.0)
    h1 = jnp.maximum((acc1 - mu1) * lax.rsqrt(var1 + BN_EPS) * g1 + be1, 0.0)
    h1b = h1.astype(jnp.bfloat16)                # single small cast before the scatter

    # ---- zero ONLY the halo/gap rows of the parity scratch (disjoint from data writes) --
    def zero_gaps(ref, n_data):
        total = ROWS + EXT
        cur = 0
        for b in range(B):
            start = b * BUF + DATA_OFF
            if start > cur:
                ref[pl.ds(cur, start - cur), :] = jnp.zeros((start - cur, C1), jnp.bfloat16)
            cur = start + n_data
        if total > cur:
            ref[pl.ds(cur, total - cur), :] = jnp.zeros((total - cur, C1), jnp.bfloat16)

    zero_gaps(ev_ref, N_EVEN)
    zero_gaps(od_ref, N_ODD)

    # ---- scatter h1 (rows pre-grouped even-t / odd-t per batch by the wrapper gather)
    #      into 16-aligned per-batch regions; all slice starts are trace-time constants ---
    for b in range(B):
        ev_ref[pl.ds(b * BUF + DATA_OFF, N_EVEN), :] = h1b[b * L1:b * L1 + N_EVEN, :]
        od_ref[pl.ds(b * BUF + DATA_OFF, N_ODD), :] = h1b[b * L1 + N_EVEN:(b + 1) * L1, :]

    # ---- stage 2: conv2 as 16 accumulated per-tap matmuls (no 256-wide operand build) ---
    # Uniform BUF spacing makes every tap one full-length shifted slice covering all
    # batches; rows with t2 >= L2 are garbage but finite and are excluded below.
    acc2 = None
    for k in range(K2):
        src = ev_ref if (k % 2 == 0) else od_ref
        tap = src[pl.ds(OFF + k // 2, ROWS), :]                        # (ROWS, C1) bf16
        part = jnp.dot(tap, w2_ref[k], preferred_element_type=jnp.float32)
        acc2 = part if acc2 is None else acc2 + part                   # (ROWS, C2) f32

    # BN2 statistics from the valid rows only (static per-batch slices, exact, f32)
    s2 = None
    ss2 = None
    for b in range(B):
        blk = acc2[b * BUF:b * BUF + L2, :]
        bs = jnp.sum(blk, axis=0, keepdims=True)
        bq = jnp.sum(blk * blk, axis=0, keepdims=True)
        s2 = bs if s2 is None else s2 + bs
        ss2 = bq if ss2 is None else ss2 + bq
    mu2 = s2 * (1.0 / M2)
    var2 = jnp.maximum(ss2 * (1.0 / M2) - mu2 * mu2, 0.0)
    h2 = jnp.maximum((acc2 - mu2) * lax.rsqrt(var2 + BN_EPS) * g2 + be2, 0.0)    # (ROWS, C2)

    # ---- stage 3: pool(16) + flatten + FC, pre-folded & batch-tiled into wcb ------------
    # wcb is zero on pad/garbage rows, so two multiplies + lane reductions + one tiny
    # selector matmul give the per-batch outputs (no per-batch loop, no 2-wide concats).
    per_row = jnp.concatenate(
        [jnp.sum(h2 * wcb_ref[o], axis=1, keepdims=True) for o in range(N_OUT)], axis=1)
    o_ref[...] = jnp.dot(sel, per_row, preferred_element_type=jnp.float32) + bfc


# ------------------------------- JAX glue ----------------------------------- #
def _adaptive_pool_matrix(lin, lout):
    # AdaptiveAvgPool1d(lout): out[p] = mean(x[floor(p*lin/lout) : ceil((p+1)*lin/lout)])
    p = np.zeros((lin, lout), np.float32)
    for j in range(lout):
        s = (j * lin) // lout
        e = ((j + 1) * lin + lout - 1) // lout
        p[s:e, j] = 1.0 / (e - s)
    return p


def init_params(key):
    ks = jax.random.split(key, 10)

    def u(k, shape, bound):
        return jax.random.uniform(k, shape, jnp.float32, -bound, bound)

    return dict(
        w1=u(ks[0], (C1, 1, K1), 1.0 / np.sqrt(K1)),
        b1=u(ks[1], (C1,), 1.0 / np.sqrt(K1)),
        g1=jax.random.uniform(ks[2], (C1,), jnp.float32, 0.5, 1.5),
        be1=u(ks[3], (C1,), 0.1),
        w2=u(ks[4], (C2, C1, K2), 1.0 / np.sqrt(C1 * K2)),
        b2=u(ks[5], (C2,), 1.0 / np.sqrt(C1 * K2)),
        g2=jax.random.uniform(ks[6], (C2,), jnp.float32, 0.5, 1.5),
        be2=u(ks[7], (C2,), 0.1),
        wfc=u(ks[8], (N_OUT, C2 * POOL_OUT), 1.0 / np.sqrt(C2 * POOL_OUT)),
        bfc=u(ks[9], (N_OUT,), 1.0 / np.sqrt(C2 * POOL_OUT)),
    )


def prepare_params(p, input_size=256, batch=2):
    """One-time static preprocessing: pool+FC fold + batch tiling, layout reshapes, bf16 casts,
    and packing of all small per-channel params into one aux input.
    Conv biases b1/b2 are intentionally dropped: training-mode (batch-stats) BN cancels them."""
    g = _geom(input_size)
    l2, buf = g["l2"], g["buf"]
    rows = batch * buf
    assert rows <= 128, ("aux selector layout and the grid=(1,) launch assume toy batch sizes; "
                         "scale via a batch-parallel grid + two-pass BN instead")

    # Fold AdaptiveAvgPool1d(16) + flatten + Linear into (N_OUT, l2, C2), then tile across
    # the per-batch row layout used by the kernel (zeros on pad/garbage rows).
    pool = jnp.asarray(_adaptive_pool_matrix(l2, POOL_OUT))            # (l2, 16)
    wfc3 = p["wfc"].reshape(N_OUT, C2, POOL_OUT)                       # [o, c, p]
    wc = jnp.einsum("tp,ocp->otc", pool, wfc3)                         # (N_OUT, l2, C2)
    wcb = jnp.zeros((N_OUT, rows, C2), jnp.float32)
    for b in range(batch):
        wcb = wcb.at[:, b * buf:b * buf + l2, :].set(wc)

    # Per-batch valid-row selector (stage-3 segment sum) + small per-channel params.
    valid = (np.arange(buf) < l2).astype(np.float32)
    aux_np = np.zeros((max(8, _round_up(batch + 5, 8)), 128), np.float32)
    for b in range(batch):
        aux_np[b, b * buf:(b + 1) * buf] = valid
    aux = jnp.asarray(aux_np)
    aux = aux.at[batch + 0, 0:C1].set(p["g1"])
    aux = aux.at[batch + 1, 0:C1].set(p["be1"])
    aux = aux.at[batch + 2, 0:C2].set(p["g2"])
    aux = aux.at[batch + 3, 0:C2].set(p["be2"])
    aux = aux.at[batch + 4, 0:N_OUT].set(p["bfc"])

    return dict(
        w1r=p["w1"].reshape(C1, K1).T.astype(jnp.bfloat16),                    # (K1, C1)
        w2p=jnp.transpose(p["w2"], (2, 1, 0)).astype(jnp.bfloat16),            # (K2, C1, C2)
        wcb=wcb,                                                               # (N_OUT, B*BUF, C2)
        aux=aux,                                                               # (>=8, 128) f32
    )


@jax.jit
def artifact_detector_forward(x, prep):
    # x: (B, 1, L) float32, same NCW convention as torch Conv1d.
    B, _, L = x.shape
    g = _geom(L)
    l1, l2, buf, ext = g["l1"], g["l2"], g["buf"], g["ext"]
    assert prep["wcb"].shape[1] == B * buf, "prepare_params(batch=..., input_size=...) must match x"

    # Stage-1 im2col: one tiny constant-index gather in XLA, rows ordered
    # (even conv1 positions, then odd) per batch so the in-kernel parity scatter is
    # two contiguous copies per batch.
    # TODO(synk): could be folded in-kernel as 4 stride-phase matmuls if the extra XLA
    # dispatch ever shows up in a profile (optional per perf review).
    x_pad = jnp.pad(x[:, 0, :], ((0, 0), (P1, P1)))                    # (B, L + 2*P1)
    t_order = np.concatenate([np.arange(0, l1, 2), np.arange(1, l1, 2)])
    gather_idx = t_order[:, None] * S1 + np.arange(K1)[None, :]        # (l1, K1) static
    patches1 = x_pad[:, gather_idx].reshape(B * l1, K1).astype(jnp.bfloat16)

    kernel = functools.partial(
        _fused_kernel, B=B, L1=l1, L2=l2, BUF=buf, EXT=ext, OFF=g["off"],
        N_EVEN=g["n_even"], N_ODD=g["n_odd"])
    aux_shape = prep["aux"].shape
    return pl.pallas_call(
        kernel,
        out_shape=jax.ShapeDtypeStruct((B, N_OUT), jnp.float32),
        grid=(1,),
        in_specs=[
            pl.BlockSpec((B * l1, K1), lambda i: (0, 0)),              # patches1 (bf16)
            pl.BlockSpec((K1, C1), lambda i: (0, 0)),                  # w1r (bf16)
            pl.BlockSpec((K2, C1, C2), lambda i: (0, 0, 0)),           # w2p (bf16)
            pl.BlockSpec((N_OUT, B * buf, C2), lambda i: (0, 0, 0)),   # folded pool+fc (f32)
            pl.BlockSpec(aux_shape, lambda i: (0, 0)),                 # packed small params
        ],
        out_specs=pl.BlockSpec((B, N_OUT), lambda i: (0, 0)),
        scratch_shapes=[
            pltpu.VMEM((B * buf + ext, C1), jnp.bfloat16),             # even-parity buffer
            pltpu.VMEM((B * buf + ext, C1), jnp.bfloat16),             # odd-parity buffer
        ],
        compiler_params=pltpu.CompilerParams(dimension_semantics=("arbitrary",)),
    )(patches1, prep["w1r"], prep["w2p"], prep["wcb"], prep["aux"])


# ------------------------------ reference ----------------------------------- #
def reference_forward(x, p):
    def bn(y, g, b):
        mean = y.mean(axis=(0, 2), keepdims=True)
        var = ((y - mean) ** 2).mean(axis=(0, 2), keepdims=True)
        return (y - mean) / jnp.sqrt(var + BN_EPS) * g[None, :, None] + b[None, :, None]

    y = lax.conv_general_dilated(x, p["w1"], (S1,), [(P1, P1)],
                                 dimension_numbers=("NCH", "OIH", "NCH"))
    y = y + p["b1"][None, :, None]
    y = jnp.maximum(bn(y, p["g1"], p["be1"]), 0.0)
    y = lax.conv_general_dilated(y, p["w2"], (S2,), [(P2, P2)],
                                 dimension_numbers=("NCH", "OIH", "NCH"))
    y = y + p["b2"][None, :, None]
    y = jnp.maximum(bn(y, p["g2"], p["be2"]), 0.0)
    pool = jnp.asarray(_adaptive_pool_matrix(y.shape[2], POOL_OUT))
    y = jnp.einsum("bct,tp->bcp", y, pool)
    y = y.reshape(y.shape[0], -1)
    return y @ p["wfc"].T + p["bfc"][None, :]


if __name__ == "__main__":
    key = jax.random.PRNGKey(0)
    kx, kp = jax.random.split(key)
    x = jax.random.normal(kx, (2, 1, 256), jnp.float32)   # (batch, 1 channel, 256 samples)
    params = init_params(kp)
    prep = prepare_params(params, input_size=256, batch=2)

    out = jax.block_until_ready(artifact_detector_forward(x, prep))
    ref = jax.block_until_ready(reference_forward(x, params))
    assert out.shape == (2, 2), out.shape
    np.testing.assert_allclose(np.asarray(out), np.asarray(ref), rtol=2e-2, atol=2e-2)
    print("KERNEL_OK")
</pallas_src>

<mosaic_0001>
module attributes {stable_mosaic.version = 11 : i64} {
  func.func @_fused_kernel(%arg0: i32, %arg1: memref<122x32xbf16, #tpu.memory_space<vmem>>, %arg2: memref<32x16xbf16, #tpu.memory_space<vmem>>, %arg3: memref<16x16x32xbf16, #tpu.memory_space<vmem>>, %arg4: memref<2x96x32xf32, #tpu.memory_space<vmem>>, %arg5: memref<8x128xf32, #tpu.memory_space<vmem>>, %arg6: memref<2x2xf32, #tpu.memory_space<vmem>>, %arg7: memref<120x16xbf16, #tpu.memory_space<vmem>>, %arg8: memref<120x16xbf16, #tpu.memory_space<vmem>>) attributes {dimension_semantics = [#tpu.dimension_semantics<arbitrary>], iteration_bounds = array<i64: 1>, scalar_prefetch = 0 : i64, scratch_operands = 2 : i64, tpu.core_type = #tpu.core_type<tc>, window_params = [{pipeline_mode = #tpu.pipeline_mode<synchronous>, transform_indices = @transform_0, window_bounds = array<i64: 122, 32>}, {pipeline_mode = #tpu.pipeline_mode<synchronous>, transform_indices = @transform_1, window_bounds = array<i64: 32, 16>}, {pipeline_mode = #tpu.pipeline_mode<synchronous>, transform_indices = @transform_2, window_bounds = array<i64: 16, 16, 32>}, {pipeline_mode = #tpu.pipeline_mode<synchronous>, transform_indices = @transform_3, window_bounds = array<i64: 2, 96, 32>}, {pipeline_mode = #tpu.pipeline_mode<synchronous>, transform_indices = @transform_4, window_bounds = array<i64: 8, 128>}, {pipeline_mode = #tpu.pipeline_mode<synchronous>, transform_indices = @transform_5, window_bounds = array<i64: 2, 2>}]} {
    %c0 = arith.constant 0 : index
    %c0_0 = arith.constant 0 : index
    %0 = vector.load %arg5[%c0, %c0_0] : memref<8x128xf32, #tpu.memory_space<vmem>>, vector<8x128xf32>
    %1 = vector.extract_strided_slice %0 {offsets = [0, 0], sizes = [2, 96], strides = [1, 1]} : vector<8x128xf32> to vector<2x96xf32>
    %2 = vector.extract_strided_slice %0 {offsets = [2, 0], sizes = [1, 16], strides = [1, 1]} : vector<8x128xf32> to vector<1x16xf32>
    %3 = vector.extract_strided_slice %0 {offsets = [3, 0], sizes = [1, 16], strides = [1, 1]} : vector<8x128xf32> to vector<1x16xf32>
    %4 = vector.extract_strided_slice %0 {offsets = [4, 0], sizes = [1, 32], strides = [1, 1]} : vector<8x128xf32> to vector<1x32xf32>
    %5 = vector.extract_strided_slice %0 {offsets = [5, 0], sizes = [1, 32], strides = [1, 1]} : vector<8x128xf32> to vector<1x32xf32>
    %6 = vector.extract_strided_slice %0 {offsets = [6, 0], sizes = [1, 2], strides = [1, 1]} : vector<8x128xf32> to vector<1x2xf32>
    %c0_1 = arith.constant 0 : index
    %c0_2 = arith.constant 0 : index
    %7 = vector.load %arg1[%c0_1, %c0_2] : memref<122x32xbf16, #tpu.memory_space<vmem>>, vector<122x32xbf16>
    %c0_3 = arith.constant 0 : index
    %c0_4 = arith.constant 0 : index
    %8 = vector.load %arg2[%c0_3, %c0_4] : memref<32x16xbf16, #tpu.memory_space<vmem>>, vector<32x16xbf16>
    %cst = arith.constant dense<0.000000e+00> : vector<122x16xf32>
    %9 = tpu.matmul %7, %8, %cst {dimension_numbers = #tpu.dot_dimension_numbers<[1], [0], [0], [1], [0, 0, 1, 1], [], []>} : vector<122x32xbf16>, vector<32x16xbf16>, vector<122x16xf32> -> vector<122x16xf32>
    %cst_5 = arith.constant dense<0.000000e+00> : vector<16xf32>
    %10 = vector.multi_reduction <add>, %9, %cst_5 [0] : vector<122x16xf32> to vector<16xf32>
    %11 = vector.shape_cast %10 : vector<16xf32> to vector<1x16xf32>
    %cst_6 = arith.constant 0.00819672085 : f32
    %12 = vector.broadcast %cst_6 : f32 to vector<1x16xf32>
    %13 = arith.mulf %11, %12 : vector<1x16xf32>
    %14 = arith.mulf %9, %9 : vector<122x16xf32>
    %cst_7 = arith.constant dense<0.000000e+00> : vector<16xf32>
    %15 = vector.multi_reduction <add>, %14, %cst_7 [0] : vector<122x16xf32> to vector<16xf32>
    %16 = vector.shape_cast %15 : vector<16xf32> to vector<1x16xf32>
    %cst_8 = arith.constant 0.00819672085 : f32
    %17 = vector.broadcast %cst_8 : f32 to vector<1x16xf32>
    %18 = arith.mulf %16, %17 : vector<1x16xf32>
    %19 = arith.mulf %13, %13 : vector<1x16xf32>
    %20 = arith.subf %18, %19 : vector<1x16xf32>
    %cst_9 = arith.constant 0.000000e+00 : f32
    %21 = vector.broadcast %cst_9 : f32 to vector<1x16xf32>
    %22 = arith.maximumf %20, %21 : vector<1x16xf32>
    %23 = vector.broadcast %13 : vector<1x16xf32> to vector<122x16xf32>
    %24 = arith.subf %9, %23 : vector<122x16xf32>
    %cst_10 = arith.constant 9.99999974E-6 : f32
    %25 = vector.broadcast %cst_10 : f32 to vector<1x16xf32>
    %26 = arith.addf %22, %25 : vector<1x16xf32>
    %27 = math.rsqrt %26 : vector<1x16xf32>
    %28 = vector.broadcast %27 : vector<1x16xf32> to vector<122x16xf32>
    %29 = arith.mulf %24, %28 : vector<122x16xf32>
    %30 = vector.broadcast %2 : vector<1x16xf32> to vector<122x16xf32>
    %31 = arith.mulf %29, %30 : vector<122x16xf32>
    %32 = vector.broadcast %3 : vector<1x16xf32> to vector<122x16xf32>
    %33 = arith.addf %31, %32 : vector<122x16xf32>
    %cst_11 = arith.constant 0.000000e+00 : f32
    %34 = vector.broadcast %cst_11 : f32 to vector<122x16xf32>
    %35 = arith.maximumf %33, %34 : vector<122x16xf32>
    %36 = arith.truncf %35 : vector<122x16xf32> to vector<122x16xbf16>
    %cst_12 = arith.constant 0.000000e+00 : bf16
    %37 = vector.broadcast %cst_12 : bf16 to vector<16x16xbf16>
    %c0_13 = arith.constant 0 : index
    %c0_14 = arith.constant 0 : index
    %38 = vector.load %arg7[%c0_13, %c0_14] : memref<120x16xbf16, #tpu.memory_space<vmem>>, vector<16x16xbf16>
    tpu.vector_store %arg7[%c0_13, %c0_14], %37 {strides = array<i32>} : memref<120x16xbf16, #tpu.memory_space<vmem>>, vector<16x16xbf16>,
    %cst_15 = arith.constant 0.000000e+00 : bf16
    %39 = vector.broadcast %cst_15 : bf16 to vector<17x16xbf16>
    %c47 = arith.constant 47 : index
    %c0_16 = arith.constant 0 : index
    %40 = vector.load %arg7[%c47, %c0_16] : memref<120x16xbf16, #tpu.memory_space<vmem>>, vector<17x16xbf16>
    tpu.vector_store %arg7[%c47, %c0_16], %39 {strides = array<i32>} : memref<120x16xbf16, #tpu.memory_space<vmem>>, vector<17x16xbf16>,
    %cst_17 = arith.constant 0.000000e+00 : bf16
    %41 = vector.broadcast %cst_17 : bf16 to vector<25x16xbf16>
    %c95 = arith.constant 95 : index
    %c0_18 = arith.constant 0 : index
    %42 = vector.load %arg7[%c95, %c0_18] : memref<120x16xbf16, #tpu.memory_space<vmem>>, vector<25x16xbf16>
    tpu.vector_store %arg7[%c95, %c0_18], %41 {strides = array<i32>} : memref<120x16xbf16, #tpu.memory_space<vmem>>, vector<25x16xbf16>,
    %cst_19 = arith.constant 0.000000e+00 : bf16
    %43 = vector.broadcast %cst_19 : bf16 to vector<16x16xbf16>
    %c0_20 = arith.constant 0 : index
    %c0_21 = arith.constant 0 : index
    %44 = vector.load %arg8[%c0_20, %c0_21] : memref<120x16xbf16, #tpu.memory_space<vmem>>, vector<16x16xbf16>
    tpu.vector_store %arg8[%c0_20, %c0_21], %43 {strides = array<i32>} : memref<120x16xbf16, #tpu.memory_space<vmem>>, vector<16x16xbf16>,
    %cst_22 = arith.constant 0.000000e+00 : bf16
    %45 = vector.broadcast %cst_22 : bf16 to vector<18x16xbf16>
    %c46 = arith.constant 46 : index
    %c0_23 = arith.constant 0 : index
    %46 = vector.load %arg8[%c46, %c0_23] : memref<120x16xbf16, #tpu.memory_space<vmem>>, vector<18x16xbf16>
    tpu.vector_store %arg8[%c46, %c0_23], %45 {strides = array<i32>} : memref<120x16xbf16, #tpu.memory_space<vmem>>, vector<18x16xbf16>,
    %cst_24 = arith.constant 0.000000e+00 : bf16
    %47 = vector.broadcast %cst_24 : bf16 to vector<26x16xbf16>
    %c94 = arith.constant 94 : index
    %c0_25 = arith.constant 0 : index
    %48 = vector.load %arg8[%c94, %c0_25] : memref<120x16xbf16, #tpu.memory_space<vmem>>, vector<26x16xbf16>
    tpu.vector_store %arg8[%c94, %c0_25], %47 {strides = array<i32>} : memref<120x16xbf16, #tpu.memory_space<vmem>>, vector<26x16xbf16>,
    %49 = vector.extract_strided_slice %36 {offsets = [0, 0], sizes = [31, 16], strides = [1, 1]} : vector<122x16xbf16> to vector<31x16xbf16>
    %c16 = arith.constant 16 : index
    %c0_26 = arith.constant 0 : index
    %50 = vector.load %arg7[%c16, %c0_26] : memref<120x16xbf16, #tpu.memory_space<vmem>>, vector<31x16xbf16>
    tpu.vector_store %arg7[%c16, %c0_26], %49 {strides = array<i32>} : memref<120x16xbf16, #tpu.memory_space<vmem>>, vector<31x16xbf16>,
    %51 = vector.extract_strided_slice %36 {offsets = [31, 0], sizes = [30, 16], strides = [1, 1]} : vector<122x16xbf16> to vector<30x16xbf16>
    %c16_27 = arith.constant 16 : index
    %c0_28 = arith.constant 0 : index
    %52 = vector.load %arg8[%c16_27, %c0_28] : memref<120x16xbf16, #tpu.memory_space<vmem>>, vector<30x16xbf16>
    tpu.vector_store %arg8[%c16_27, %c0_28], %51 {strides = array<i32>} : memref<120x16xbf16, #tpu.memory_space<vmem>>, vector<30x16xbf16>,
    %53 = vector.extract_strided_slice %36 {offsets = [61, 0], sizes = [31, 16], strides = [1, 1]} : vector<122x16xbf16> to vector<31x16xbf16>
    %c64 = arith.constant 64 : index
    %c0_29 = arith.constant 0 : index
    %54 = vector.load %arg7[%c64, %c0_29] : memref<120x16xbf16, #tpu.memory_space<vmem>>, vector<31x16xbf16>
    tpu.vector_store %arg7[%c64, %c0_29], %53 {strides = array<i32>} : memref<120x16xbf16, #tpu.memory_space<vmem>>, vector<31x16xbf16>,
    %55 = vector.extract_strided_slice %36 {offsets = [92, 0], sizes = [30, 16], strides = [1, 1]} : vector<122x16xbf16> to vector<30x16xbf16>
    %c64_30 = arith.constant 64 : index
    %c0_31 = arith.constant 0 : index
    %56 = vector.load %arg8[%c64_30, %c0_31] : memref<120x16xbf16, #tpu.memory_space<vmem>>, vector<30x16xbf16>
    tpu.vector_store %arg8[%c64_30, %c0_31], %55 {strides = array<i32>} : memref<120x16xbf16, #tpu.memory_space<vmem>>, vector<30x16xbf16>,
    %c14 = arith.constant 14 : index
    %c0_32 = arith.constant 0 : index
    %57 = vector.load %arg7[%c14, %c0_32] : memref<120x16xbf16, #tpu.memory_space<vmem>>, vector<96x16xbf16>
    %c0_33 = arith.constant 0 : index
    %c0_34 = arith.constant 0 : index
    %c0_35 = arith.constant 0 : index
    %58 = vector.load %arg3[%c0_33, %c0_34, %c0_35] : memref<16x16x32xbf16, #tpu.memory_space<vmem>>, vector<1x16x32xbf16>
    %59 = vector.shape_cast %58 : vector<1x16x32xbf16> to vector<16x32xbf16>
    %cst_36 = arith.constant dense<0.000000e+00> : vector<96x32xf32>
    %60 = tpu.matmul %57, %59, %cst_36 {dimension_numbers = #tpu.dot_dimension_numbers<[1], [0], [0], [1], [0, 0, 1, 1], [], []>} : vector<96x16xbf16>, vector<16x32xbf16>, vector<96x32xf32> -> vector<96x32xf32>
    %c14_37 = arith.constant 14 : index
    %c0_38 = arith.constant 0 : index
    %61 = vector.load %arg8[%c14_37, %c0_38] : memref<120x16xbf16, #tpu.memory_space<vmem>>, vector<96x16xbf16>
    %c1 = arith.constant 1 : index
    %c0_39 = arith.constant 0 : index
    %c0_40 = arith.constant 0 : index
    %62 = vector.load %arg3[%c1, %c0_39, %c0_40] : memref<16x16x32xbf16, #tpu.memory_space<vmem>>, vector<1x16x32xbf16>
    %63 = vector.shape_cast %62 : vector<1x16x32xbf16> to vector<16x32xbf16>
    %cst_41 = arith.constant dense<0.000000e+00> : vector<96x32xf32>
    %64 = tpu.matmul %61, %63, %cst_41 {dimension_numbers = #tpu.dot_dimension_numbers<[1], [0], [0], [1], [0, 0, 1, 1], [], []>} : vector<96x16xbf16>, vector<16x32xbf16>, vector<96x32xf32> -> vector<96x32xf32>
    %65 = arith.addf %60, %64 : vector<96x32xf32>
    %c15 = arith.constant 15 : index
    %c0_42 = arith.constant 0 : index
    %66 = vector.load %arg7[%c15, %c0_42] : memref<120x16xbf16, #tpu.memory_space<vmem>>, vector<96x16xbf16>
    %c2 = arith.constant 2 : index
    %c0_43 = arith.constant 0 : index
    %c0_44 = arith.constant 0 : index
    %67 = vector.load %arg3[%c2, %c0_43, %c0_44] : memref<16x16x32xbf16, #tpu.memory_space<vmem>>, vector<1x16x32xbf16>
    %68 = vector.shape_cast %67 : vector<1x16x32xbf16> to vector<16x32xbf16>
    %cst_45 = arith.constant dense<0.000000e+00> : vector<96x32xf32>
    %69 = tpu.matmul %66, %68, %cst_45 {dimension_numbers = #tpu.dot_dimension_numbers<[1], [0], [0], [1], [0, 0, 1, 1], [], []>} : vector<96x16xbf16>, vector<16x32xbf16>, vector<96x32xf32> -> vector<96x32xf32>
    %70 = arith.addf %65, %69 : vector<96x32xf32>
    %c15_46 = arith.constant 15 : index
    %c0_47 = arith.constant 0 : index
    %71 = vector.load %arg8[%c15_46, %c0_47] : memref<120x16xbf16, #tpu.memory_space<vmem>>, vector<96x16xbf16>
    %c3 = arith.constant 3 : index
    %c0_48 = arith.constant 0 : index
    %c0_49 = arith.constant 0 : index
    %72 = vector.load %arg3[%c3, %c0_48, %c0_49] : memref<16x16x32xbf16, #tpu.memory_space<vmem>>, vector<1x16x32xbf16>
    %73 = vector.shape_cast %72 : vector<1x16x32xbf16> to vector<16x32xbf16>
    %cst_50 = arith.constant dense<0.000000e+00> : vector<96x32xf32>
    %74 = tpu.matmul %71, %73, %cst_50 {dimension_numbers = #tpu.dot_dimension_numbers<[1], [0], [0], [1], [0, 0, 1, 1], [], []>} : vector<96x16xbf16>, vector<16x32xbf16>, vector<96x32xf32> -> vector<96x32xf32>
    %75 = arith.addf %70, %74 : vector<96x32xf32>
    %c16_51 = arith.constant 16 : index
    %c0_52 = arith.constant 0 : index
    %76 = vector.load %arg7[%c16_51, %c0_52] : memref<120x16xbf16, #tpu.memory_space<vmem>>, vector<96x16xbf16>
    %c4 = arith.constant 4 : index
    %c0_53 = arith.constant 0 : index
    %c0_54 = arith.constant 0 : index
    %77 = vector.load %arg3[%c4, %c0_53, %c0_54] : memref<16x16x32xbf16, #tpu.memory_space<vmem>>, vector<1x16x32xbf16>
    %78 = vector.shape_cast %77 : vector<1x16x32xbf16> to vector<16x32xbf16>
    %cst_55 = arith.constant dense<0.000000e+00> : vector<96x32xf32>
    %79 = tpu.matmul %76, %78, %cst_55 {dimension_numbers = #tpu.dot_dimension_numbers<[1], [0], [0], [1], [0, 0, 1, 1], [], []>} : vector<96x16xbf16>, vector<16x32xbf16>, vector<96x32xf32> -> vector<96x32xf32>
    %80 = arith.addf %75, %79 : vector<96x32xf32>
    %c16_56 = arith.constant 16 : index
    %c0_57 = arith.constant 0 : index
    %81 = vector.load %arg8[%c16_56, %c0_57] : memref<120x16xbf16, #tpu.memory_space<vmem>>, vector<96x16xbf16>
    %c5 = arith.constant 5 : index
    %c0_58 = arith.constant 0 : index
    %c0_59 = arith.constant 0 : index
    %82 = vector.load %arg3[%c5, %c0_58, %c0_59] : memref<16x16x32xbf16, #tpu.memory_space<vmem>>, vector<1x16x32xbf16>
    %83 = vector.shape_cast %82 : vector<1x16x32xbf16> to vector<16x32xbf16>
    %cst_60 = arith.constant dense<0.000000e+00> : vector<96x32xf32>
    %84 = tpu.matmul %81, %83, %cst_60 {dimension_numbers = #tpu.dot_dimension_numbers<[1], [0], [0], [1], [0, 0, 1, 1], [], []>} : vector<96x16xbf16>, vector<16x32xbf16>, vector<96x32xf32> -> vector<96x32xf32>
    %85 = arith.addf %80, %84 : vector<96x32xf32>
    %c17 = arith.constant 17 : index
    %c0_61 = arith.constant 0 : index
    %86 = vector.load %arg7[%c17, %c0_61] : memref<120x16xbf16, #tpu.memory_space<vmem>>, vector<96x16xbf16>
    %c6 = arith.constant 6 : index
    %c0_62 = arith.constant 0 : index
    %c0_63 = arith.constant 0 : index
    %87 = vector.load %arg3[%c6, %c0_62, %c0_63] : memref<16x16x32xbf16, #tpu.memory_space<vmem>>, vector<1x16x32xbf16>
    %88 = vector.shape_cast %87 : vector<1x16x32xbf16> to vector<16x32xbf16>
    %cst_64 = arith.constant dense<0.000000e+00> : vector<96x32xf32>
    %89 = tpu.matmul %86, %88, %cst_64 {dimension_numbers = #tpu.dot_dimension_numbers<[1], [0], [0], [1], [0, 0, 1, 1], [], []>} : vector<96x16xbf16>, vector<16x32xbf16>, vector<96x32xf32> -> vector<96x32xf32>
    %90 = arith.addf %85, %89 : vector<96x32xf32>
    %c17_65 = arith.constant 17 : index
    %c0_66 = arith.constant 0 : index
    %91 = vector.load %arg8[%c17_65, %c0_66] : memref<120x16xbf16, #tpu.memory_space<vmem>>, vector<96x16xbf16>
    %c7 = arith.constant 7 : index
    %c0_67 = arith.constant 0 : index
    %c0_68 = arith.constant 0 : index
    %92 = vector.load %arg3[%c7, %c0_67, %c0_68] : memref<16x16x32xbf16, #tpu.memory_space<vmem>>, vector<1x16x32xbf16>
    %93 = vector.shape_cast %92 : vector<1x16x32xbf16> to vector<16x32xbf16>
    %cst_69 = arith.constant dense<0.000000e+00> : vector<96x32xf32>
    %94 = tpu.matmul %91, %93, %cst_69 {dimension_numbers = #tpu.dot_dimension_numbers<[1], [0], [0], [1], [0, 0, 1, 1], [], []>} : vector<96x16xbf16>, vector<16x32xbf16>, vector<96x32xf32> -> vector<96x32xf32>
    %95 = arith.addf %90, %94 : vector<96x32xf32>
    %c18 = arith.constant 18 : index
    %c0_70 = arith.constant 0 : index
    %96 = vector.load %arg7[%c18, %c0_70] : memref<120x16xbf16, #tpu.memory_space<vmem>>, vector<96x16xbf16>
    %c8 = arith.constant 8 : index
    %c0_71 = arith.constant 0 : index
    %c0_72 = arith.constant 0 : index
    %97 = vector.load %arg3[%c8, %c0_71, %c0_72] : memref<16x16x32xbf16, #tpu.memory_space<vmem>>, vector<1x16x32xbf16>
    %98 = vector.shape_cast %97 : vector<1x16x32xbf16> to vector<16x32xbf16>
    %cst_73 = arith.constant dense<0.000000e+00> : vector<96x32xf32>
    %99 = tpu.matmul %96, %98, %cst_73 {dimension_numbers = #tpu.dot_dimension_numbers<[1], [0], [0], [1], [0, 0, 1, 1], [], []>} : vector<96x16xbf16>, vector<16x32xbf16>, vector<96x32xf32> -> vector<96x32xf32>
    %100 = arith.addf %95, %99 : vector<96x32xf32>
    %c18_74 = arith.constant 18 : index
    %c0_75 = arith.constant 0 : index
    %101 = vector.load %arg8[%c18_74, %c0_75] : memref<120x16xbf16, #tpu.memory_space<vmem>>, vector<96x16xbf16>
    %c9 = arith.constant 9 : index
    %c0_76 = arith.constant 0 : index
    %c0_77 = arith.constant 0 : index
    %102 = vector.load %arg3[%c9, %c0_76, %c0_77] : memref<16x16x32xbf16, #tpu.memory_space<vmem>>, vector<1x16x32xbf16>
    %103 = vector.shape_cast %102 : vector<1x16x32xbf16> to vector<16x32xbf16>
    %cst_78 = arith.constant dense<0.000000e+00> : vector<96x32xf32>
    %104 = tpu.matmul %101, %103, %cst_78 {dimension_numbers = #tpu.dot_dimension_numbers<[1], [0], [0], [1], [0, 0, 1, 1], [], []>} : vector<96x16xbf16>, vector<16x32xbf16>, vector<96x32xf32> -> vector<96x32xf32>
    %105 = arith.addf %100, %104 : vector<96x32xf32>
    %c19 = arith.constant 19 : index
    %c0_79 = arith.constant 0 : index
    %106 = vector.load %arg7[%c19, %c0_79] : memref<120x16xbf16, #tpu.memory_space<vmem>>, vector<96x16xbf16>
    %c10 = arith.constant 10 : index
    %c0_80 = arith.constant 0 : index
    %c0_81 = arith.constant 0 : index
    %107 = vector.load %arg3[%c10, %c0_80, %c0_81] : memref<16x16x32xbf16, #tpu.memory_space<vmem>>, vector<1x16x32xbf16>
    %108 = vector.shape_cast %107 : vector<1x16x32xbf16> to vector<16x32xbf16>
    %cst_82 = arith.constant dense<0.000000e+00> : vector<96x32xf32>
    %109 = tpu.matmul %106, %108, %cst_82 {dimension_numbers = #tpu.dot_dimension_numbers<[1], [0], [0], [1], [0, 0, 1, 1], [], []>} : vector<96x16xbf16>, vector<16x32xbf16>, vector<96x32xf32> -> vector<96x32xf32>
    %110 = arith.addf %105, %109 : vector<96x32xf32>
    %c19_83 = arith.constant 19 : index
    %c0_84 = arith.constant 0 : index
    %111 = vector.load %arg8[%c19_83, %c0_84] : memref<120x16xbf16, #tpu.memory_space<vmem>>, vector<96x16xbf16>
    %c11 = arith.constant 11 : index
    %c0_85 = arith.constant 0 : index
    %c0_86 = arith.constant 0 : index
    %112 = vector.load %arg3[%c11, %c0_85, %c0_86] : memref<16x16x32xbf16, #tpu.memory_space<vmem>>, vector<1x16x32xbf16>
    %113 = vector.shape_cast %112 : vector<1x16x32xbf16> to vector<16x32xbf16>
    %cst_87 = arith.constant dense<0.000000e+00> : vector<96x32xf32>
    %114 = tpu.matmul %111, %113, %cst_87 {dimension_numbers = #tpu.dot_dimension_numbers<[1], [0], [0], [1], [0, 0, 1, 1], [], []>} : vector<96x16xbf16>, vector<16x32xbf16>, vector<96x32xf32> -> vector<96x32xf32>
    %115 = arith.addf %110, %114 : vector<96x32xf32>
    %c20 = arith.constant 20 : index
    %c0_88 = arith.constant 0 : index
    %116 = vector.load %arg7[%c20, %c0_88] : memref<120x16xbf16, #tpu.memory_space<vmem>>, vector<96x16xbf16>
    %c12 = arith.constant 12 : index
    %c0_89 = arith.constant 0 : index
    %c0_90 = arith.constant 0 : index
    %117 = vector.load %arg3[%c12, %c0_89, %c0_90] : memref<16x16x32xbf16, #tpu.memory_space<vmem>>, vector<1x16x32xbf16>
    %118 = vector.shape_cast %117 : vector<1x16x32xbf16> to vector<16x32xbf16>
    %cst_91 = arith.constant dense<0.000000e+00> : vector<96x32xf32>
    %119 = tpu.matmul %116, %118, %cst_91 {dimension_numbers = #tpu.dot_dimension_numbers<[1], [0], [0], [1], [0, 0, 1, 1], [], []>} : vector<96x16xbf16>, vector<16x32xbf16>, vector<96x32xf32> -> vector<96x32xf32>
    %120 = arith.addf %115, %119 : vector<96x32xf32>
    %c20_92 = arith.constant 20 : index
    %c0_93 = arith.constant 0 : index
    %121 = vector.load %arg8[%c20_92, %c0_93] : memref<120x16xbf16, #tpu.memory_space<vmem>>, vector<96x16xbf16>
    %c13 = arith.constant 13 : index
    %c0_94 = arith.constant 0 : index
    %c0_95 = arith.constant 0 : index
    %122 = vector.load %arg3[%c13, %c0_94, %c0_95] : memref<16x16x32xbf16, #tpu.memory_space<vmem>>, vector<1x16x32xbf16>
    %123 = vector.shape_cast %122 : vector<1x16x32xbf16> to vector<16x32xbf16>
    %cst_96 = arith.constant dense<0.000000e+00> : vector<96x32xf32>
    %124 = tpu.matmul %121, %123, %cst_96 {dimension_numbers = #tpu.dot_dimension_numbers<[1], [0], [0], [1], [0, 0, 1, 1], [], []>} : vector<96x16xbf16>, vector<16x32xbf16>, vector<96x32xf32> -> vector<96x32xf32>
    %125 = arith.addf %120, %124 : vector<96x32xf32>
    %c21 = arith.constant 21 : index
    %c0_97 = arith.constant 0 : index
    %126 = vector.load %arg7[%c21, %c0_97] : memref<120x16xbf16, #tpu.memory_space<vmem>>, vector<96x16xbf16>
    %c14_98 = arith.constant 14 : index
    %c0_99 = arith.constant 0 : index
    %c0_100 = arith.constant 0 : index
    %127 = vector.load %arg3[%c14_98, %c0_99, %c0_100] : memref<16x16x32xbf16, #tpu.memory_space<vmem>>, vector<1x16x32xbf16>
    %128 = vector.shape_cast %127 : vector<1x16x32xbf16> to vector<16x32xbf16>
    %cst_101 = arith.constant dense<0.000000e+00> : vector<96x32xf32>
    %129 = tpu.matmul %126, %128, %cst_101 {dimension_numbers = #tpu.dot_dimension_numbers<[1], [0], [0], [1], [0, 0, 1, 1], [], []>} : vector<96x16xbf16>, vector<16x32xbf16>, vector<96x32xf32> -> vector<96x32xf32>
    %130 = arith.addf %125, %129 : vector<96x32xf32>
    %c21_102 = arith.constant 21 : index
    %c0_103 = arith.constant 0 : index
    %131 = vector.load %arg8[%c21_102, %c0_103] : memref<120x16xbf16, #tpu.memory_space<vmem>>, vector<96x16xbf16>
    %c15_104 = arith.constant 15 : index
    %c0_105 = arith.constant 0 : index
    %c0_106 = arith.constant 0 : index
    %132 = vector.load %arg3[%c15_104, %c0_105, %c0_106] : memref<16x16x32xbf16, #tpu.memory_space<vmem>>, vector<1x16x32xbf16>
    %133 = vector.shape_cast %132 : vector<1x16x32xbf16> to vector<16x32xbf16>
    %cst_107 = arith.constant dense<0.000000e+00> : vector<96x32xf32>
    %134 = tpu.matmul %131, %133, %cst_107 {dimension_numbers = #tpu.dot_dimension_numbers<[1], [0], [0], [1], [0, 0, 1, 1], [], []>} : vector<96x16xbf16>, vector<16x32xbf16>, vector<96x32xf32> -> vector<96x32xf32>
    %135 = arith.addf %130, %134 : vector<96x32xf32>
    %136 = vector.extract_strided_slice %135 {offsets = [0, 0], sizes = [27, 32], strides = [1, 1]} : vector<96x32xf32> to vector<27x32xf32>
    %cst_108 = arith.constant dense<0.000000e+00> : vector<32xf32>
    %137 = vector.multi_reduction <add>, %136, %cst_108 [0] : vector<27x32xf32> to vector<32xf32>
    %138 = vector.shape_cast %137 : vector<32xf32> to vector<1x32xf32>
    %139 = arith.mulf %136, %136 : vector<27x32xf32>
    %cst_109 = arith.constant dense<0.000000e+00> : vector<32xf32>
    %140 = vector.multi_reduction <add>, %139, %cst_109 [0] : vector<27x32xf32> to vector<32xf32>
    %141 = vector.shape_cast %140 : vector<32xf32> to vector<1x32xf32>
    %142 = vector.extract_strided_slice %135 {offsets = [48, 0], sizes = [27, 32], strides = [1, 1]} : vector<96x32xf32> to vector<27x32xf32>
    %cst_110 = arith.constant dense<0.000000e+00> : vector<32xf32>
    %143 = vector.multi_reduction <add>, %142, %cst_110 [0] : vector<27x32xf32> to vector<32xf32>
    %144 = vector.shape_cast %143 : vector<32xf32> to vector<1x32xf32>
    %145 = arith.mulf %142, %142 : vector<27x32xf32>
    %cst_111 = arith.constant dense<0.000000e+00> : vector<32xf32>
    %146 = vector.multi_reduction <add>, %145, %cst_111 [0] : vector<27x32xf32> to vector<32xf32>
    %147 = vector.shape_cast %146 : vector<32xf32> to vector<1x32xf32>
    %148 = arith.addf %138, %144 : vector<1x32xf32>
    %149 = arith.addf %141, %147 : vector<1x32xf32>
    %cst_112 = arith.constant 0.0185185187 : f32
    %150 = vector.broadcast %cst_112 : f32 to vector<1x32xf32>
    %151 = arith.mulf %148, %150 : vector<1x32xf32>
    %cst_113 = arith.constant 0.0185185187 : f32
    %152 = vector.broadcast %cst_113 : f32 to vector<1x32xf32>
    %153 = arith.mulf %149, %152 : vector<1x32xf32>
    %154 = arith.mulf %151, %151 : vector<1x32xf32>
    %155 = arith.subf %153, %154 : vector<1x32xf32>
    %cst_114 = arith.constant 0.000000e+00 : f32
    %156 = vector.broadcast %cst_114 : f32 to vector<1x32xf32>
    %157 = arith.maximumf %155, %156 : vector<1x32xf32>
    %158 = vector.broadcast %151 : vector<1x32xf32> to vector<96x32xf32>
    %159 = arith.subf %135, %158 : vector<96x32xf32>
    %cst_115 = arith.constant 9.99999974E-6 : f32
    %160 = vector.broadcast %cst_115 : f32 to vector<1x32xf32>
    %161 = arith.addf %157, %160 : vector<1x32xf32>
    %162 = math.rsqrt %161 : vector<1x32xf32>
    %163 = vector.broadcast %162 : vector<1x32xf32> to vector<96x32xf32>
    %164 = arith.mulf %159, %163 : vector<96x32xf32>
    %165 = vector.broadcast %4 : vector<1x32xf32> to vector<96x32xf32>
    %166 = arith.mulf %164, %165 : vector<96x32xf32>
    %167 = vector.broadcast %5 : vector<1x32xf32> to vector<96x32xf32>
    %168 = arith.addf %166, %167 : vector<96x32xf32>
    %cst_116 = arith.constant 0.000000e+00 : f32
    %169 = vector.broadcast %cst_116 : f32 to vector<96x32xf32>
    %170 = arith.maximumf %168, %169 : vector<96x32xf32>
    %c0_117 = arith.constant 0 : index
    %c0_118 = arith.constant 0 : index
    %c0_119 = arith.constant 0 : index
    %171 = vector.load %arg4[%c0_117, %c0_118, %c0_119] : memref<2x96x32xf32, #tpu.memory_space<vmem>>, vector<1x96x32xf32>
    %172 = vector.shape_cast %171 : vector<1x96x32xf32> to vector<96x32xf32>
    %173 = arith.mulf %170, %172 : vector<96x32xf32>
    %cst_120 = arith.constant dense<0.000000e+00> : vector<96xf32>
    %174 = vector.multi_reduction <add>, %173, %cst_120 [1] : vector<96x32xf32> to vector<96xf32>
    %175 = vector.shape_cast %174 : vector<96xf32> to vector<96x1xf32>
    %c1_121 = arith.constant 1 : index
    %c0_122 = arith.constant 0 : index
    %c0_123 = arith.constant 0 : index
    %176 = vector.load %arg4[%c1_121, %c0_122, %c0_123] : memref<2x96x32xf32, #tpu.memory_space<vmem>>, vector<1x96x32xf32>
    %177 = vector.shape_cast %176 : vector<1x96x32xf32> to vector<96x32xf32>
    %178 = arith.mulf %170, %177 : vector<96x32xf32>
    %cst_124 = arith.constant dense<0.000000e+00> : vector<96xf32>
    %179 = vector.multi_reduction <add>, %178, %cst_124 [1] : vector<96x32xf32> to vector<96xf32>
    %180 = vector.shape_cast %179 : vector<96xf32> to vector<96x1xf32>
    %181 = tpu.concatenate %175, %180 in 1 : vector<96x1xf32>, vector<96x1xf32> -> vector<96x2xf32>
    %cst_125 = arith.constant dense<0.000000e+00> : vector<2x2xf32>
    %182 = tpu.matmul %1, %181, %cst_125 {dimension_numbers = #tpu.dot_dimension_numbers<[1], [0], [0], [1], [0, 0, 1, 1], [], []>} : vector<2x96xf32>, vector<96x2xf32>, vector<2x2xf32> -> vector<2x2xf32>
    %183 = vector.broadcast %6 : vector<1x2xf32> to vector<2x2xf32>
    %184 = arith.addf %182, %183 : vector<2x2xf32>
    %c0_126 = arith.constant 0 : index
    %c0_127 = arith.constant 0 : index
    %185 = vector.load %arg6[%c0_126, %c0_127] : memref<2x2xf32, #tpu.memory_space<vmem>>, vector<2x2xf32>
    tpu.vector_store %arg6[%c0_126, %c0_127], %184 {strides = array<i32>} : memref<2x2xf32, #tpu.memory_space<vmem>>, vector<2x2xf32>,
    return
  }
  func.func @transform_0(%arg0: i32) -> (i32, i32) {
    %c0_i32 = arith.constant 0 : i32
    %c0_i32_0 = arith.constant 0 : i32
    %c0_i32_1 = arith.constant 0 : i32
    return %c0_i32, %c0_i32_0 : i32, i32
  }
  func.func @transform_1(%arg0: i32) -> (i32, i32) {
    %c0_i32 = arith.constant 0 : i32
    %c0_i32_0 = arith.constant 0 : i32
    %c0_i32_1 = arith.constant 0 : i32
    return %c0_i32, %c0_i32_0 : i32, i32
  }
  func.func @transform_2(%arg0: i32) -> (i32, i32, i32) {
    %c0_i32 = arith.constant 0 : i32
    %c0_i32_0 = arith.constant 0 : i32
    %c0_i32_1 = arith.constant 0 : i32
    %c0_i32_2 = arith.constant 0 : i32
    return %c0_i32, %c0_i32_0, %c0_i32_1 : i32, i32, i32
  }
  func.func @transform_3(%arg0: i32) -> (i32, i32, i32) {
    %c0_i32 = arith.constant 0 : i32
    %c0_i32_0 = arith.constant 0 : i32
    %c0_i32_1 = arith.constant 0 : i32
    %c0_i32_2 = arith.constant 0 : i32
    return %c0_i32, %c0_i32_0, %c0_i32_1 : i32, i32, i32
  }
  func.func @transform_4(%arg0: i32) -> (i32, i32) {
    %c0_i32 = arith.constant 0 : i32
    %c0_i32_0 = arith.constant 0 : i32
    %c0_i32_1 = arith.constant 0 : i32
    return %c0_i32, %c0_i32_0 : i32, i32
  }
  func.func @transform_5(%arg0: i32) -> (i32, i32) {
    %c0_i32 = arith.constant 0 : i32
    %c0_i32_0 = arith.constant 0 : i32
    %c0_i32_1 = arith.constant 0 : i32
    return %c0_i32, %c0_i32_0 : i32, i32
  }
}

</mosaic_0001>

<bundles_post_ra>
// kernel: artifact_detector_forward.1
= control target key start
LH: loop header
LB: loop body
LE: loop exit
PB: predicated region body
PF: predicated region fallthrough
CT: control target
= control target key end

     0   :  { %s4885_s0 = inlined_call_operand.vmem [shape: bf16[122,32], index: 0, kind: input, shape index: {}]   ;;  %s4886_s1 = inlined_call_operand.vmem [shape: bf16[32,16], index: 1, kind: input, shape index: {}]   ;;  %s4887_s2 = inlined_call_operand.vmem [shape: bf16[16,16,32], index: 2, kind: input, shape index: {}]   ;;  %s4888_s3 = inlined_call_operand.vmem [shape: f32[2,96,32], index: 3, kind: input, shape index: {}]   ;;  %s4889_s4 = inlined_call_operand.vmem [shape: f32[8,128], index: 4, kind: input, shape index: {}]   ;;  %s4890_s5 = inlined_call_operand.hbm [shape: f32[2,2], index: 5, kind: output, shape index: {}]  }
   0x1   :  { %v3088_v0 = vld [vmem:[%s4886_s1 + $0x8] sm:$0xff] }
   0x2   :  { %10 = vsyncpa [#allocation5], 0  ;;  %126 = vmatpush.bf16.msra.mxu0 %v3088_v0  ;;  %v3087_v1 = vld [vmem:[%s4886_s1] sm:$0xff]  ;;  %vm95_vm0 = vcmask 261120   ;;  %v3080_v3 = vld [vmem:[%s4885_s0 + $0x8] sm:$0xff]  ;;  %vm169_vm1 = vcmask 130048  }
   0x3   :  { %v3079_v2 = vld [vmem:[%s4885_s0] sm:$0xff]  ;;  %v3081_v4 = vld [vmem:[%s4885_s0 + $0x10] sm:$0xff]  ;;  %v3082_v5 = vld [vmem:[%s4885_s0 + $0x18] sm:$0xff]  ;;  %vm199_vm2 = vcmask 123904   ;;  %vm378_vm3 = vcmask 125955   ;;  %vm375_vm9 = vcmask 125952  }
   0x4   :  { %v3083_v6 = vld [vmem:[%s4885_s0 + $0x20] sm:$0xff]  ;;  %v3084_v7 = vld [vmem:[%s4885_s0 + $0x28] sm:$0xff]  ;;  %v3085_v8 = vld [vmem:[%s4885_s0 + $0x30] sm:$0xff]  ;;  %vm379_vm4 = vsmask.f32 7950  ;;  %s2777_s15 = sshll.u32 %s4890_s5, 4  ;;  %s2778_s15 = int_to_ptr.hbm [resolvable:$true] %s2777_s15 }
   0x5   :  { %v2816_v9 = vld [vmem:[%s4885_s0 + $0x38] sm:$0xf]  ;;  %v3086_v10 = vld [vmem:[%s4885_s0 + $0x38] sm:$0x10]  ;;  %vm380_vm5 = vmand %vm378_vm3, %vm379_vm4  ;;  %vm406_vm10 = vsmask.f32 3328 }
   0x6   :  { %127 = vmatpush.bf16.msra.mxu0 %v3087_v1  ;;  %v2817_v11 = vor.u32 %v3086_v10, %v2816_v9  ;;  %vm411_vm11 = vsmask.f32 256  ;;  %vm412_vm12 = vsmask.f32 4368  ;;  %vm3571_vm13 = vmand %vm375_vm9, %vm406_vm10  ;;  %vm463_vm14 = vsmask.f32 1280 }
   0x7   :  { %vm464_vm15 = vsmask.f32 5392  ;;  %vm525_vm4 = vcmask 1045508   ;;  %vm612_vm10 = vcmask 1044480  }
   0x9   :  { %2826 = vmatmul.msk.bf16.vlgmr.msra.gmra.mxu0 %vm95_vm0, %v3079_v2 }
  0x19   :  { %2827 = vmatmul.msk.bf16.gmra.mxu0 %vm95_vm0, %v3080_v3 }
  0x29   :  { %2828 = vmatmul.msk.bf16.gmra.mxu0 %vm95_vm0, %v3081_v4 }
  0x39   :  { %2829 = vmatmul.msk.bf16.gmra.mxu0 %vm95_vm0, %v3082_v5 }
  0x49   :  { %2830 = vmatmul.msk.bf16.gmra.mxu0 %vm95_vm0, %v3083_v6 }
  0x59   :  { %2831 = vmatmul.msk.bf16.gmra.mxu0 %vm95_vm0, %v3084_v7 }
  0x69   :  { %2832 = vmatmul.msk.bf16.gmra.mxu0 %vm95_vm0, %v3085_v8 }
  0x79   :  { %2833 = vmatmul.msk.bf16.gmra.mxu0 %vm95_vm0, %v2817_v11 }
  0x86   :  { %v3368_v12 = vpop.f32.mrf.mxu0 }
  0x87   :  { %v209_v25 = vmul.f32 %v3368_v12, %v3368_v12  ;;  %v170_v28 = vsel %vm169_vm1, %v3368_v12, 0.0 }
  0x89   :  { %v225_v33 = vsel %vm169_vm1, %v209_v25, 0.0 }
  0x8e   :  { %v3370_v13 = vpop.f32.mrf.mxu0 }
  0x8f   :  { %v210_v24 = vmul.f32 %v3370_v13, %v3370_v13  ;;  %v171_v26 = vsel %vm169_vm1, %v3370_v13, 0.0 }
  0x90   :  { %v172_v32 = vadd.f32 %v171_v26, %v170_v28 }
  0x91   :  { %v226_v29 = vsel %vm169_vm1, %v210_v24, 0.0 }
  0x92   :  { %v227_v38 = vadd.f32 %v226_v29, %v225_v33 }
  0x96   :  { %v3372_v14 = vpop.f32.mrf.mxu0 }
  0x97   :  { %v211_v27 = vmul.f32 %v3372_v14, %v3372_v14  ;;  %v173_v30 = vsel %vm169_vm1, %v3372_v14, 0.0 }
  0x98   :  { %v174_v37 = vadd.f32 %v173_v30, %v172_v32 }
  0x99   :  { %v228_v34 = vsel %vm169_vm1, %v211_v27, 0.0 }
  0x9a   :  { %v229_v43 = vadd.f32 %v228_v34, %v227_v38 }
  0x9e   :  { %v3374_v15 = vpop.f32.mrf.mxu0 }
  0x9f   :  { %v212_v31 = vmul.f32 %v3374_v15, %v3374_v15  ;;  %v175_v35 = vsel %vm169_vm1, %v3374_v15, 0.0 }
  0xa0   :  { %v176_v44 = vadd.f32 %v175_v35, %v174_v37 }
  0xa1   :  { %v230_v40 = vsel %vm169_vm1, %v212_v31, 0.0 }
  0xa2   :  { %v231_v49 = vadd.f32 %v230_v40, %v229_v43 }
  0xa6   :  { %v3376_v16 = vpop.f32.mrf.mxu0 }
  0xa7   :  { %v213_v36 = vmul.f32 %v3376_v16, %v3376_v16  ;;  %v177_v41 = vsel %vm169_vm1, %v3376_v16, 0.0 }
  0xa8   :  { %v178_v48 = vadd.f32 %v177_v41, %v176_v44 }
  0xa9   :  { %v232_v45 = vsel %vm169_vm1, %v213_v36, 0.0 }
  0xaa   :  { %v233_v53 = vadd.f32 %v232_v45, %v231_v49 }
  0xae   :  { %v3378_v17 = vpop.f32.mrf.mxu0 }
  0xaf   :  { %v214_v42 = vmul.f32 %v3378_v17, %v3378_v17  ;;  %v179_v46 = vsel %vm169_vm1, %v3378_v17, 0.0 }
  0xb0   :  { %v180_v54 = vadd.f32 %v179_v46, %v178_v48 }
  0xb1   :  { %v234_v50 = vsel %vm169_vm1, %v214_v42, 0.0 }
  0xb2   :  { %v235_v59 = vadd.f32 %v234_v50, %v233_v53 }
  0xb6   :  { %v3380_v18 = vpop.f32.mrf.mxu0 }
  0xb7   :  { %v215_v47 = vmul.f32 %v3380_v18, %v3380_v18  ;;  %v181_v51 = vsel %vm169_vm1, %v3380_v18, 0.0 }
  0xb8   :  { %v182_v58 = vadd.f32 %v181_v51, %v180_v54 }
  0xb9   :  { %v236_v55 = vsel %vm169_vm1, %v215_v47, 0.0 }
  0xba   :  { %v237_v0 = vadd.f32 %v236_v55, %v235_v59 }
  0xbe   :  { %v3382_v19 = vpop.f32.mrf.mxu0 }
  0xbf   :  { %v216_v52 = vmul.f32 %v3382_v19, %v3382_v19  ;;  %v183_v56 = vsel %vm169_vm1, %v3382_v19, 0.0 }
  0xc0   :  { %v184_v1 = vadd.f32 %v183_v56, %v182_v58 }
  0xc1   :  { %v238_v61 = vsel %vm169_vm1, %v216_v52, 0.0 }
  0xc2   :  { %v239_v6 = vadd.f32 %v238_v61, %v237_v0 }
  0xc6   :  { %v3384_v20 = vpop.f32.mrf.mxu0 }
  0xc7   :  { %v217_v57 = vmul.f32 %v3384_v20, %v3384_v20  ;;  %v185_v62 = vsel %vm169_vm1, %v3384_v20, 0.0 }
  0xc8   :  { %v186_v5 = vadd.f32 %v185_v62, %v184_v1 }
  0xc9   :  { %v240_v2 = vsel %vm169_vm1, %v217_v57, 0.0 }
  0xca   :  { %v241_v10 = vadd.f32 %v240_v2, %v239_v6 }
  0xce   :  { %v3386_v21 = vpop.f32.mrf.mxu0 }
  0xcf   :  { %v218_v63 = vmul.f32 %v3386_v21, %v3386_v21  ;;  %v187_v3 = vsel %vm169_vm1, %v3386_v21, 0.0 }
  0xd0   :  { %v188_v11 = vadd.f32 %v187_v3, %v186_v5 }
  0xd1   :  { %v242_v7 = vsel %vm169_vm1, %v218_v63, 0.0 }
  0xd2   :  { %v243_v28 = vadd.f32 %v242_v7, %v241_v10 }
  0xd6   :  { %v3388_v22 = vpop.f32.mrf.mxu0 }
  0xd7   :  { %v219_v4 = vmul.f32 %v3388_v22, %v3388_v22  ;;  %v189_v8 = vsel %vm169_vm1, %v3388_v22, 0.0 }
  0xd8   :  { %v190_v27 = vadd.f32 %v189_v8, %v188_v11  ;;  %v381_v8 = vld [vmem:[#allocation2 + $0x14] sm:$0x8] }
  0xd9   :  { %v244_v24 = vsel %vm169_vm1, %v219_v4, 0.0  ;;  %v382_v11 = vsel %vm380_vm5, 0, %v381_v8 }
  0xda   :  { %v245_v33 = vadd.f32 %v244_v24, %v243_v28  ;;  %383 = vst [vmem:[#allocation2 + $0x14] sm:$0x8] %v382_v11  ;;  %v386_v24 = vld [vmem:[#allocation2 + $0x2c] sm:$0x8]  ;;  %v22_v28 = vld [vmem:[%s4889_s4] sm:$0xff] }
  0xde   :  { %v3390_v23 = vpop.f32.mrf.mxu0 }
  0xdf   :  { %v220_v9 = vmul.f32 %v3390_v23, %v3390_v23  ;;  %v191_v25 = vsel %vm169_vm1, %v3390_v23, 0.0 }
  0xe0   :  { %v192_v34 = vadd.f32 %v191_v25, %v190_v27  ;;  %v387_v25 = vsel %vm380_vm5, 0, %v386_v24  ;;  %vm461_vm5 = vcmask 124928  }
  0xe1   :  { %v246_v30 = vsel %vm169_vm1, %v220_v9, 0.0  ;;  %388 = vst [vmem:[#allocation2 + $0x2c] sm:$0x8] %v387_v25 }
  0xe2   :  { %v247_v40 = vadd.f32 %v246_v30, %v245_v33 }
  0xe6   :  { %v3413_v39 = vpop.f32.mrf.mxu0 }
  0xe7   :  { %v221_v26 = vmul.f32 %v3413_v39, %v3413_v39  ;;  %v193_v31 = vsel %vm169_vm1, %v3413_v39, 0.0 }
  0xe8   :  { %v194_v38 = vadd.f32 %v193_v31, %v192_v34  ;;  %v3490_v34 = vperm.slane %v22_v28, 2 }
  0xe9   :  { %v248_v35 = vsel %vm169_vm1, %v221_v26, 0.0 }
  0xea   :  { %v249_v43 = vadd.f32 %v248_v35, %v247_v40 }
  0xee   :  { %v3435_v60 = vpop.f32.mrf.mxu0 }
  0xef   :  { %v222_v32 = vmul.f32 %v3435_v60, %v3435_v60  ;;  %v195_v36 = vsel %vm169_vm1, %v3435_v60, 0.0 }
  0xf0   :  { %v196_v44 = vadd.f32 %v195_v36, %v194_v38 }
  0xf1   :  { %v250_v41 = vsel %vm169_vm1, %v222_v32, 0.0 }
  0xf2   :  { %v251_v47 = vadd.f32 %v250_v41, %v249_v43 }
  0xf6   :  { %v3457_v29 = vpop.f32.mrf.mxu0 }
  0xf7   :  { %v223_v37 = vmul.f32 %v3457_v29, %v3457_v29  ;;  %v197_v42 = vsel %vm169_vm1, %v3457_v29, 0.0 }
  0xf8   :  { %v198_v46 = vadd.f32 %v197_v42, %v196_v44  ;;  %v3514_v42 = vperm.slane %v22_v28, 3 }
  0xf9   :  { %v252_v45 = vsel %vm169_vm1, %v223_v37, 0.0 }
  0xfa   :  { %v253_v51 = vadd.f32 %v252_v45, %v251_v47 }
  0xfe   :  { %v3473_v48 = vpop.f32.mrf.mxu0 }
  0xff   :  { %v200_v49 = vsel %vm199_vm2, %v3473_v48, 0.0  ;;  %v224_v50 = vmul.f32 %v3473_v48, %v3473_v48 }
 0x100   :  { %v201_v52 = vadd.f32 %v200_v49, %v198_v46 }
 0x101   :  { %v254_v53 = vsel %vm199_vm2, %v224_v50, 0.0  ;;  %vm524_vm2 = vcmask 1041408  }
 0x102   :  { %v202_v54 = vrot.slane %v201_v52, 4  ;;  %v255_v55 = vadd.f32 %v254_v53, %v253_v51 }
 0x104   :  { %v203_v56 = vadd.f32 %v202_v54, %v201_v52  ;;  %v256_v57 = vrot.slane %v255_v55, 4 }
 0x106   :  { %v204_v58 = vrot.slane %v203_v56, 2  ;;  %v257_v59 = vadd.f32 %v256_v57, %v255_v55 }
 0x108   :  { %v205_v61 = vadd.f32 %v204_v58, %v203_v56  ;;  %v258_v62 = vrot.slane %v257_v59, 2 }
 0x10a   :  { %v206_v63 = vrot.slane %v205_v61, 1  ;;  %v259_v0 = vadd.f32 %v258_v62, %v257_v59 }
 0x10c   :  { %v207_v1 = vadd.f32 %v206_v63, %v205_v61  ;;  %v260_v2 = vrot.slane %v259_v0, 1 }
 0x10e   :  { %v3478_v3 = vmul.f32 0.008196721, %v207_v1  ;;  %v261_v4 = vadd.f32 %v260_v2, %v259_v0 }
 0x110   :  { %v262_v5 = vmul.f32 0.008196721, %v261_v4  ;;  %v263_v6 = vmul.f32 %v3478_v3, %v3478_v3  ;;  %v269_v32 = vsub.f32 %v3374_v15, %v3478_v3  ;;  %v270_v33 = vsub.f32 %v3376_v16, %v3478_v3  ;;  %v3100_v4 = vld [vmem:[%s4887_s2 + $0x30] sm:$0xff] }
 0x111   :  { %v271_v35 = vsub.f32 %v3378_v17, %v3478_v3  ;;  %v272_v36 = vsub.f32 %v3380_v18, %v3478_v3  ;;  %v273_v38 = vsub.f32 %v3382_v19, %v3478_v3  ;;  %v274_v40 = vsub.f32 %v3384_v20, %v3478_v3  ;;  %1388 = vmatpush.bf16.msrb.mxu0 %v3100_v4 }
 0x112   :  { %v264_v7 = vsub.f32 %v262_v5, %v263_v6  ;;  %v275_v15 = vsub.f32 %v3386_v21, %v3478_v3  ;;  %v276_v16 = vsub.f32 %v3388_v22, %v3478_v3  ;;  %v277_v17 = vsub.f32 %v3390_v23, %v3478_v3  ;;  %v3090_v5 = vld [vmem:[%s4887_s2 + $0x8] sm:$0xff] }
 0x113   :  { %v278_v18 = vsub.f32 %v3413_v39, %v3478_v3  ;;  %v279_v19 = vsub.f32 %v3435_v60, %v3478_v3  ;;  %v280_v20 = vsub.f32 %v3457_v29, %v3478_v3  ;;  %v281_v21 = vsub.f32 %v3473_v48, %v3478_v3  ;;  %3224 = vmatpush.bf16.msra.mxu3 %v3090_v5 }
 0x114   :  { %v265_v9 = vmax.f32 %v264_v7, 0.0  ;;  %v266_v23 = vsub.f32 %v3368_v12, %v3478_v3  ;;  %v267_v39 = vsub.f32 %v3370_v13, %v3478_v3  ;;  %v268_v60 = vsub.f32 %v3372_v14, %v3478_v3  ;;  %657 = vmatpush.bf16.msra.mxu1 %v3090_v5  ;;  %3223 = vmatpush.bf16.msra.mxu2 %v3090_v5 }
 0x116   :  { %v282_v10 = vadd.f32 1e-05, %v265_v9 }
 0x118   :  { %3245 = vrsqrt.f32 %v282_v10  ;;  %vm289_vm7 = vweird.f32 %v282_v10 }
 0x11e   :  { %v3246_v26 = vpop.eup %3245 }
 0x11f   :  { %v284_v27 = vmul.f32 %v3246_v26, %v282_v10  ;;  %vm290_vm6 = vweird.f32 %v3246_v26 }
 0x120   :  { %vm291_vm8 = vmor %vm289_vm7, %vm290_vm6 }
 0x121   :  { %v285_v30 = vmul.f32 %v3246_v26, %v284_v27  ;;  %vm3589_vm6 = vmor %vm411_vm11, %vm412_vm12  ;;  %vm1304_vm11 = vsmask.f32 7424  ;;  %vm2236_vm12 = vsmask.f32 5376 }
 0x122   :  { %vm3608_vm7 = vmor %vm463_vm14, %vm464_vm15  ;;  %vm2045_vm14 = vcmask 1045504  }
 0x123   :  { %v286_v31 = vmul.f32 0.5, %v285_v30 }
 0x125   :  { %v287_v37 = vsub.f32 1.5, %v286_v31 }
 0x127   :  { %v288_v41 = vmul.f32 %v3246_v26, %v287_v37 }
 0x129   :  { %v3516_v22 = vsel %vm291_vm8, %v3246_v26, %v288_v41  ;;  %vm3615_vm8 = vmor %vm524_vm2, %vm525_vm4 }
 0x12a   :  { %v296_v43 = vmul.f32 %v3516_v22, %v269_v32  ;;  %v297_v29 = vmul.f32 %v3516_v22, %v270_v33  ;;  %v298_v44 = vmul.f32 %v3516_v22, %v271_v35  ;;  %v299_v45 = vmul.f32 %v3516_v22, %v272_v36 }
 0x12b   :  { %v300_v46 = vmul.f32 %v3516_v22, %v273_v38  ;;  %v301_v47 = vmul.f32 %v3516_v22, %v274_v40  ;;  %v302_v48 = vmul.f32 %v3516_v22, %v275_v15  ;;  %v303_v49 = vmul.f32 %v3516_v22, %v276_v16 }
 0x12c   :  { %v304_v50 = vmul.f32 %v3516_v22, %v277_v17  ;;  %v305_v51 = vmul.f32 %v3516_v22, %v278_v18  ;;  %v306_v52 = vmul.f32 %v3516_v22, %v279_v19  ;;  %v307_v53 = vmul.f32 %v3516_v22, %v280_v20 }
 0x12d   :  { %v308_v54 = vmul.f32 %v3516_v22, %v281_v21  ;;  %v313_v55 = vmul.f32 %v3490_v34, %v296_v43  ;;  %v314_v56 = vmul.f32 %v3490_v34, %v297_v29  ;;  %v315_v57 = vmul.f32 %v3490_v34, %v298_v44 }
 0x12e   :  { %v316_v58 = vmul.f32 %v3490_v34, %v299_v45  ;;  %v317_v59 = vmul.f32 %v3490_v34, %v300_v46  ;;  %v318_v61 = vmul.f32 %v3490_v34, %v301_v47  ;;  %v319_v62 = vmul.f32 %v3490_v34, %v302_v48  ;;  %v408_v47 = vld [vmem:[#allocation2 + $0x14] sm:$0xf] }
 0x12f   :  { %v320_v63 = vmul.f32 %v3490_v34, %v303_v49  ;;  %v321_v0 = vmul.f32 %v3490_v34, %v304_v50  ;;  %v322_v1 = vmul.f32 %v3490_v34, %v305_v51  ;;  %v323_v2 = vmul.f32 %v3490_v34, %v306_v52 }
 0x130   :  { %v324_v6 = vmul.f32 %v3490_v34, %v307_v53  ;;  %v325_v7 = vmul.f32 %v3490_v34, %v308_v54  ;;  %v330_v8 = vadd.f32 %v3514_v42, %v313_v55  ;;  %v331_v9 = vadd.f32 %v3514_v42, %v314_v56 }
 0x131   :  { %v332_v10 = vadd.f32 %v3514_v42, %v315_v57  ;;  %v333_v11 = vadd.f32 %v3514_v42, %v316_v58  ;;  %v334_v24 = vadd.f32 %v3514_v42, %v317_v59  ;;  %v335_v25 = vadd.f32 %v3514_v42, %v318_v61 }
 0x132   :  { %v336_v26 = vadd.f32 %v3514_v42, %v319_v62  ;;  %v337_v27 = vadd.f32 %v3514_v42, %v320_v63  ;;  %v338_v28 = vadd.f32 %v3514_v42, %v321_v0  ;;  %v339_v30 = vadd.f32 %v3514_v42, %v322_v1 }
 0x133   :  { %v340_v31 = vadd.f32 %v3514_v42, %v323_v2  ;;  %v341_v32 = vadd.f32 %v3514_v42, %v324_v6  ;;  %v342_v33 = vadd.f32 %v3514_v42, %v325_v7  ;;  %v346_v35 = vmax.f32 %v330_v8, 0.0 }
 0x134   :  { %v347_v36 = vmax.f32 %v331_v9, 0.0  ;;  %v348_v37 = vmax.f32 %v332_v10, 0.0  ;;  %v349_v38 = vmax.f32 %v333_v11, 0.0  ;;  %v350_v40 = vmax.f32 %v334_v24, 0.0 }
 0x135   :  { %v351_v15 = vmax.f32 %v335_v25, 0.0  ;;  %v352_v16 = vmax.f32 %v336_v26, 0.0  ;;  %v353_v17 = vmax.f32 %v337_v27, 0.0  ;;  %v354_v18 = vmax.f32 %v338_v28, 0.0 }
 0x136   :  { %v355_v41 = vmax.f32 %v339_v30, 0.0  ;;  %v356_v19 = vmax.f32 %v340_v31, 0.0  ;;  %v357_v20 = vmax.f32 %v341_v32, 0.0  ;;  %v358_v21 = vmax.f32 %v342_v33, 0.0 }
 0x137   :  { %v362_v43 = vpack.c.bf16 %v346_v35, %v346_v35  ;;  %v363_v29 = vpack.c.bf16 %v347_v36, %v347_v36  ;;  %v364_v44 = vpack.c.bf16 %v348_v37, %v348_v37  ;;  %v365_v45 = vpack.c.bf16 %v349_v38, %v349_v38 }
 0x138   :  { %v366_v48 = vpack.c.bf16 %v350_v40, %v350_v40  ;;  %v367_v49 = vpack.c.bf16 %v351_v15, %v351_v15  ;;  %v368_v50 = vpack.c.bf16 %v352_v16, %v352_v16  ;;  %v369_v51 = vpack.c.bf16 %v353_v17, %v353_v17 }
 0x139   :  { %v3575_v52 = vpack.c.bf16 %v354_v18, %v354_v18  ;;  %v3577_v53 = vpack.c.bf16 %v355_v41, %v355_v41  ;;  %v3579_v54 = vpack.c.bf16 %v356_v19, %v356_v19  ;;  %v3581_v55 = vpack.c.bf16 %v357_v20, %v357_v20 }
 0x13a   :  { %v3583_v56 = vpack.c.bf16 %v358_v21, %v358_v21  ;;  %v409_v57 = vsel %vm3571_vm13, %v362_v43, %v408_v47  ;;  %v415_v58 = vshrl.u32 %v362_v43, 16  ;;  %v420_v59 = vshrl.u32 %v363_v29, 16 }
 0x13b   :  { %410 = vst [vmem:[#allocation2 + $0x14] sm:$0xf] %v409_v57  ;;  %v423_v61 = vshll.u32 %v363_v29, 16  ;;  %v429_v62 = vshrl.u32 %v364_v44, 16  ;;  %v432_v63 = vshll.u32 %v364_v44, 16  ;;  %v438_v0 = vshrl.u32 %v365_v45, 16 }
 0x13c   :  { %v2834_v1 = vrot.slane %v415_v58, 11  ;;  %v422_v2 = vrot.slane %v420_v59, 7  ;;  %v441_v4 = vshll.u32 %v365_v45, 16  ;;  %v447_v5 = vshrl.u32 %v366_v48, 16 }
 0x13d   :  { %v431_v7 = vrot.slane %v429_v62, 7  ;;  %v440_v8 = vrot.slane %v438_v0, 7  ;;  %v450_v9 = vshll.u32 %v366_v48, 16  ;;  %v471_v10 = vshrl.u32 %v367_v49, 16 }
 0x13e   :  { %v425_v11 = vor.u32 %v423_v61, %v422_v2  ;;  %v427_v24 = vrot.slane %v422_v2, 4  ;;  %v449_v25 = vrot.slane %v447_v5, 7  ;;  %v466_v26 = vrot.slane %v447_v5, 6 }
 0x13f   :  { %v434_v27 = vor.u32 %v432_v63, %v431_v7  ;;  %v436_v28 = vrot.slane %v431_v7, 4  ;;  %v443_v30 = vor.u32 %v441_v4, %v440_v8  ;;  %v445_v31 = vrot.slane %v440_v8, 4  ;;  %v516_v7 = vld [vmem:[#allocation2 + $0x2c] sm:$0xf] }
 0x140   :  { %v426_v32 = vsel %vm3589_vm6, %v2834_v1, %v425_v11  ;;  %v452_v33 = vor.u32 %v450_v9, %v449_v25  ;;  %v467_v35 = vrot.slane %v450_v9, 7  ;;  %v473_v36 = vrot.slane %v471_v10, 6 }
 0x141   :  { %v435_v37 = vsel %vm3589_vm6, %v427_v24, %v434_v27  ;;  %v444_v38 = vsel %vm3589_vm6, %v436_v28, %v443_v30  ;;  %458 = vst.msk [vmem:[#allocation3 + $0x8] sm:$0xf] %vm375_vm9, %v426_v32  ;;  %v474_v40 = vshll.u32 %v367_v49, 16  ;;  %v481_v15 = vshrl.u32 %v368_v50, 16 }
 0x142   :  { %v453_v16 = vsel %vm3589_vm6, %v445_v31, %v452_v33  ;;  %459 = vst.msk [vmem:[#allocation3 + $0xc] sm:$0xf] %vm375_vm9, %v435_v37  ;;  %v468_v17 = vor.u32 %v467_v35, %v466_v26  ;;  %v484_v18 = vshll.u32 %v368_v50, 16  ;;  %v491_v41 = vshrl.u32 %v369_v51, 16 }
 0x143   :  { %460 = vst.msk [vmem:[#allocation3 + $0x10] sm:$0xf] %vm375_vm9, %v444_v38  ;;  %v476_v19 = vrot.slane %v474_v40, 7  ;;  %v483_v20 = vrot.slane %v481_v15, 6  ;;  %v494_v21 = vshll.u32 %v369_v51, 16  ;;  %v501_v43 = vshrl.u32 %v3575_v52, 16 }
 0x144   :  { %462 = vst.msk [vmem:[#allocation3 + $0x14] sm:$0x7] %vm461_vm5, %v453_v16  ;;  %v469_v44 = vrot.slane %v468_v17, 4  ;;  %v486_v45 = vrot.slane %v484_v18, 7  ;;  %v493_v47 = vrot.slane %v491_v41, 6  ;;  %v504_v48 = vshll.u32 %v3575_v52, 16 }
 0x145   :  { %v477_v49 = vor.u32 %v476_v19, %v473_v36  ;;  %v496_v50 = vrot.slane %v494_v21, 7  ;;  %v503_v57 = vrot.slane %v501_v43, 6  ;;  %v2835_v58 = vrot.slane %v3575_v52, 10 }
 0x146   :  { %v487_v59 = vor.u32 %v486_v45, %v483_v20  ;;  %v506_v61 = vrot.slane %v504_v48, 7  ;;  %v529_v62 = vrot.slane %v3577_v53, 6  ;;  %v532_v63 = vrot.slane %v3579_v54, 6  ;;  %v3089_v48 = vld [vmem:[%s4887_s2] sm:$0xff] }
 0x147   :  { %v478_v0 = vsel %vm3608_vm7, %v469_v44, %v477_v49  ;;  %v479_v1 = vrot.slane %v477_v49, 4  ;;  %v497_v2 = vor.u32 %v496_v50, %v493_v47  ;;  %v535_v4 = vrot.slane %v3581_v55, 6  ;;  %766 = vmatpush.bf16.msrb.mxu2 %v3089_v48 }
 0x148   :  { %v489_v5 = vrot.slane %v487_v59, 4  ;;  %v507_v6 = vor.u32 %v506_v61, %v503_v57  ;;  %513 = vst.msk [vmem:[#allocation2 + $0x20] sm:$0xf] %vm375_vm9, %v478_v0  ;;  %v530_v52 = vsel %vm3615_vm8, %v2835_v58, %v529_v62  ;;  %v531_v8 = vrot.slane %v529_v62, 4  ;;  %v3235_v44 = vld [vmem:[#allocation3 + $0x4] sm:$0xf0]  }
 0x149   :  { %v488_v53 = vsel %vm3608_vm7, %v479_v1, %v487_v59  ;;  %v499_v54 = vrot.slane %v497_v2, 4  ;;  %v534_v9 = vrot.slane %v532_v63, 4  ;;  %v537_v10 = vrot.slane %v535_v4, 4  ;;  %544 = vst.msk [vmem:[#allocation3 + $0x20] sm:$0xf] %vm375_vm9, %v530_v52 }
 0x14a   :  { %v498_v55 = vsel %vm3608_vm7, %v489_v5, %v497_v2  ;;  %514 = vst.msk [vmem:[#allocation2 + $0x24] sm:$0xf] %vm375_vm9, %v488_v53  ;;  %v533_v11 = vsel %vm3615_vm8, %v531_v8, %v532_v63  ;;  %v538_v24 = vrot.slane %v3583_v56, 6  ;;  %v293_v25 = vmul.f32 %v3516_v22, %v266_v23  ;;  %v3237_v29 = vld [vmem:[#allocation3 + $0xc] sm:$0xff]  }
 0x14b   :  { %v508_v26 = vsel %vm3608_vm7, %v499_v54, %v507_v6  ;;  %515 = vst.msk [vmem:[#allocation2 + $0x28] sm:$0xf] %vm375_vm9, %v498_v55  ;;  %v536_v27 = vsel %vm3615_vm8, %v534_v9, %v535_v4  ;;  %v294_v28 = vmul.f32 %v3516_v22, %v267_v39  ;;  %v295_v12 = vmul.f32 %v3516_v22, %v268_v60  ;;  %v3091_v4 = vld [vmem:[%s4887_s2 + $0x10] sm:$0xff] }
 0x14c   :  { %v517_v23 = vsel %vm3571_vm13, %v508_v26, %v516_v7  ;;  %v539_v56 = vsel %vm3615_vm8, %v537_v10, %v538_v24  ;;  %545 = vst.msk [vmem:[#allocation3 + $0x24] sm:$0xf] %vm375_vm9, %v533_v11  ;;  %v310_v30 = vmul.f32 %v3490_v34, %v293_v25  ;;  %v3295_v33 = vmov 0   ;;  %899 = vmatpush.bf16.msrb.mxu3 %v3091_v4 }
 0x14d   :  { %518 = vst [vmem:[#allocation2 + $0x2c] sm:$0xf] %v517_v23  ;;  %v311_v13 = vmul.f32 %v3490_v34, %v294_v28  ;;  %v312_v39 = vmul.f32 %v3490_v34, %v295_v12  ;;  %v3092_v34 = vld [vmem:[%s4887_s2 + $0x18] sm:$0xff]  ;;  %v614_v50 = vrot.slane %v3237_v29, 3  ;;  %v959_v6 = vshrl.u32 %v3237_v29, 16 }
 0x14e   :  { %546 = vst.msk [vmem:[#allocation3 + $0x28] sm:$0xf] %vm375_vm9, %v536_v27  ;;  %v327_v14 = vadd.f32 %v3514_v42, %v310_v30  ;;  %1043 = vmatpush.bf16.msrb.mxu1 %v3092_v34  ;;  %v962_v7 = vshll.u32 %v3237_v29, 16  ;;  %vm1615_vm13 = vcmask 1046528   ;;  %vm2768_vm6 = vcmask 9216  }
 0x14f   :  { %547 = vst.msk [vmem:[#allocation3 + $0x2c] sm:$0x7] %vm461_vm5, %v539_v56  ;;  %v328_v3 = vadd.f32 %v3514_v42, %v311_v13  ;;  %v329_v22 = vadd.f32 %v3514_v42, %v312_v39  ;;  %v961_v26 = vrot.slane %v959_v6, 3  ;;  %vm2730_vm5 = vcmask 7168  }
 0x150   :  { %v343_v60 = vmax.f32 %v327_v14, 0.0  ;;  %397 = vst.msk [vmem:[#allocation3 + $0x1c] sm:$0xf] %vm375_vm9, %v3295_v33  ;;  %v964_v12 = vrot.slane %v962_v7, 4 }
 0x151   :  { %v344_v46 = vmax.f32 %v328_v3, 0.0  ;;  %v345_v31 = vmax.f32 %v329_v22, 0.0  ;;  %377 = vst.msk [vmem:[#allocation2 + $0x4] sm:$0xf] %vm375_vm9, %v3295_v33  ;;  %v3747_v22 = vld [vmem:[#allocation2 + $0x20] sm:$0xff] }
 0x152   :  { %v359_v32 = vpack.c.bf16 %v343_v60, %v343_v60  ;;  %384 = vst.msk [vmem:[#allocation2 + $0x18] sm:$0xf] %vm375_vm9, %v3295_v33 }
 0x153   :  { %v360_v35 = vpack.c.bf16 %v344_v46, %v344_v46  ;;  %v361_v36 = vpack.c.bf16 %v345_v31, %v345_v31  ;;  %385 = vst.msk [vmem:[#allocation2 + $0x1c] sm:$0xf] %vm375_vm9, %v3295_v33 }
 0x154   :  { %402 = vst.msk [vmem:[#allocation2 + $0x8] sm:$0xf] %vm375_vm9, %v359_v32  ;;  %v3774_v48 = vld [vmem:[#allocation2 + $0x28] sm:$0xff] }
 0x155   :  { %403 = vst.msk [vmem:[#allocation2 + $0xc] sm:$0xf] %vm375_vm9, %v360_v35  ;;  %v3674_v42 = vld [vmem:[#allocation3 + $0x24] sm:$0xff]  }
 0x156   :  { %404 = vst.msk [vmem:[#allocation2 + $0x10] sm:$0xf] %vm375_vm9, %v361_v36  ;;  %v620_v38 = vrot.slane %v3674_v42, 3  ;;  %v986_v10 = vshrl.u32 %v3674_v42, 16  ;;  %v989_v55 = vshll.u32 %v3674_v42, 16  ;;  %v3752_v36 = vor.u32 %v964_v12, %v961_v26 }
 0x157   :  { %v3679_v37 = vld [vmem:[#allocation3 + $0x1c] sm:$0xff]   ;;  %389 = vst.msk [vmem:[#allocation2 + $0x30] sm:$0xf] %vm375_vm9, %v3295_v33 }
 0x158   :  { %390 = vst.msk [vmem:[#allocation2 + $0x34] sm:$0xf] %vm375_vm9, %v3295_v33  ;;  %v618_v40 = vrot.slane %v3679_v37, 3  ;;  %v988_v13 = vrot.slane %v986_v10, 3  ;;  %v991_v39 = vrot.slane %v989_v55, 4  ;;  %v3790_v10 = vshll.u32 %v3774_v48, 16 }
 0x159   :  { %391 = vst.msk [vmem:[#allocation2 + $0x38] sm:$0xf] %vm375_vm9, %v3295_v33  ;;  %v3793_v55 = vshrl.u32 %v3774_v48, 16 }
 0x15a   :  { %v621_v18 = vsel %vm612_vm10, %v618_v40, %v620_v38  ;;  %393 = vst.msk [vmem:[#allocation3 + $0x4] sm:$0xf] %vm375_vm9, %v3295_v33  ;;  %v3715_v63 = vld [vmem:[#allocation2 + $0x18] sm:$0xff]  ;;  %v3755_v42 = vor.u32 %v991_v39, %v988_v13 }
 0x15b   :  { %2845 = vmatmul.msk.bf16.vlgmr.msra.gmra.mxu3 %vm169_vm1, %v621_v18  ;;  %395 = vst.msk [vmem:[#allocation3 + $0x14] sm:$0x8] %vm378_vm3, %v3295_v33  ;;  %v3730_v8 = vshll.u32 %v3715_v63, 16  ;;  %v3743_v30 = vshrl.u32 %v3715_v63, 16  ;;  %v3761_v18 = vshll.u32 %v3747_v22, 16 }
 0x15c   :  { %v3685_v15 = vld [vmem:[#allocation2 + $0x8] sm:$0xff]   ;;  %396 = vst.msk [vmem:[#allocation3 + $0x18] sm:$0xf] %vm375_vm9, %v3295_v33 }
 0x15d   :  { %v3095_v16 = vld [vmem:[#allocation2 + $0x10] sm:$0xff]  ;;  %v1308_v17 = vshll.u32 %v3685_v15, 16  ;;  %v1306_v41 = vshrl.u32 %v3685_v15, 16  ;;  %398 = vst.msk [vmem:[#allocation3 + $0x2c] sm:$0x8] %vm378_vm3, %v3295_v33  ;;  %v1323_v24 = vrot.slane %v3730_v8, 1 }
 0x15e   :  { %v3696_v20 = vshll.u32 %v3095_v16, 16  ;;  %399 = vst.msk [vmem:[#allocation3 + $0x30] sm:$0xf] %vm375_vm9, %v3295_v33  ;;  %v3727_v52 = vshrl.u32 %v3095_v16, 16  ;;  %vm805_vm3 = vsmask.f32 4352 }
 0x15f   :  { %v1310_v19 = vrot.slane %v1308_v17, 1  ;;  %400 = vst.msk [vmem:[#allocation3 + $0x34] sm:$0xf] %vm375_vm9, %v3295_v33  ;;  %v1819_v17 = vrot.slane %v3743_v30, 1  ;;  %v3226_v4 = vld [vmem:[#allocation2 + $0x4] sm:$0xf0]  }
 0x160   :  { %v1315_v43 = vrot.slane %v3696_v20, 1  ;;  %401 = vst.msk [vmem:[#allocation3 + $0x38] sm:$0xf] %vm375_vm9, %v3295_v33  ;;  %v1815_v46 = vrot.slane %v3727_v52, 1  ;;  %v1816_v33 = vrot.slane %v3696_v20, 2  ;;  %v3781_v6 = vld [vmem:[#allocation2 + $0x30] sm:$0xff] }
 0x161   :  { %v1311_v21 = vor.u32 %v1310_v19, %v1306_v41  ;;  %v3177_v47 = vld [vmem:[#allocation3 + $0x4] sm:$0x8]  ;;  %4913 = vst [vmem:[#allocation7_spill] sm:$0xff] %v3747_v22  ;;  %vm1806_vm9 = vsmask.f32 6400 }
 0x162   :  { %v3178_v49 = vor.u32 %v3235_v44, %v3177_v47  ;;  %v1319_v11 = vor.u32 %v3727_v52, %v1315_v43  ;;  %v3757_v16 = vor.u32 %v1816_v33, %v1815_v46  ;;  %4914 = vst [vmem:[#allocation8_spill] sm:$0xff] %v3774_v48 }
 0x163   :  { %v1316_v45 = vsel %vm1304_vm11, %v1311_v21, %v1315_v43  ;;  %v3709_v57 = vld [vmem:[#allocation3 + $0x14] sm:$0xff]   ;;  %v1820_v43 = vrot.slane %v3730_v8, 2  ;;  %4915 = vst [vmem:[#allocation9_spill] sm:$0xff] %v3781_v6 }
 0x164   :  { %2932 = vmatmul.msk.bf16.vlgmr.msrb.gmra.mxu0 %vm169_vm1, %v1316_v45  ;;  %v613_v51 = vrot.slane %v3178_v49, 3  ;;  %v3711_v58 = vld [vmem:[#allocation3 + $0x28] sm:$0xff]   ;;  %v616_v61 = vrot.slane %v3709_v57, 3  ;;  %v951_v53 = vshrl.u32 %v3178_v49, 16  ;;  %v954_v54 = vshll.u32 %v3178_v49, 16 }
 0x165   :  { %v3291_v59 = vld [vmem:[#allocation3 + $0x2c] sm:$0xf]  ;;  %v3292_v1 = vld [vmem:[#allocation3 + $0x2c] sm:$0xf0]   ;;  %v1324_v3 = vsel %vm1304_vm11, %v1319_v11, %v1323_v24  ;;  %v1821_v49 = vor.u32 %v1820_v43, %v1819_v17  ;;  %v971_v7 = vshll.u32 %v3709_v57, 16  ;;  %v1327_v11 = vor.u32 %v3743_v30, %v1323_v24 }
 0x166   :  { %v615_v62 = vsel %vm612_vm10, %v613_v51, %v614_v50  ;;  %v3717_v0 = vld [vmem:[#allocation3 + $0x30] sm:$0xff]   ;;  %v617_v2 = vsel %vm612_vm10, %v614_v50, %v616_v61  ;;  %v3725_v5 = vor.u32 %v3292_v1, %v3291_v59  ;;  %v953_v27 = vrot.slane %v951_v53, 3 }
 0x167   :  { %2842 = vmatmul.msk.bf16.vlgmr.msra.gmra.mxu1 %vm169_vm1, %v615_v62  ;;  %2843 = vmatmul.msk.bf16.vlgmr.msra.gmra.mxu2 %vm169_vm1, %v617_v2  ;;  %v956_v28 = vrot.slane %v954_v54, 4  ;;  %v575_v23 = vld [vmem:[#allocation3 + $0x34] sm:$0x7]  ;;  %v948_v34 = vunpack.c.h.b16 %v3717_v0  ;;  %v619_v47 = vsel %vm612_vm10, %v616_v61, %v618_v40  ;;  %v1331_v50 = vrot.slane %v3761_v18, 1  ;;  %v3201_v2 = vld [vmem:[#allocation2 + $0x4] sm:$0x8] }
 0x168   :  { %v622_v9 = vrot.slane %v3725_v5, 3  ;;  %v995_v56 = vshrl.u32 %v3725_v5, 16  ;;  %v998_v14 = vshll.u32 %v3725_v5, 16  ;;  %v604_v31 = vunpack.c.l.b16 %v575_v23  ;;  %v2038_v54 = vld [vmem:[#allocation2 + $0x8] sm:$0xc] }
 0x169   :  { %v957_v35 = vor.u32 %v956_v28, %v953_v27  ;;  %v949_v41 = vpack.c.b16 %v948_v34, %v948_v34  ;;  %v3779_v51 = vshrl.u32 %v3747_v22, 16  ;;  %v3785_v40 = vsel %vm1806_vm9, %v3757_v16, %v1821_v49 }
 0x16a   :  { %v623_v25 = vsel %vm612_vm10, %v620_v38, %v622_v9  ;;  %v997_v60 = vrot.slane %v995_v56, 3  ;;  %v1000_v32 = vrot.slane %v998_v14, 4  ;;  %v611_v19 = vpack.c.b16 %v604_v31, %v604_v31 }
 0x16b   :  { %2846 = vmatmul.msk.bf16.gmra.mxu3 %vm169_vm1, %v623_v25  ;;  %v966_v29 = vsel %vm805_vm3, %v957_v35, %v3752_v36  ;;  %v1004_v44 = vshrl.u32 %v949_v41, 16  ;;  %v1007_v45 = vshll.u32 %v949_v41, 16  ;;  %v968_v61 = vshrl.u32 %v3709_v57, 16  ;;  %v3796_v25 = vld [vmem:[#allocation2 + $0xc] sm:$0xff]  }
 0x16c   :  { %v1001_v38 = vor.u32 %v1000_v32, %v997_v60  ;;  %v624_v1 = vrot.slane %v611_v19, 3  ;;  %v3202_v26 = vor.u32 %v3226_v4, %v3201_v2  ;;  %v1823_v28 = vrot.slane %v3779_v51, 1 }
 0x16d   :  { %v1006_v59 = vrot.slane %v1004_v44, 3  ;;  %v1009_v62 = vrot.slane %v1007_v45, 4  ;;  %v1335_v12 = vor.u32 %v3779_v51, %v1331_v50  ;;  %v3807_v23 = vshrl.u32 %v3781_v6, 16 }
 0x16e   :  { %v3765_v21 = vsel %vm805_vm3, %v3755_v42, %v1001_v38  ;;  %v625_v57 = vsel %vm612_vm10, %v622_v9, %v624_v1  ;;  %v1824_v56 = vrot.slane %v3761_v18, 2  ;;  %v4891_v24 = vunpack.c.h.b16 %v3685_v15  ;;  %v3837_v1 = vld [vmem:[#allocation3 + $0x10] sm:$0xff] }
 0x16f   :  { %v1010_v53 = vor.u32 %v1009_v62, %v1006_v59  ;;  %v2043_v13 = vunpack.c.l.b16 %v2038_v54  ;;  %v970_v39 = vrot.slane %v968_v61, 3  ;;  %v973_v14 = vrot.slane %v971_v7, 4  ;;  %v3846_v54 = vld [vmem:[#allocation2 + $0x14] sm:$0xff]  }
 0x170   :  { %v1825_v5 = vor.u32 %v1824_v56, %v1823_v28  ;;  %v1827_v9 = vrot.slane %v3793_v55, 1  ;;  %v1828_v60 = vrot.slane %v3790_v10, 2  ;;  %v1332_v46 = vsel %vm1304_vm11, %v1327_v11, %v1331_v50 }
 0x171   :  { %v3799_v27 = vsel %vm805_vm3, %v1001_v38, %v1010_v53  ;;  %v807_v31 = vshrl.u32 %v3202_v26, 16  ;;  %v810_v32 = vshll.u32 %v3202_v26, 16  ;;  %v815_v33 = vshrl.u32 %v3796_v25, 16 }
 0x172   :  { %v818_v35 = vshll.u32 %v3796_v25, 16  ;;  %v3822_v34 = vsel %vm1806_vm9, %v1821_v49, %v1825_v5  ;;  %v1829_v38 = vor.u32 %v1828_v60, %v1827_v9  ;;  %v1831_v17 = vrot.slane %v3807_v23, 1 }
 0x173   :  { %v3827_v41 = vpack.c.b16 %v4891_v24, %v2043_v13  ;;  %v974_v19 = vor.u32 %v973_v14, %v970_v39  ;;  %v4892_v43 = vrot.slane %v3790_v10, 1  ;;  %v722_v44 = vrot.slane %v3202_v26, 3 }
 0x174   :  { %2933 = vmatmul.msk.bf16.gmra.mxu0 %vm169_vm1, %v1324_v3  ;;  %v3813_v3 = vshll.u32 %v3781_v6, 16  ;;  %v4893_v45 = vrot.slane %v3796_v25, 3  ;;  %v809_v50 = vrot.slane %v807_v31, 3  ;;  %v812_v59 = vrot.slane %v810_v32, 4  ;;  %v3871_v31 = vld [vmem:[#allocation3 + $0x18] sm:$0xff] }
 0x175   :  { %4916 = vst [vmem:[#allocation10_spill] sm:$0xff] %v3827_v41  ;;  %v980_v62 = vshll.u32 %v3679_v37, 16  ;;  %v817_v2 = vrot.slane %v815_v33, 3  ;;  %v820_v4 = vrot.slane %v818_v35, 4  ;;  %v975_v7 = vsel %vm805_vm3, %v3752_v36, %v974_v19 }
 0x176   :  { %v1832_v49 = vrot.slane %v3813_v3, 2  ;;  %v1340_v53 = vsel %vm1304_vm11, %v1335_v12, %v4892_v43  ;;  %v2238_v26 = vshrl.u32 %v3827_v41, 16  ;;  %v2241_v36 = vshll.u32 %v3827_v41, 16 }
 0x177   :  { %2876 = vmatmul.msk.bf16.vlgmr.msrb.gmra.mxu1 %vm169_vm1, %v966_v29  ;;  %2844 = vmatmul.msk.bf16.gmra.mxu2 %vm169_vm1, %v619_v47  ;;  %v977_v29 = vshrl.u32 %v3679_v37, 16  ;;  %v3833_v47 = vsel %vm1806_vm9, %v1825_v5, %v1829_v38  ;;  %v724_v37 = vsel %vm612_vm10, %v722_v44, %v4893_v45  ;;  %v813_v12 = vor.u32 %v812_v59, %v809_v50 }
 0x178   :  { %v3839_v61 = vor.u32 %v1832_v49, %v1831_v17  ;;  %v982_v56 = vrot.slane %v980_v62, 4  ;;  %v3861_v13 = vshll.u32 %v3837_v1, 16  ;;  %v3864_v39 = vshrl.u32 %v3837_v1, 16 }
 0x179   :  { %v979_v11 = vrot.slane %v977_v29, 3  ;;  %v3866_v14 = vor.u32 %v820_v4, %v817_v2  ;;  %v2240_v5 = vrot.slane %v2238_v26, 2  ;;  %v2243_v9 = vrot.slane %v2241_v36, 3  ;;  %v3892_v2 = vld [vmem:[#allocation3 + $0x8] sm:$0xff]  }
 0x17a   :  { %v3855_v28 = vsel %vm1806_vm9, %v1829_v38, %v3839_v61  ;;  %v2246_v60 = vrot.slane %v3696_v20, 3  ;;  %v2249_v32 = vrot.slane %v3743_v30, 2  ;;  %v2250_v33 = vrot.slane %v3730_v8, 3  ;;  %v3876_v38 = vld [vmem:[#allocation3 + $0x20] sm:$0xff]  ;;  %v2134_v4 = vld [vmem:[#allocation3 + $0x8] sm:$0xc] }
 0x17b   :  { %2847 = vmatmul.msk.bf16.gmra.mxu3 %vm169_vm1, %v625_v57  ;;  %v2245_v57 = vrot.slane %v3727_v52, 2  ;;  %v824_v52 = vshrl.u32 %v3846_v54, 16  ;;  %v827_v35 = vshll.u32 %v3846_v54, 16  ;;  %v2244_v17 = vor.u32 %v2243_v9, %v2240_v5  ;;  %v3897_v26 = vld [vmem:[#allocation3 + $0x28] sm:$0xff]  ;;  %v3910_v5 = vld [vmem:[#allocation3 + $0x30] sm:$0xff] }
 0x17c   :  { %v3879_v44 = vshrl.u32 %v3871_v31, 16  ;;  %v2251_v20 = vor.u32 %v2250_v33, %v2249_v32  ;;  %v1934_v49 = vrot.slane %v3864_v39, 1  ;;  %v1935_v50 = vrot.slane %v3861_v13, 2 }
 0x17d   :  { %v2247_v29 = vor.u32 %v2246_v60, %v2245_v57  ;;  %v822_v30 = vsel %vm805_vm3, %v813_v12, %v3866_v14  ;;  %v3885_v59 = vor.u32 %v982_v56, %v979_v11  ;;  %v2253_v62 = vrot.slane %v3779_v51, 2 }
 0x17e   :  { %v3902_v11 = vor.u32 %v1935_v50, %v1934_v49  ;;  %v2254_v36 = vrot.slane %v3761_v18, 3  ;;  %v826_v57 = vrot.slane %v824_v52, 3  ;;  %v829_v12 = vrot.slane %v827_v35, 4 }
 0x17f   :  { %v3888_v8 = vsel %vm2236_vm12, %v2244_v17, %v2247_v29  ;;  %v984_v51 = vsel %vm805_vm3, %v974_v19, %v3885_v59  ;;  %v3908_v56 = vshrl.u32 %v3876_v38, 16  ;;  %v3913_v9 = vshll.u32 %v3876_v38, 16 }
 0x180   :  { %v2255_v60 = vor.u32 %v2254_v36, %v2253_v62  ;;  %v1938_v32 = vrot.slane %v3879_v44, 1  ;;  %v4896_v18 = vunpack.c.h.b16 %v3892_v2  ;;  %v2139_v19 = vunpack.c.l.b16 %v2134_v4 }
 0x181   :  { %v2257_v52 = vrot.slane %v3793_v55, 2  ;;  %v2258_v35 = vrot.slane %v3790_v10, 3  ;;  %v3922_v17 = vshll.u32 %v3897_v26, 16  ;;  %v1942_v4 = vrot.slane %v3908_v56, 1 }
 0x182   :  { %v3928_v49 = vsel %vm2236_vm12, %v2251_v20, %v2255_v60  ;;  %v1943_v24 = vrot.slane %v3913_v9, 2  ;;  %v2261_v43 = vrot.slane %v3807_v23, 2  ;;  %v4919_v41 = vrot.slane %v3846_v54, 3 }
 0x183   :  { %v4920_v6 = vrot.slane %v3796_v25, 3  ;;  %v1947_v48 = vrot.slane %v3922_v17, 2  ;;  %v3994_v25 = vld [vmem:[#allocation2 + $0x1c] sm:$0xff]   ;;  %v1718_v22 = vrot.slane %v3897_v26, 1 }
 0x184   :  { %2934 = vmatmul.msk.bf16.gmra.mxu0 %vm169_vm1, %v1332_v46  ;;  %v1944_v62 = vor.u32 %v1943_v24, %v1942_v4  ;;  %v1716_v24 = vrot.slane %v3876_v38, 1 }
 0x187   :  { %2877 = vmatmul.msk.bf16.gmra.mxu1 %vm169_vm1, %v975_v7  ;;  %2852 = vmatmul.msk.bf16.vlgmr.msrb.gmra.mxu2 %vm169_vm1, %v724_v37  ;;  %v3895_v7 = vshll.u32 %v3871_v31, 16  ;;  %v3900_v37 = vsel %vm2236_vm12, %v2247_v29, %v2251_v20  ;;  %v3925_v29 = vshrl.u32 %v3897_v26, 16  ;;  %v2262_v20 = vrot.slane %v3813_v3, 3 }
 0x189   :  { %v1939_v33 = vrot.slane %v3895_v7, 2  ;;  %v3954_v45 = vor.u32 %v2262_v20, %v2261_v43  ;;  %v1946_v46 = vrot.slane %v3925_v29, 1  ;;  %v4922_v43 = vrot.slane %v3790_v10, 1 }
 0x18b   :  { %2864 = vmatmul.msk.bf16.vlgmr.msrb.gmra.mxu3 %vm169_vm1, %v822_v30  ;;  %v1940_v50 = vor.u32 %v1939_v33, %v1938_v32  ;;  %v3931_v30 = vshrl.u32 %v3910_v5, 16  ;;  %v2140_v32 = vpack.c.b16 %v4896_v18, %v2139_v19  ;;  %v3947_v33 = vshll.u32 %v3910_v5, 16  ;;  %4918 = vst [vmem:[#allocation12_spill] sm:$0xff] %v3954_v45  ;;  %v1267_v45 = vld [vmem:[#allocation2 + $0x38] sm:$0x1] }
 0x18c   :  { %v726_v19 = vsel %vm612_vm10, %v4920_v6, %v4919_v41  ;;  %v4921_v18 = vrot.slane %v3837_v1, 1  ;;  %v1343_v4 = vor.u32 %v3793_v55, %v4922_v43  ;;  %v3093_v6 = vld [vmem:[%s4887_s2 + $0x20] sm:$0xff]  ;;  %v3109_v41 = vld [vmem:[%s4887_s2 + $0x50] sm:$0xff]  ;;  %v3988_v55 = vor.u32 %v829_v12, %v826_v57 }
 0x18d   :  { %v3939_v36 = vsel %vm1806_vm9, %v3902_v11, %v1940_v50  ;;  %v1950_v10 = vrot.slane %v3931_v30, 1  ;;  %v1948_v20 = vor.u32 %v1947_v48, %v1946_v46  ;;  %v1951_v43 = vrot.slane %v3947_v33, 2  ;;  %1127 = vmatpush.bf16.msra.mxu2 %v3093_v6  ;;  %1875 = vmatpush.bf16.msra.mxu0 %v3109_v41 }
 0x18e   :  { %v2360_v46 = vshll.u32 %v2140_v32, 16  ;;  %v2364_v12 = vrot.slane %v3864_v39, 2  ;;  %v4008_v41 = vsel %vm1615_vm13, %v1716_v24, %v1718_v22 }
 0x18f   :  { %v3999_v57 = vsel %vm1806_vm9, %v1944_v62, %v1948_v20  ;;  %v4001_v48 = vor.u32 %v1951_v43, %v1950_v10  ;;  %4926 = vst [vmem:[#allocation15_spill] sm:$0xff] %v4008_v41  ;;  %v2141_v41 = vrot.slane %v2140_v32, 2 }
 0x190   :  { %v2362_v43 = vrot.slane %v2360_v46, 3 }
 0x191   :  { %4924 = vst [vmem:[#allocation14_spill] sm:$0xff] %v4001_v48  ;;  %v4020_v10 = vsel %vm1806_vm9, %v1948_v20, %v4001_v48  ;;  %v836_v20 = vshll.u32 %v3994_v25, 16  ;;  %v2372_v48 = vrot.slane %v3908_v56, 2 }
 0x194   :  { %2935 = vmatmul.msk.bf16.gmra.mxu0 %vm169_vm1, %v1340_v53  ;;  %v3933_v53 = vor.u32 %v2258_v35, %v2257_v52  ;;  %v1714_v35 = vrot.slane %v3871_v31, 1 }
 0x196   :  { %4917 = vst [vmem:[#allocation11_spill] sm:$0xff] %v3933_v53  ;;  %v3951_v52 = vsel %vm2236_vm12, %v2255_v60, %v3933_v53  ;;  %v3966_v60 = vsel %vm1615_vm13, %v4921_v18, %v1714_v35  ;;  %v3985_v18 = vsel %vm1806_vm9, %v1940_v50, %v1944_v62  ;;  %v4901_v53 = vrot.slane %v3910_v5, 1 }
 0x197   :  { %2878 = vmatmul.msk.bf16.gmra.mxu1 %vm169_vm1, %v984_v51  ;;  %2853 = vmatmul.msk.bf16.gmra.mxu2 %vm169_vm1, %v726_v19  ;;  %v3094_v51 = vld [vmem:[%s4887_s2 + $0x28] sm:$0xff]  ;;  %v3991_v19 = vsel %vm1615_vm13, %v1714_v35, %v1716_v24  ;;  %v2357_v50 = vshrl.u32 %v2140_v32, 16  ;;  %v4925_v35 = vrot.slane %v3813_v3, 1  ;;  %v831_v62 = vsel %vm805_vm3, %v3866_v14, %v3988_v55 }
 0x198   :  { %4923 = vst [vmem:[#allocation13_spill] sm:$0xff] %v3991_v19  ;;  %1211 = vmatpush.bf16.msra.mxu3 %v3094_v51  ;;  %v4013_v19 = vsel %vm1615_vm13, %v1718_v22, %v4901_v53  ;;  %v1296_v24 = vunpack.c.l.b16 %v1267_v45  ;;  %v2368_v22 = vrot.slane %v3879_v44, 2  ;;  %v2142_v14 = vrot.slane %v3837_v1, 2 }
 0x199   :  { %v1348_v6 = vsel %vm1304_vm11, %v1343_v4, %v4925_v35  ;;  %4927 = vst [vmem:[#allocation16_spill] sm:$0xff] %v4013_v19  ;;  %v2359_v51 = vrot.slane %v2357_v50, 2  ;;  %v2365_v4 = vrot.slane %v3861_v13, 3  ;;  %v833_v35 = vshrl.u32 %v3994_v25, 16 }
 0x19a   :  { %v2369_v50 = vrot.slane %v3895_v7, 3  ;;  %v2144_v32 = vrot.slane %v3871_v31, 2  ;;  %v2380_v31 = vrot.slane %v3931_v30, 2 }
 0x19b   :  { %2865 = vmatmul.msk.bf16.gmra.mxu3 %vm169_vm1, %v831_v62  ;;  %v2363_v53 = vor.u32 %v2362_v43, %v2359_v51  ;;  %v2366_v19 = vor.u32 %v2365_v4, %v2364_v12  ;;  %v4035_v62 = vsel %vm2045_vm14, %v2141_v41, %v2142_v14  ;;  %v2373_v51 = vrot.slane %v3913_v9, 3 }
 0x19c   :  { %v2370_v46 = vor.u32 %v2369_v50, %v2368_v22  ;;  %4929 = vst [vmem:[#allocation18_spill] sm:$0xff] %v4035_v62  ;;  %v727_v12 = vrot.slane %v3994_v25, 3  ;;  %v4040_v43 = vpack.c.b16 %v1296_v24, %v1296_v24  ;;  %v2376_v22 = vrot.slane %v3925_v29, 2 }
 0x19d   :  { %v4032_v45 = vsel %vm2236_vm12, %v2363_v53, %v2366_v19  ;;  %v4047_v53 = vsel %vm2045_vm14, %v2142_v14, %v2144_v32  ;;  %v2377_v41 = vrot.slane %v3922_v17, 3  ;;  %v2146_v50 = vrot.slane %v3876_v38, 2 }
 0x19e   :  { %4928 = vst [vmem:[#allocation17_spill] sm:$0xff] %v4032_v45  ;;  %v4043_v4 = vsel %vm2236_vm12, %v2366_v19, %v2370_v46  ;;  %v835_v62 = vrot.slane %v833_v35, 3  ;;  %v838_v45 = vrot.slane %v836_v20, 4  ;;  %v2381_v25 = vrot.slane %v3947_v33, 3 }
 0x19f   :  { %4930 = vst [vmem:[#allocation19_spill] sm:$0xff] %v4043_v4  ;;  %v2378_v19 = vor.u32 %v2377_v41, %v2376_v22  ;;  %v4057_v4 = vsel %vm2045_vm14, %v2144_v32, %v2146_v50  ;;  %v993_v14 = vsel %vm805_vm3, %v3885_v59, %v3755_v42  ;;  %v1353_v38 = vshll.u32 %v4040_v43, 16  ;;  %v3106_v42 = vld [vmem:[%s4887_s2 + $0x38] sm:$0xff]  ;;  %v1608_v22 = vld [vmem:[#allocation2 + $0x8] sm:$0xe] }
 0x1a0   :  { %v4064_v35 = vor.u32 %v2381_v25, %v2380_v31  ;;  %v4903_v20 = vrot.slane %v3910_v5, 2  ;;  %v4935_v41 = vrot.slane %v3813_v3, 1  ;;  %1564 = vmatpush.bf16.msra.mxu1 %v3106_v42  ;;  %v1613_v25 = vunpack.c.l.b16 %v1608_v22  ;;  %v4104_v22 = vld [vmem:[#allocation2 + $0x28] sm:$0xff]  }
 0x1a1   :  { %v1355_v31 = vrot.slane %v1353_v38, 1 }
 0x1a2   :  { %4931 = vst [vmem:[#allocation20_spill] sm:$0xff] %v4064_v35  ;;  %v4083_v59 = vsel %vm2236_vm12, %v2378_v19, %v4064_v35 }
 0x1a4   :  { %2936 = vmatmul.msk.bf16.gmra.mxu0 %vm169_vm1, %v1348_v6  ;;  %v2374_v6 = vor.u32 %v2373_v51, %v2372_v48  ;;  %v2148_v48 = vrot.slane %v3897_v26, 2  ;;  %v4932_v51 = vrot.slane %v3846_v54, 3 }
 0x1a6   :  { %v4054_v24 = vsel %vm2236_vm12, %v2370_v46, %v2374_v6  ;;  %v728_v46 = vsel %vm612_vm10, %v4932_v51, %v727_v12  ;;  %v4072_v32 = vsel %vm2236_vm12, %v2374_v6, %v2378_v19  ;;  %v4075_v26 = vsel %vm2045_vm14, %v2146_v50, %v2148_v48  ;;  %v3233_v51 = vld [vmem:[#allocation2 + $0x24] sm:$0xff]  }
 0x1a7   :  { %2879 = vmatmul.msk.bf16.gmra.mxu1 %vm169_vm1, %v993_v14  ;;  %4933 = vst [vmem:[#allocation21_spill] sm:$0xff] %v4075_v26  ;;  %2854 = vmatmul.msk.bf16.gmra.mxu2 %vm169_vm1, %v728_v46  ;;  %v4088_v54 = vsel %vm2045_vm14, %v2148_v48, %v4903_v20  ;;  %v839_v6 = vor.u32 %v838_v45, %v835_v62  ;;  %v4936_v48 = vunpack.c.h.b16 %v3685_v15  ;;  %v842_v3 = vshrl.u32 %v3233_v51, 16 }
 0x1a8   :  { %4934 = vst [vmem:[#allocation22_spill] sm:$0xff] %v4088_v54  ;;  %v1351_v50 = vor.u32 %v3807_v23, %v4935_v41  ;;  %v845_v45 = vshll.u32 %v3233_v51, 16  ;;  %v729_v23 = vrot.slane %v3233_v51, 3  ;;  %v3293_v41 = vld [vmem:[#allocation2 + $0x2c] sm:$0xf] }
 0x1a9   :  { %v840_v14 = vsel %vm805_vm3, %v3988_v55, %v839_v6  ;;  %v4099_v46 = vpack.c.b16 %v4936_v48, %v1613_v25  ;;  %v844_v42 = vrot.slane %v842_v3, 3 }
 0x1aa   :  { %v1356_v19 = vsel %vm1304_vm11, %v1351_v50, %v1355_v31  ;;  %v847_v55 = vrot.slane %v845_v45, 4  ;;  %v4106_v50 = vld [vmem:[#allocation2 + $0x30] sm:$0xff]   ;;  %v730_v25 = vsel %vm612_vm10, %v727_v12, %v729_v23 }
 0x1ab   :  { %2866 = vmatmul.msk.bf16.gmra.mxu3 %vm169_vm1, %v840_v14  ;;  %v1808_v62 = vshrl.u32 %v4099_v46, 16  ;;  %v1811_v38 = vshll.u32 %v4099_v46, 16  ;;  %v3294_v31 = vld [vmem:[#allocation2 + $0x2c] sm:$0xf0]  }
 0x1ac   :  { %v3290_v45 = vor.u32 %v3294_v31, %v3293_v41 }
 0x1ad   :  { %v1810_v14 = vrot.slane %v1808_v62, 1  ;;  %v1813_v51 = vrot.slane %v1811_v38, 2 }
 0x1ae   :  { %v851_v12 = vshrl.u32 %v3290_v45, 16  ;;  %v854_v35 = vshll.u32 %v3290_v45, 16  ;;  %v731_v54 = vrot.slane %v3290_v45, 3 }
 0x1af   :  { %v1814_v48 = vor.u32 %v1813_v51, %v1810_v14  ;;  %v1491_v14 = vrot.slane %v3861_v13, 1 }
 0x1b0   :  { %v856_v26 = vrot.slane %v854_v35, 4  ;;  %v732_v62 = vsel %vm612_vm10, %v729_v23, %v731_v54  ;;  %v1482_v23 = vshrl.u32 %v3892_v2, 16 }
 0x1b1   :  { %v1818_v20 = vsel %vm1806_vm9, %v1814_v48, %v3757_v16  ;;  %v1484_v16 = vshll.u32 %v3892_v2, 16  ;;  %v1495_v13 = vor.u32 %v3864_v39, %v1491_v14 }
 0x1b3   :  { %v1486_v35 = vrot.slane %v1484_v16, 1 }
 0x1b4   :  { %2937 = vmatmul.msk.bf16.gmra.mxu0 %vm169_vm1, %v1356_v19  ;;  %v848_v19 = vor.u32 %v847_v55, %v844_v42  ;;  %v803_v42 = vunpack.c.h.b16 %v4106_v50 }
 0x1b6   :  { %v849_v3 = vsel %vm805_vm3, %v839_v6, %v848_v19  ;;  %v560_v6 = vld [vmem:[#allocation2 + $0x34] sm:$0x7]  ;;  %v804_v41 = vpack.c.b16 %v803_v42, %v803_v42 }
 0x1b7   :  { %2880 = vmatmul.msk.bf16.gmra.mxu1 %vm169_vm1, %v3765_v21  ;;  %2855 = vmatmul.msk.bf16.gmra.mxu2 %vm169_vm1, %v730_v25  ;;  %v853_v21 = vrot.slane %v851_v12, 3  ;;  %v714_v55 = vunpack.c.l.b16 %v560_v6  ;;  %v1499_v6 = vrot.slane %v3895_v7, 1  ;;  %v1507_v7 = vrot.slane %v3913_v9, 1  ;;  %v3169_v9 = vld [vmem:[#allocation3 + $0x10] sm:$0xff]  }
 0x1b8   :  { %v863_v25 = vshll.u32 %v804_v41, 16 }
 0x1b9   :  { %v857_v38 = vor.u32 %v856_v26, %v853_v21  ;;  %v721_v31 = vpack.c.b16 %v714_v55, %v714_v55  ;;  %v1487_v26 = vor.u32 %v1486_v35, %v1482_v23  ;;  %v1503_v39 = vor.u32 %v3879_v44, %v1499_v6  ;;  %v1799_v35 = vld [vmem:[#allocation2 + $0x38] sm:$0x3] }
 0x1bb   :  { %2867 = vmatmul.msk.bf16.gmra.mxu3 %vm169_vm1, %v849_v3  ;;  %v733_v51 = vrot.slane %v721_v31, 3  ;;  %v865_v3 = vrot.slane %v863_v25, 4  ;;  %v3107_v25 = vld [vmem:[%s4887_s2 + $0x40] sm:$0xff] }
 0x1bc   :  { %1660 = vmatpush.bf16.msrb.mxu2 %v3107_v25 }
 0x1bd   :  { %v734_v45 = vsel %vm612_vm10, %v731_v54, %v733_v51  ;;  %v1500_v54 = vsel %vm1304_vm11, %v1495_v13, %v1499_v6  ;;  %v1511_v51 = vor.u32 %v3908_v56, %v1507_v7  ;;  %v3165_v13 = vld [vmem:[#allocation2 + $0x18] sm:$0xff]  }
 0x1c4   :  { %3000 = vmatmul.msk.bf16.vlgmr.msra.gmra.mxu0 %vm169_vm1, %v1818_v20  ;;  %v858_v20 = vsel %vm805_vm3, %v848_v19, %v857_v38  ;;  %v1492_v19 = vsel %vm1304_vm11, %v1487_v26, %v1491_v14  ;;  %v3113_v26 = vld [vmem:[%s4887_s2 + $0x70] sm:$0xff] }
 0x1c5   :  { %2305 = vmatpush.bf16.msrb.mxu0 %v3113_v26 }
 0x1c7   :  { %2881 = vmatmul.msk.bf16.gmra.mxu1 %vm169_vm1, %v3799_v27  ;;  %2856 = vmatmul.msk.bf16.gmra.mxu2 %vm169_vm1, %v732_v62  ;;  %v860_v27 = vshrl.u32 %v804_v41, 16  ;;  %v3164_v41 = vld [vmem:[#allocation2 + $0x10] sm:$0xff]  }
 0x1c9   :  { %v862_v48 = vrot.slane %v860_v27, 3 }
 0x1cb   :  { %2868 = vmatmul.msk.bf16.gmra.mxu3 %vm169_vm1, %v858_v20  ;;  %v866_v12 = vor.u32 %v865_v3, %v862_v48 }
 0x1cd   :  { %v867_v21 = vsel %vm805_vm3, %v857_v38, %v866_v12  ;;  %v1515_v12 = vrot.slane %v3922_v17, 1 }
 0x1d4   :  { %3001 = vmatmul.msk.bf16.gmra.mxu0 %vm169_vm1, %v3785_v40 }
 0x1d7   :  { %2964 = vmatmul.msk.bf16.vlgmr.msra.gmra.mxu1 %vm169_vm1, %v1492_v19  ;;  %2857 = vmatmul.msk.bf16.gmra.mxu2 %vm169_vm1, %v734_v45 }
 0x1db   :  { %2869 = vmatmul.msk.bf16.gmra.mxu3 %vm169_vm1, %v867_v21  ;;  %v3108_v21 = vld [vmem:[%s4887_s2 + $0x48] sm:$0xff] }
 0x1dc   :  { %1755 = vmatpush.bf16.msrb.mxu3 %v3108_v21 }
 0x1de   :  { %v4135_v40 = vpop.f32.mrf.mxu3 }
 0x1e1   :  { %v4195_v56 = vpop.f32.mrf.mxu0 }
 0x1e4   :  { %3002 = vmatmul.msk.bf16.gmra.mxu0 %vm169_vm1, %v3822_v34  ;;  %v659_v62 = vpop.f32.mrf.mxu1 }
 0x1e6   :  { %v4143_v42 = vpop.f32.mrf.mxu3 }
 0x1e7   :  { %2965 = vmatmul.msk.bf16.gmra.mxu1 %vm169_vm1, %v1500_v54  ;;  %2888 = vmatmul.msk.bf16.vlgmr.msra.gmra.mxu2 %vm169_vm1, %v3685_v15  ;;  %v1508_v15 = vsel %vm1304_vm11, %v1503_v39, %v1507_v7 }
 0x1e9   :  { %v4209_v25 = vpop.f32.mrf.mxu0 }
 0x1ea   :  { %v4147_v38 = vpop.f32.mrf.mxu2 }
 0x1eb   :  { %2900 = vmatmul.msk.bf16.vlgmr.msra.gmra.mxu3 %vm169_vm1, %v3892_v2 }
 0x1ec   :  { %v661_v16 = vpop.f32.mrf.mxu1 }
 0x1ee   :  { %v4153_v34 = vpop.f32.mrf.mxu3 }
 0x1f2   :  { %v4157_v55 = vpop.f32.mrf.mxu2 }
 0x1f4   :  { %3003 = vmatmul.msk.bf16.gmra.mxu0 %vm169_vm1, %v3833_v47  ;;  %v4159_v20 = vpop.f32.mrf.mxu1  ;;  %v1804_v47 = vunpack.c.l.b16 %v1799_v35 }
 0x1f6   :  { %v4164_v31 = vpop.f32.mrf.mxu3  ;;  %v4171_v27 = vpack.c.b16 %v1804_v47, %v1804_v47  ;;  %v3110_v47 = vld [vmem:[%s4887_s2 + $0x58] sm:$0xff] }
 0x1f7   :  { %2966 = vmatmul.msk.bf16.gmra.mxu1 %vm169_vm1, %v1508_v15  ;;  %2889 = vmatmul.msk.bf16.gmra.mxu2 %vm169_vm1, %v3164_v41  ;;  %v3170_v15 = vld [vmem:[#allocation3 + $0x18] sm:$0xff]  }
 0x1f8   :  { %v1836_v48 = vshrl.u32 %v4171_v27, 16  ;;  %v1839_v3 = vshll.u32 %v4171_v27, 16  ;;  %1994 = vmatpush.bf16.msrb.mxu1 %v3110_v47  ;;  %v3171_v47 = vld [vmem:[#allocation3 + $0x20] sm:$0xff]  }
 0x1fa   :  { %v4166_v23 = vpop.f32.mrf.mxu2  ;;  %v1838_v6 = vrot.slane %v1836_v48, 1  ;;  %v1841_v54 = vrot.slane %v1839_v3, 2  ;;  %v1523_v48 = vrot.slane %v3947_v33, 1 }
 0x1fb   :  { %2901 = vmatmul.msk.bf16.gmra.mxu3 %vm169_vm1, %v3169_v9 }
 0x1fc   :  { %v4168_v44 = vpop.f32.mrf.mxu1  ;;  %v1842_v7 = vor.u32 %v1841_v54, %v1838_v6  ;;  %v3166_v54 = vld [vmem:[#allocation2 + $0x20] sm:$0xff]  }
 0x1fe   :  { %v4181_v14 = vpop.f32.mrf.mxu3  ;;  %v1843_v9 = vsel %vm1806_vm9, %v3839_v61, %v1842_v7 }
 0x202   :  { %v4186_v19 = vpop.f32.mrf.mxu2 }
 0x204   :  { %3004 = vmatmul.msk.bf16.gmra.mxu0 %vm169_vm1, %v3855_v28  ;;  %v4188_v45 = vpop.f32.mrf.mxu1  ;;  %v1516_v28 = vsel %vm1304_vm11, %v1511_v51, %v1515_v12  ;;  %v1444_v51 = vld [vmem:[#allocation3 + $0x38] sm:$0x1] }
 0x205   :  { %v1473_v6 = vunpack.c.l.b16 %v1444_v51 }
 0x206   :  { %v4199_v39 = vpop.f32.mrf.mxu3 }
 0x207   :  { %2967 = vmatmul.msk.bf16.gmra.mxu1 %vm169_vm1, %v1516_v28  ;;  %2890 = vmatmul.msk.bf16.gmra.mxu2 %vm169_vm1, %v3165_v13  ;;  %v4219_v7 = vpack.c.b16 %v1473_v6, %v1473_v6 }
 0x20a   :  { %v768_v17 = vpop.f32.mrf.mxu2 }
 0x20b   :  { %v769_v41 = vadd.f32 %v768_v17, %v659_v62  ;;  %2902 = vmatmul.msk.bf16.gmra.mxu3 %vm169_vm1, %v3170_v15  ;;  %v1519_v62 = vor.u32 %v3925_v29, %v1515_v12  ;;  %v4221_v29 = vpop.f32.mrf.mxu0 }
 0x20c   :  { %v4201_v35 = vpop.f32.mrf.mxu1 }
 0x20d   :  { %v1524_v61 = vsel %vm1304_vm11, %v1519_v62, %v1523_v48 }
 0x20e   :  { %v901_v26 = vpop.f32.mrf.mxu3 }
 0x20f   :  { %v931_v3 = vadd.f32 %v901_v26, %v769_v41  ;;  %v1529_v41 = vshll.u32 %v4219_v7, 16  ;;  %v1527_v26 = vor.u32 %v3931_v30, %v1523_v48 }
 0x211   :  { %v1531_v51 = vrot.slane %v1529_v41, 1 }
 0x212   :  { %v770_v21 = vpop.f32.mrf.mxu2 }
 0x213   :  { %v771_v13 = vadd.f32 %v770_v21, %v661_v16 }
 0x214   :  { %3005 = vmatmul.msk.bf16.gmra.mxu0 %vm169_vm1, %v1843_v9  ;;  %v4214_v28 = vpop.f32.mrf.mxu1  ;;  %v1704_v9 = vld [vmem:[#allocation3 + $0x8] sm:$0xe] }
 0x215   :  { %v1709_v21 = vunpack.c.l.b16 %v1704_v9 }
 0x216   :  { %v903_v17 = vpop.f32.mrf.mxu3 }
 0x217   :  { %2968 = vmatmul.msk.bf16.gmra.mxu1 %vm169_vm1, %v1524_v61  ;;  %2891 = vmatmul.msk.bf16.gmra.mxu2 %vm169_vm1, %v3166_v54  ;;  %v932_v15 = vadd.f32 %v903_v17, %v771_v13  ;;  %v1532_v54 = vsel %vm1304_vm11, %v1527_v26, %v1531_v51  ;;  %v4235_v17 = vpop.f32.mrf.mxu0 }
 0x21a   :  { %v773_v33 = vpop.f32.mrf.mxu2 }
 0x21b   :  { %v774_v12 = vadd.f32 %v773_v33, %v4147_v38  ;;  %2903 = vmatmul.msk.bf16.gmra.mxu3 %vm169_vm1, %v3171_v47  ;;  %v4937_v33 = vunpack.c.h.b16 %v3892_v2 }
 0x21c   :  { %v4224_v16 = vpop.f32.mrf.mxu1 }
 0x21d   :  { %v1710_v47 = vpack.c.b16 %v4937_v33, %v1709_v21 }
 0x21e   :  { %v906_v62 = vpop.f32.mrf.mxu3 }
 0x21f   :  { %v933_v13 = vadd.f32 %v906_v62, %v774_v12  ;;  %v1927_v48 = vshrl.u32 %v1710_v47, 16  ;;  %v1930_v12 = vshll.u32 %v1710_v47, 16  ;;  %v4247_v51 = vpop.f32.mrf.mxu0  ;;  %v4250_v62 = vadd.f32 %v4159_v20, %v931_v3 }
 0x220   :  { %v4263_v20 = vadd.f32 %v4168_v44, %v932_v15 }
 0x221   :  { %v1929_v26 = vrot.slane %v1927_v48, 1  ;;  %v1932_v2 = vrot.slane %v1930_v12, 2 }
 0x222   :  { %v775_v6 = vpop.f32.mrf.mxu2 }
 0x223   :  { %v776_v38 = vadd.f32 %v775_v6, %v4157_v55  ;;  %v1933_v21 = vor.u32 %v1932_v2, %v1929_v26  ;;  %v4282_v26 = vld [vmem:[#allocation2 + $0x10] sm:$0xff] }
 0x224   :  { %3048 = vmatmul.msk.bf16.vlgmr.msrb.gmra.mxu0 %vm169_vm1, %v3888_v8  ;;  %v4232_v61 = vpop.f32.mrf.mxu1 }
 0x226   :  { %v908_v8 = vpop.f32.mrf.mxu3 }
 0x227   :  { %2969 = vmatmul.msk.bf16.gmra.mxu1 %vm169_vm1, %v1532_v54  ;;  %2892 = vmatmul.msk.bf16.gmra.mxu2 %vm169_vm1, %v4104_v22  ;;  %v934_v30 = vadd.f32 %v908_v8, %v776_v38 }
 0x22a   :  { %v778_v41 = vpop.f32.mrf.mxu2 }
 0x22b   :  { %v779_v55 = vadd.f32 %v778_v41, %v4166_v23  ;;  %2904 = vmatmul.msk.bf16.gmra.mxu3 %vm169_vm1, %v3711_v58  ;;  %v1937_v58 = vsel %vm1806_vm9, %v1933_v21, %v3902_v11  ;;  %v1616_v41 = vrot.slane %v4099_v46, 1  ;;  %v1711_v46 = vrot.slane %v1710_v47, 1 }
 0x22c   :  { %v4243_v9 = vpop.f32.mrf.mxu1 }
 0x22e   :  { %v911_v22 = vpop.f32.mrf.mxu3 }
 0x22f   :  { %v935_v6 = vadd.f32 %v911_v22, %v779_v55 }
 0x232   :  { %v780_v38 = vpop.f32.mrf.mxu2 }
 0x233   :  { %v781_v23 = vadd.f32 %v780_v38, %v4186_v19  ;;  %v4273_v19 = vadd.f32 %v4188_v45, %v933_v13  ;;  %v4291_v45 = vadd.f32 %v4201_v35, %v934_v30  ;;  %v1619_v30 = vrot.slane %v3715_v63, 1 }
 0x234   :  { %3049 = vmatmul.msk.bf16.gmra.mxu0 %vm169_vm1, %v3900_v37  ;;  %v4255_v54 = vpop.f32.mrf.mxu1  ;;  %v4265_v37 = vpop.f32.mrf.mxu0 }
 0x236   :  { %v913_v3 = vpop.f32.mrf.mxu3 }
 0x237   :  { %3012 = vmatmul.msk.bf16.vlgmr.msrb.gmra.mxu1 %vm169_vm1, %v1937_v58  ;;  %2893 = vmatmul.msk.bf16.gmra.mxu2 %vm169_vm1, %v4106_v50  ;;  %v936_v33 = vadd.f32 %v913_v3, %v781_v23  ;;  %v4938_v23 = vrot.slane %v3837_v1, 1  ;;  %v4306_v3 = vadd.f32 %v4214_v28, %v935_v6  ;;  %v3111_v6 = vld [vmem:[%s4887_s2 + $0x60] sm:$0xff] }
 0x238   :  { %2090 = vmatpush.bf16.msra.mxu2 %v3111_v6 }
 0x239   :  { %v1713_v58 = vsel %vm1615_vm13, %v1711_v46, %v4938_v23  ;;  %v4318_v63 = vadd.f32 %v4224_v16, %v936_v33 }
 0x23a   :  { %v783_v8 = vpop.f32.mrf.mxu2 }
 0x23b   :  { %2905 = vmatmul.msk.bf16.gmra.mxu3 %vm169_vm1, %v3717_v0  ;;  %v784_v11 = vadd.f32 %v783_v8, %v4135_v40  ;;  %v1617_v0 = vrot.slane %v4282_v26, 1 }
 0x23c   :  { %v4267_v48 = vpop.f32.mrf.mxu1  ;;  %v4277_v15 = vpop.f32.mrf.mxu0 }
 0x23d   :  { %v1618_v40 = vsel %vm1615_vm13, %v1616_v41, %v1617_v0  ;;  %v4940_v41 = vld [vmem:[#allocation11_spill] sm:$0xff] }
 0x23e   :  { %v916_v50 = vpop.f32.mrf.mxu3 }
 0x23f   :  { %v937_v44 = vadd.f32 %v916_v50, %v784_v11  ;;  %v1620_v11 = vsel %vm1615_vm13, %v1617_v0, %v1619_v30 }
 0x241   :  { %v4338_v46 = vadd.f32 %v4232_v61, %v937_v44 }
 0x242   :  { %v785_v12 = vpop.f32.mrf.mxu2 }
 0x244   :  { %3050 = vmatmul.msk.bf16.gmra.mxu0 %vm169_vm1, %v3928_v49  ;;  %v4280_v55 = vpop.f32.mrf.mxu1  ;;  %v786_v49 = vadd.f32 %v785_v12, %v4143_v42  ;;  %v4295_v38 = vpop.f32.mrf.mxu0 }
 0x246   :  { %v918_v13 = vpop.f32.mrf.mxu3 }
 0x247   :  { %3013 = vmatmul.msk.bf16.gmra.mxu1 %vm169_vm1, %v3939_v36  ;;  %2976 = vmatmul.msk.bf16.vlgmr.msrb.gmra.mxu2 %vm169_vm1, %v1618_v40  ;;  %v938_v2 = vadd.f32 %v918_v13, %v786_v49 }
 0x249   :  { %v4353_v44 = vadd.f32 %v4243_v9, %v938_v2  ;;  %v4943_v9 = vld [vmem:[#allocation8_spill] sm:$0xff] }
 0x24a   :  { %v788_v22 = vpop.f32.mrf.mxu2  ;;  %v1623_v2 = vrot.slane %v4943_v9, 1 }
 0x24b   :  { %2988 = vmatmul.msk.bf16.vlgmr.msrb.gmra.mxu3 %vm169_vm1, %v1713_v58  ;;  %v789_v36 = vadd.f32 %v788_v22, %v4153_v34 }
 0x24c   :  { %v4293_v21 = vpop.f32.mrf.mxu1  ;;  %v4310_v1 = vpop.f32.mrf.mxu0 }
 0x24e   :  { %v921_v42 = vpop.f32.mrf.mxu3 }
 0x24f   :  { %v939_v35 = vadd.f32 %v921_v42, %v789_v36 }
 0x252   :  { %v790_v47 = vpop.f32.mrf.mxu2 }
 0x253   :  { %v791_v34 = vadd.f32 %v790_v47, %v4164_v31  ;;  %v4939_v31 = vld [vmem:[#allocation12_spill] sm:$0xff] }
 0x254   :  { %3051 = vmatmul.msk.bf16.gmra.mxu0 %vm169_vm1, %v3951_v52  ;;  %v4308_v8 = vpop.f32.mrf.mxu1  ;;  %v2264_v0 = vsel %vm2236_vm12, %v4940_v41, %v4939_v31  ;;  %v4331_v40 = vpop.f32.mrf.mxu0 }
 0x256   :  { %v923_v52 = vpop.f32.mrf.mxu3 }
 0x257   :  { %3014 = vmatmul.msk.bf16.gmra.mxu1 %vm169_vm1, %v3985_v18  ;;  %2977 = vmatmul.msk.bf16.gmra.mxu2 %vm169_vm1, %v1620_v11  ;;  %v940_v50 = vadd.f32 %v923_v52, %v791_v34  ;;  %v4942_v34 = vld [vmem:[#allocation13_spill] sm:$0xff] }
 0x25a   :  { %v793_v12 = vpop.f32.mrf.mxu2 }
 0x25b   :  { %2989 = vmatmul.msk.bf16.gmra.mxu3 %vm169_vm1, %v3966_v60  ;;  %v794_v18 = vadd.f32 %v793_v12, %v4181_v14  ;;  %v4941_v60 = vld [vmem:[#allocation7_spill] sm:$0xff]  ;;  %v3112_v14 = vld [vmem:[%s4887_s2 + $0x68] sm:$0xff] }
 0x25c   :  { %v4320_v28 = vpop.f32.mrf.mxu1  ;;  %v1621_v13 = vrot.slane %v4941_v60, 1  ;;  %2185 = vmatpush.bf16.msra.mxu3 %v3112_v14 }
 0x25e   :  { %v926_v16 = vpop.f32.mrf.mxu3  ;;  %v1622_v23 = vsel %vm1615_vm13, %v1619_v30, %v1621_v13  ;;  %v3114_v30 = vld [vmem:[%s4887_s2 + $0x78] sm:$0xff] }
 0x25f   :  { %v4334_v33 = vadd.f32 %v926_v16, %v794_v18  ;;  %2424 = vmatpush.bf16.msra.mxu1 %v3114_v30 }
 0x262   :  { %v795_v49 = vpop.f32.mrf.mxu2 }
 0x263   :  { %v796_v58 = vadd.f32 %v795_v49, %v4199_v39 }
 0x264   :  { %3052 = vmatmul.msk.bf16.gmra.mxu0 %vm169_vm1, %v2264_v0  ;;  %v4340_v22 = vpop.f32.mrf.mxu1  ;;  %v1624_v0 = vsel %vm1615_vm13, %v1621_v13, %v1623_v2 }
 0x266   :  { %v928_v36 = vpop.f32.mrf.mxu3 }
 0x267   :  { %3015 = vmatmul.msk.bf16.gmra.mxu1 %vm169_vm1, %v3999_v57  ;;  %2978 = vmatmul.msk.bf16.gmra.mxu2 %vm169_vm1, %v1622_v23  ;;  %v4350_v42 = vadd.f32 %v928_v36, %v796_v58  ;;  %v1919_v57 = vld [vmem:[#allocation3 + $0x38] sm:$0x3] }
 0x268   :  { %v1924_v39 = vunpack.c.l.b16 %v1919_v57 }
 0x26a   :  { %v1129_v61 = vpop.f32.mrf.mxu2  ;;  %v4369_v41 = vpack.c.b16 %v1924_v39, %v1924_v39  ;;  %v4945_v39 = vld [vmem:[#allocation9_spill] sm:$0xff] }
 0x26b   :  { %v1159_v47 = vadd.f32 %v1129_v61, %v4250_v62  ;;  %2990 = vmatmul.msk.bf16.gmra.mxu3 %vm169_vm1, %v4942_v34 }
 0x26c   :  { %v4356_v11 = vpop.f32.mrf.mxu1  ;;  %v1955_v16 = vshrl.u32 %v4369_v41, 16  ;;  %v1958_v49 = vshll.u32 %v4369_v41, 16 }
 0x26e   :  { %v1213_v52 = vpop.f32.mrf.mxu3  ;;  %v1957_v13 = vrot.slane %v1955_v16, 1  ;;  %v1960_v61 = vrot.slane %v1958_v49, 2 }
 0x26f   :  { %v4363_v12 = vadd.f32 %v1213_v52, %v1159_v47  ;;  %v4944_v47 = vld [vmem:[#allocation15_spill] sm:$0xff]  ;;  %v1625_v52 = vrot.slane %v4945_v39, 1 }
 0x272   :  { %v1131_v6 = vpop.f32.mrf.mxu2 }
 0x273   :  { %v1160_v62 = vadd.f32 %v1131_v6, %v4263_v20  ;;  %v1083_v20 = vadd.f32 %v4255_v54, %v939_v35  ;;  %v1084_v6 = vadd.f32 %v4267_v48, %v940_v50  ;;  %v1627_v50 = vrot.slane %v4040_v43, 1 }
 0x274   :  { %v4367_v18 = vpop.f32.mrf.mxu1 }
 0x276   :  { %v1215_v60 = vpop.f32.mrf.mxu3 }
 0x277   :  { %3016 = vmatmul.msk.bf16.gmra.mxu1 %vm169_vm1, %v4020_v10  ;;  %2979 = vmatmul.msk.bf16.gmra.mxu2 %vm169_vm1, %v1624_v0  ;;  %v4377_v14 = vadd.f32 %v1215_v60, %v1160_v62  ;;  %v1961_v10 = vor.u32 %v1960_v61, %v1957_v13  ;;  %v1626_v62 = vsel %vm1615_vm13, %v1623_v2, %v1625_v52 }
 0x27a   :  { %v1134_v23 = vpop.f32.mrf.mxu2 }
 0x27b   :  { %v1161_v58 = vadd.f32 %v1134_v23, %v4273_v19  ;;  %2991 = vmatmul.msk.bf16.gmra.mxu3 %vm169_vm1, %v4944_v47  ;;  %v4946_v19 = vld [vmem:[#allocation14_spill] sm:$0xff]  ;;  %v4410_v47 = vpop.f32.mrf.mxu0 }
 0x27c   :  { %v4381_v36 = vpop.f32.mrf.mxu1  ;;  %v1962_v9 = vsel %vm1806_vm9, %v4946_v19, %v1961_v10  ;;  %v1628_v10 = vsel %vm1615_vm13, %v1625_v52, %v1627_v50 }
 0x27e   :  { %v1218_v30 = vpop.f32.mrf.mxu3 }
 0x27f   :  { %v4385_v57 = vadd.f32 %v1218_v30, %v1161_v58  ;;  %v1722_v30 = vrot.slane %v4219_v7, 1 }
 0x282   :  { %v1136_v34 = vpop.f32.mrf.mxu2 }
 0x283   :  { %v1162_v54 = vadd.f32 %v1136_v34, %v4291_v45  ;;  %v4947_v45 = vld [vmem:[#allocation16_spill] sm:$0xff]  ;;  %v4426_v52 = vpop.f32.mrf.mxu0 }
 0x284   :  { %v4390_v35 = vpop.f32.mrf.mxu1 }
 0x286   :  { %v1220_v0 = vpop.f32.mrf.mxu3 }
 0x287   :  { %3017 = vmatmul.msk.bf16.gmra.mxu1 %vm169_vm1, %v1962_v9  ;;  %2980 = vmatmul.msk.bf16.gmra.mxu2 %vm169_vm1, %v1626_v62  ;;  %v4397_v16 = vadd.f32 %v1220_v0, %v1162_v54  ;;  %v4949_v54 = vrot.slane %v3910_v5, 1 }
 0x28a   :  { %v1139_v49 = vpop.f32.mrf.mxu2 }
 0x28b   :  { %v1163_v60 = vadd.f32 %v1139_v49, %v4306_v3  ;;  %2992 = vmatmul.msk.bf16.gmra.mxu3 %vm169_vm1, %v4947_v45  ;;  %v4948_v3 = vld [vmem:[#allocation17_spill] sm:$0xff]  ;;  %v4950_v49 = vld [vmem:[#allocation10_spill] sm:$0xff] }
 0x28c   :  { %v4400_v48 = vpop.f32.mrf.mxu1 }
 0x28e   :  { %v1223_v23 = vpop.f32.mrf.mxu3 }
 0x28f   :  { %v4405_v58 = vadd.f32 %v1223_v23, %v1163_v60  ;;  %v2046_v60 = vrot.slane %v4950_v49, 2  ;;  %v2047_v23 = vrot.slane %v4282_v26, 2 }
 0x292   :  { %v1141_v2 = vpop.f32.mrf.mxu2 }
 0x293   :  { %v1164_v13 = vadd.f32 %v1141_v2, %v4318_v63  ;;  %v1723_v63 = vsel %vm1615_vm13, %v4949_v54, %v1722_v30  ;;  %v4951_v2 = vld [vmem:[#allocation19_spill] sm:$0xff] }
 0x294   :  { %v4408_v61 = vpop.f32.mrf.mxu1 }
 0x296   :  { %v1225_v43 = vpop.f32.mrf.mxu3 }
 0x297   :  { %3060 = vmatmul.msk.bf16.vlgmr.msra.gmra.mxu1 %vm169_vm1, %v4948_v3  ;;  %2981 = vmatmul.msk.bf16.gmra.mxu2 %vm169_vm1, %v1628_v10  ;;  %v4417_v34 = vadd.f32 %v1225_v43, %v1164_v13  ;;  %v4439_v13 = vpop.f32.mrf.mxu0 }
 0x29a   :  { %v1144_v39 = vpop.f32.mrf.mxu2 }
 0x29b   :  { %v1165_v19 = vadd.f32 %v1144_v39, %v4338_v46  ;;  %2993 = vmatmul.msk.bf16.gmra.mxu3 %vm169_vm1, %v1723_v63  ;;  %v2048_v46 = vsel %vm2045_vm14, %v2046_v60, %v2047_v23 }
 0x29c   :  { %v4423_v9 = vpop.f32.mrf.mxu1 }
 0x29e   :  { %v1228_v62 = vpop.f32.mrf.mxu3 }
 0x29f   :  { %v4428_v7 = vadd.f32 %v1228_v62, %v1165_v19  ;;  %v4449_v63 = vpop.f32.mrf.mxu0  ;;  %v3250_v62 = vld [vmem:[#allocation2 + $0x18] sm:$0xff] }
 0x2a2   :  { %v1146_v0 = vpop.f32.mrf.mxu2 }
 0x2a3   :  { %v1166_v45 = vadd.f32 %v1146_v0, %v4353_v44  ;;  %v4952_v44 = vld [vmem:[#allocation18_spill] sm:$0xff]  ;;  %v2049_v0 = vrot.slane %v3250_v62, 2 }
 0x2a4   :  { %v4432_v50 = vpop.f32.mrf.mxu1 }
 0x2a6   :  { %v1230_v10 = vpop.f32.mrf.mxu3 }
 0x2a7   :  { %3061 = vmatmul.msk.bf16.gmra.mxu1 %vm169_vm1, %v4951_v2  ;;  %3024 = vmatmul.msk.bf16.vlgmr.msra.gmra.mxu2 %vm169_vm1, %v2048_v46  ;;  %v4441_v3 = vadd.f32 %v1230_v10, %v1166_v45  ;;  %v2050_v45 = vsel %vm2045_vm14, %v2047_v23, %v2049_v0  ;;  %v1085_v46 = vadd.f32 %v4280_v55, %v4334_v33 }
 0x2aa   :  { %v1149_v30 = vpop.f32.mrf.mxu2 }
 0x2ab   :  { %v1167_v43 = vadd.f32 %v1149_v30, %v1083_v20  ;;  %3036 = vmatmul.msk.bf16.vlgmr.msra.gmra.mxu3 %vm169_vm1, %v4952_v44 }
 0x2ac   :  { %v4443_v39 = vpop.f32.mrf.mxu1 }
 0x2ae   :  { %v1233_v26 = vpop.f32.mrf.mxu3 }
 0x2af   :  { %v4447_v54 = vadd.f32 %v1233_v26, %v1167_v43 }
 0x2b2   :  { %v1151_v19 = vpop.f32.mrf.mxu2 }
 0x2b3   :  { %v1168_v49 = vadd.f32 %v1151_v19, %v1084_v6  ;;  %v4463_v6 = vpop.f32.mrf.mxu0  ;;  %v3251_v19 = vld [vmem:[#allocation2 + $0x20] sm:$0xff] }
 0x2b4   :  { %v4451_v60 = vpop.f32.mrf.mxu1  ;;  %v2051_v55 = vrot.slane %v3251_v19, 2 }
 0x2b6   :  { %v1235_v20 = vpop.f32.mrf.mxu3 }
 0x2b7   :  { %3062 = vmatmul.msk.bf16.gmra.mxu1 %vm169_vm1, %v4054_v24  ;;  %3025 = vmatmul.msk.bf16.gmra.mxu2 %vm169_vm1, %v2050_v45  ;;  %v4459_v2 = vadd.f32 %v1235_v20, %v1168_v49  ;;  %v1086_v24 = vadd.f32 %v4293_v21, %v4350_v42  ;;  %v2052_v45 = vsel %vm2045_vm14, %v2049_v0, %v2051_v55 }
 0x2b8   :  { %v1420_v21 = vadd.f32 %v4195_v56, %v4363_v12 }
 0x2ba   :  { %v1154_v10 = vpop.f32.mrf.mxu2 }
 0x2bb   :  { %v1169_v30 = vadd.f32 %v1154_v10, %v1085_v46  ;;  %3037 = vmatmul.msk.bf16.gmra.mxu3 %vm169_vm1, %v4047_v53  ;;  %v4473_v49 = vpop.f32.mrf.mxu0  ;;  %v1421_v10 = vadd.f32 %v4209_v25, %v4377_v14  ;;  %v1422_v25 = vadd.f32 %v4221_v29, %v4385_v57  ;;  %v1423_v29 = vadd.f32 %v4235_v17, %v4397_v16  ;;  %v4953_v57 = vld [vmem:[#allocation21_spill] sm:$0xff] }
 0x2bc   :  { %v4461_v43 = vpop.f32.mrf.mxu1 }
 0x2be   :  { %v1238_v23 = vpop.f32.mrf.mxu3 }
 0x2bf   :  { %v4469_v44 = vadd.f32 %v1238_v23, %v1169_v30  ;;  %v1596_v30 = vadd.f32 %v4308_v8, %v1420_v21 }
 0x2c2   :  { %v1156_v26 = vpop.f32.mrf.mxu2 }
 0x2c3   :  { %v1170_v33 = vadd.f32 %v1156_v26, %v1086_v24  ;;  %v4490_v0 = vpop.f32.mrf.mxu0  ;;  %v1597_v24 = vadd.f32 %v4320_v28, %v1421_v10  ;;  %v3252_v26 = vld [vmem:[#allocation2 + $0x28] sm:$0xff]  ;;  %v1598_v28 = vadd.f32 %v4340_v22, %v1422_v25 }
 0x2c4   :  { %v4471_v62 = vpop.f32.mrf.mxu1  ;;  %v2053_v19 = vrot.slane %v3252_v26, 2  ;;  %v1424_v26 = vadd.f32 %v4247_v51, %v4405_v58  ;;  %v1425_v51 = vadd.f32 %v4265_v37, %v4417_v34  ;;  %v4954_v58 = vld [vmem:[#allocation22_spill] sm:$0xff] }
 0x2c6   :  { %v1240_v53 = vpop.f32.mrf.mxu3  ;;  %v2054_v8 = vsel %vm2045_vm14, %v2051_v55, %v2053_v19  ;;  %v1599_v55 = vadd.f32 %v4356_v11, %v1423_v29  ;;  %v1600_v11 = vadd.f32 %v4367_v18, %v1424_v26  ;;  %v2057_v18 = vrot.slane %v4171_v27, 2 }
 0x2c7   :  { %3063 = vmatmul.msk.bf16.gmra.mxu1 %vm169_vm1, %v4072_v32  ;;  %3026 = vmatmul.msk.bf16.gmra.mxu2 %vm169_vm1, %v2052_v45  ;;  %v4481_v42 = vadd.f32 %v1240_v53, %v1170_v33 }
 0x2ca   :  { %v1662_v20 = vpop.f32.mrf.mxu2 }
 0x2cb   :  { %3038 = vmatmul.msk.bf16.gmra.mxu3 %vm169_vm1, %v4057_v4  ;;  %v1692_v32 = vadd.f32 %v1662_v20, %v1596_v30  ;;  %v4506_v53 = vpop.f32.mrf.mxu0 }
 0x2cc   :  { %v4483_v46 = vpop.f32.mrf.mxu1 }
 0x2ce   :  { %v1757_v23 = vpop.f32.mrf.mxu3 }
 0x2cf   :  { %v4493_v56 = vadd.f32 %v1757_v23, %v1692_v32  ;;  %v3253_v32 = vld [vmem:[#allocation2 + $0x30] sm:$0xff] }
 0x2d0   :  { %v2055_v23 = vrot.slane %v3253_v32, 2 }
 0x2d2   :  { %v1664_v12 = vpop.f32.mrf.mxu2  ;;  %v2056_v17 = vsel %vm2045_vm14, %v2053_v19, %v2055_v23 }
 0x2d3   :  { %v1693_v33 = vadd.f32 %v1664_v12, %v1597_v24  ;;  %v4517_v12 = vpop.f32.mrf.mxu0 }
 0x2d4   :  { %v4495_v45 = vpop.f32.mrf.mxu1 }
 0x2d6   :  { %v1759_v4 = vpop.f32.mrf.mxu3 }
 0x2d7   :  { %3064 = vmatmul.msk.bf16.gmra.mxu1 %vm169_vm1, %v4083_v59  ;;  %3027 = vmatmul.msk.bf16.gmra.mxu2 %vm169_vm1, %v2054_v8  ;;  %v4504_v14 = vadd.f32 %v1759_v4, %v1693_v33 }
 0x2da   :  { %v1667_v21 = vpop.f32.mrf.mxu2 }
 0x2db   :  { %v1694_v20 = vadd.f32 %v1667_v21, %v1598_v28  ;;  %3039 = vmatmul.msk.bf16.gmra.mxu3 %vm169_vm1, %v4953_v57  ;;  %v2229_v28 = vld [vmem:[#allocation2 + $0x38] sm:$0x7]  ;;  %v2349_v21 = vld [vmem:[#allocation3 + $0x38] sm:$0x7]  ;;  %v4532_v19 = vpop.f32.mrf.mxu0 }
 0x2dc   :  { %v4508_v10 = vpop.f32.mrf.mxu1  ;;  %v2354_v29 = vunpack.c.l.b16 %v2349_v21 }
 0x2de   :  { %v1762_v59 = vpop.f32.mrf.mxu3 }
 0x2df   :  { %v4515_v30 = vadd.f32 %v1762_v59, %v1694_v20  ;;  %v2234_v20 = vunpack.c.l.b16 %v2229_v28  ;;  %v2355_v59 = vpack.c.b16 %v2354_v29, %v2354_v29  ;;  %v2058_v29 = vsel %vm2045_vm14, %v2055_v23, %v2057_v18 }
 0x2e1   :  { %v2235_v57 = vpack.c.b16 %v2234_v20, %v2234_v20  ;;  %v2385_v26 = vshrl.u32 %v2355_v59, 16 }
 0x2e2   :  { %v1669_v22 = vpop.f32.mrf.mxu2 }
 0x2e3   :  { %v1695_v24 = vadd.f32 %v1669_v22, %v1599_v55  ;;  %v2266_v32 = vshrl.u32 %v2235_v57, 16  ;;  %v2387_v28 = vrot.slane %v2385_v26, 2 }
 0x2e4   :  { %v4521_v33 = vpop.f32.mrf.mxu1 }
 0x2e5   :  { %v2268_v34 = vrot.slane %v2266_v32, 2 }
 0x2e6   :  { %v1764_v16 = vpop.f32.mrf.mxu3 }
 0x2e7   :  { %3028 = vmatmul.msk.bf16.gmra.mxu2 %vm169_vm1, %v2056_v17  ;;  %v4526_v25 = vadd.f32 %v1764_v16, %v1695_v24  ;;  %v2269_v24 = vshll.u32 %v2235_v57, 16  ;;  %v2388_v17 = vshll.u32 %v2355_v59, 16  ;;  %v1601_v16 = vadd.f32 %v4381_v36, %v1425_v51  ;;  %v4550_v59 = vpop.f32.mrf.mxu0 }
 0x2e8   :  { %v2152_v57 = vrot.slane %v4369_v41, 2 }
 0x2e9   :  { %v2390_v21 = vrot.slane %v2388_v17, 3 }
 0x2ea   :  { %v1672_v8 = vpop.f32.mrf.mxu2 }
 0x2eb   :  { %v1696_v4 = vadd.f32 %v1672_v8, %v1600_v11  ;;  %3040 = vmatmul.msk.bf16.gmra.mxu3 %vm169_vm1, %v4954_v58  ;;  %v2271_v8 = vrot.slane %v2269_v24, 3  ;;  %v2391_v58 = vor.u32 %v2390_v21, %v2387_v28  ;;  %v1427_v24 = vadd.f32 %v4295_v38, %v4441_v3 }
 0x2ec   :  { %v4535_v55 = vpop.f32.mrf.mxu1 }
 0x2ed   :  { %4955 = vst [vmem:[#allocation12_spill] sm:$0xff] %v4535_v55  ;;  %v2272_v27 = vor.u32 %v2271_v8, %v2268_v34  ;;  %v1426_v55 = vadd.f32 %v4277_v15, %v4428_v7  ;;  %v1603_v17 = vadd.f32 %v4400_v48, %v1427_v24  ;;  %v1429_v48 = vadd.f32 %v4331_v40, %v4459_v2 }
 0x2ee   :  { %v1767_v22 = vpop.f32.mrf.mxu3 }
 0x2ef   :  { %v4538_v11 = vadd.f32 %v1767_v22, %v1696_v4  ;;  %v2273_v36 = vsel %vm2236_vm12, %v4939_v31, %v2272_v27  ;;  %v4956_v4 = vld [vmem:[#allocation20_spill] sm:$0xff]  ;;  %v1602_v18 = vadd.f32 %v4390_v35, %v1426_v55  ;;  %v4957_v31 = vrot.slane %v3910_v5, 2  ;;  %v4567_v35 = vpop.f32.mrf.mxu0 }
 0x2f0   :  { %v2392_v51 = vsel %vm2236_vm12, %v4956_v4, %v2391_v58  ;;  %3053 = vmatmul.msk.bf16.gmra.mxu0 %vm169_vm1, %v2273_v36  ;;  %v1428_v5 = vadd.f32 %v4310_v1, %v4447_v54  ;;  %v1605_v58 = vadd.f32 %v4423_v9, %v1429_v48  ;;  %v1431_v9 = vadd.f32 %v4426_v52, %v4481_v42 }
 0x2f1   :  { %3065 = vmatmul.msk.bf16.gmra.mxu1 %vm169_vm1, %v2392_v51  ;;  %v2153_v22 = vsel %vm2045_vm14, %v4957_v31, %v2152_v57 }
 0x2f2   :  { %v1674_v37 = vpop.f32.mrf.mxu2  ;;  %v1604_v28 = vadd.f32 %v4408_v61, %v1428_v5  ;;  %v1430_v61 = vadd.f32 %v4410_v47, %v4469_v44 }
 0x2f3   :  { %v1697_v20 = vadd.f32 %v1674_v37, %v1601_v16 }
 0x2f4   :  { %v4556_v41 = vpop.f32.mrf.mxu1 }
 0x2f6   :  { %v1769_v23 = vpop.f32.mrf.mxu3 }
 0x2f7   :  { %3029 = vmatmul.msk.bf16.gmra.mxu2 %vm169_vm1, %v2058_v29  ;;  %v4554_v15 = vadd.f32 %v1769_v23, %v1697_v20  ;;  %v4576_v20 = vpop.f32.mrf.mxu0  ;;  %v1606_v23 = vadd.f32 %v4432_v50, %v1430_v61  ;;  %v1911_v61 = vadd.f32 %v4490_v0, %v4538_v11 }
 0x2fa   :  { %v1677_v7 = vpop.f32.mrf.mxu2 }
 0x2fb   :  { %v1698_v32 = vadd.f32 %v1677_v7, %v1602_v18  ;;  %3041 = vmatmul.msk.bf16.gmra.mxu3 %vm169_vm1, %v2153_v22  ;;  %v1607_v22 = vadd.f32 %v4443_v39, %v1431_v9  ;;  %vm2473_vm1 = vcmask 256000  }
 0x2fc   :  { %v4569_v34 = vpop.f32.mrf.mxu1 }
 0x2fe   :  { %v1772_v26 = vpop.f32.mrf.mxu3 }
 0x2ff   :  { %v4565_v16 = vadd.f32 %v1772_v26, %v1698_v32  ;;  %v4587_v36 = vpop.f32.mrf.mxu0  ;;  %v1907_v26 = vadd.f32 %v4439_v13, %v4493_v56 }
 0x302   :  { %v1679_v55 = vpop.f32.mrf.mxu2 }
 0x303   :  { %v1699_v37 = vadd.f32 %v1679_v55, %v1603_v17  ;;  %v2026_v17 = vadd.f32 %v4451_v60, %v1907_v26 }
 0x304   :  { %v4580_v29 = vpop.f32.mrf.mxu1 }
 0x306   :  { %v1774_v8 = vpop.f32.mrf.mxu3 }
 0x307   :  { %v4574_v38 = vadd.f32 %v1774_v8, %v1699_v37  ;;  %v2307_v7 = vpop.f32.mrf.mxu0 }
 0x30a   :  { %v1682_v3 = vpop.f32.mrf.mxu2 }
 0x30b   :  { %v1700_v21 = vadd.f32 %v1682_v3, %v1604_v28 }
 0x30c   :  { %v4589_v4 = vpop.f32.mrf.mxu1 }
 0x30e   :  { %v1777_v27 = vpop.f32.mrf.mxu3 }
 0x30f   :  { %v4583_v57 = vadd.f32 %v1777_v27, %v1700_v21  ;;  %v2309_v37 = vpop.f32.mrf.mxu0 }
 0x312   :  { %v1684_v1 = vpop.f32.mrf.mxu2 }
 0x313   :  { %v1701_v54 = vadd.f32 %v1684_v1, %v1605_v58 }
 0x314   :  { %v2426_v47 = vpop.f32.mrf.mxu1 }
 0x316   :  { %v1779_v51 = vpop.f32.mrf.mxu3 }
 0x317   :  { %v4592_v40 = vadd.f32 %v1779_v51, %v1701_v54  ;;  %v2312_v21 = vpop.f32.mrf.mxu0 }
 0x31a   :  { %v1687_v2 = vpop.f32.mrf.mxu2 }
 0x31b   :  { %v1702_v18 = vadd.f32 %v1687_v2, %v1606_v23  ;;  %v2030_v2 = vadd.f32 %v4495_v45, %v1911_v61  ;;  %v1908_v45 = vadd.f32 %v4449_v63, %v4504_v14  ;;  %v1913_v14 = vadd.f32 %v4517_v12, %v4565_v16 }
 0x31c   :  { %v2428_v42 = vpop.f32.mrf.mxu1 }
 0x31e   :  { %v1782_v31 = vpop.f32.mrf.mxu3 }
 0x31f   :  { %v4597_v32 = vadd.f32 %v1782_v31, %v1702_v18  ;;  %v2314_v13 = vpop.f32.mrf.mxu0  ;;  %v1912_v31 = vadd.f32 %v4506_v53, %v4554_v15  ;;  %v2027_v53 = vadd.f32 %v4461_v43, %v1908_v45 }
 0x322   :  { %v1689_v44 = vpop.f32.mrf.mxu2 }
 0x323   :  { %v1703_v24 = vadd.f32 %v1689_v44, %v1607_v22 }
 0x324   :  { %v2431_v27 = vpop.f32.mrf.mxu1 }
 0x326   :  { %v1784_v50 = vpop.f32.mrf.mxu3 }
 0x327   :  { %v4602_v55 = vadd.f32 %v1784_v50, %v1703_v24  ;;  %v2317_v51 = vpop.f32.mrf.mxu0 }
 0x32a   :  { %v2092_v5 = vpop.f32.mrf.mxu2 }
 0x32b   :  { %v2122_v52 = vadd.f32 %v2092_v5, %v2026_v17 }
 0x32c   :  { %v2433_v56 = vpop.f32.mrf.mxu1 }
 0x32e   :  { %v2187_v8 = vpop.f32.mrf.mxu3 }
 0x32f   :  { %v2217_v28 = vadd.f32 %v2187_v8, %v2122_v52  ;;  %v2319_v24 = vpop.f32.mrf.mxu0  ;;  %v1909_v52 = vadd.f32 %v4463_v6, %v4515_v30 }
 0x331   :  { %v2337_v3 = vadd.f32 %v2307_v7, %v2217_v28 }
 0x332   :  { %v2094_v39 = vpop.f32.mrf.mxu2 }
 0x333   :  { %v4604_v48 = vadd.f32 %v2426_v47, %v2337_v3  ;;  %v2031_v47 = vadd.f32 %v4508_v10, %v1912_v31  ;;  %v1910_v10 = vadd.f32 %v4473_v49, %v4526_v25  ;;  %v2123_v61 = vadd.f32 %v2094_v39, %v2027_v53 }
 0x334   :  { %v2436_v18 = vpop.f32.mrf.mxu1 }
 0x335   :  { %v2029_v30 = vadd.f32 %v4483_v46, %v1910_v10 }
 0x336   :  { %v2189_v58 = vpop.f32.mrf.mxu3 }
 0x337   :  { %v2322_v3 = vpop.f32.mrf.mxu0 }
 0x33a   :  { %v2097_v1 = vpop.f32.mrf.mxu2 }
 0x33c   :  { %v2438_v5 = vpop.f32.mrf.mxu1 }
 0x33e   :  { %v2192_v54 = vpop.f32.mrf.mxu3 }
 0x342   :  { %v2099_v60 = vpop.f32.mrf.mxu2 }
 0x343   :  { %v2125_v49 = vadd.f32 %v2099_v60, %v2029_v30 }
 0x344   :  { %v2441_v63 = vpop.f32.mrf.mxu1 }
 0x346   :  { %v2194_v23 = vpop.f32.mrf.mxu3 }
 0x347   :  { %v2220_v31 = vadd.f32 %v2194_v23, %v2125_v49 }
 0x349   :  { %v2340_v16 = vadd.f32 %v2314_v13, %v2220_v31  ;;  %v2482_v13 = vmul.f32 %v4604_v48, %v4604_v48 }
 0x34a   :  { %v2102_v9 = vpop.f32.mrf.mxu2 }
 0x34b   :  { %v2126_v7 = vadd.f32 %v2102_v9, %v2030_v2  ;;  %v1914_v9 = vadd.f32 %v4532_v19, %v4574_v38  ;;  %v1915_v19 = vadd.f32 %v4550_v59, %v4583_v57  ;;  %v2486_v53 = vsel %vm95_vm0, %v2482_v13, 0.0 }
 0x34d   :  { %v2034_v57 = vadd.f32 %v4556_v41, %v1915_v19  ;;  %v1916_v41 = vadd.f32 %v4567_v35, %v4592_v40 }
 0x34e   :  { %v2197_v22 = vpop.f32.mrf.mxu3 }
 0x34f   :  { %v2221_v44 = vadd.f32 %v2197_v22, %v2126_v7 }
 0x351   :  { %v2341_v17 = vadd.f32 %v2317_v51, %v2221_v44  ;;  %v2028_v51 = vadd.f32 %v4471_v62, %v1909_v52  ;;  %v2032_v62 = vadd.f32 %v4521_v33, %v1913_v14 }
 0x352   :  { %v2104_v26 = vpop.f32.mrf.mxu2 }
 0x353   :  { %v2127_v50 = vadd.f32 %v2104_v26, %v2031_v47  ;;  %v4612_v0 = vadd.f32 %v2436_v18, %v2341_v17  ;;  %v2218_v18 = vadd.f32 %v2189_v58, %v2123_v61  ;;  %v2124_v6 = vadd.f32 %v2097_v1, %v2028_v51  ;;  %v4958_v47 = vld [vmem:[#allocation12_spill] sm:$0xff]  ;;  %v2443_v26 = vpop.f32.mrf.mxu1 }
 0x354   :  { %v2033_v44 = vadd.f32 %v4958_v47, %v1914_v9  ;;  %v2468_v17 = vsel %vm95_vm0, %v4604_v48, 0.0 }
 0x355   :  { %v2219_v25 = vadd.f32 %v2192_v54, %v2124_v6  ;;  %v2338_v7 = vadd.f32 %v2309_v37, %v2218_v18  ;;  %v4639_v54 = vadd.f32 %v2433_v56, %v2340_v16 }
 0x356   :  { %v2199_v11 = vpop.f32.mrf.mxu3 }
 0x357   :  { %v2222_v8 = vadd.f32 %v2199_v11, %v2127_v50  ;;  %v2339_v22 = vadd.f32 %v2312_v21, %v2219_v25  ;;  %v4631_v12 = vadd.f32 %v2428_v42, %v2338_v7  ;;  %v2485_v45 = vmul.f32 %v4639_v54, %v4639_v54 }
 0x359   :  { %v2342_v28 = vadd.f32 %v2319_v24, %v2222_v8  ;;  %v2324_v24 = vpop.f32.mrf.mxu0  ;;  %v4635_v38 = vadd.f32 %v2431_v27, %v2339_v22  ;;  %v2483_v33 = vmul.f32 %v4631_v12, %v4631_v12  ;;  %v2469_v23 = vsel %vm95_vm0, %v4631_v12, 0.0 }
 0x35a   :  { %v2107_v15 = vpop.f32.mrf.mxu2  ;;  %v2491_v6 = vsel %vm2473_vm1, %v2485_v45, 0.0 }
 0x35b   :  { %v4622_v2 = vadd.f32 %v2438_v5, %v2342_v28  ;;  %v2128_v58 = vadd.f32 %v2107_v15, %v2032_v62  ;;  %v2484_v59 = vmul.f32 %v4635_v38, %v4635_v38  ;;  %v2487_v56 = vsel %vm95_vm0, %v2483_v33, 0.0  ;;  %v2446_v14 = vpop.f32.mrf.mxu1 }
 0x35c   :  { %v2471_v5 = vsel %vm95_vm0, %v4635_v38, 0.0  ;;  %v2470_v15 = vadd.f32 %v2469_v23, %v2468_v17  ;;  %v2488_v18 = vadd.f32 %v2487_v56, %v2486_v53 }
 0x35d   :  { %v2489_v28 = vsel %vm95_vm0, %v2484_v59, 0.0 }
 0x35e   :  { %v2202_v43 = vpop.f32.mrf.mxu3 }
 0x35f   :  { %v2223_v1 = vadd.f32 %v2202_v43, %v2128_v58  ;;  %v2490_v43 = vadd.f32 %v2489_v28, %v2488_v18 }
 0x361   :  { %v2343_v60 = vadd.f32 %v2322_v3, %v2223_v1  ;;  %v2327_v8 = vpop.f32.mrf.mxu0  ;;  %v2474_v3 = vsel %vm2473_vm1, %v4639_v54, 0.0  ;;  %v2492_v62 = vadd.f32 %v2491_v6, %v2490_v43 }
 0x362   :  { %v2109_v39 = vpop.f32.mrf.mxu2 }
 0x363   :  { %v2129_v46 = vadd.f32 %v2109_v39, %v2033_v44  ;;  %v4657_v11 = vadd.f32 %v2441_v63, %v2343_v60  ;;  %v2472_v63 = vadd.f32 %v2471_v5, %v2470_v15  ;;  %v2035_v39 = vadd.f32 %v4569_v34, %v1916_v41 }
 0x364   :  { %v1917_v41 = vadd.f32 %v4576_v20, %v4597_v32 }
 0x365   :  { %v2512_v35 = vmul.f32 %v4657_v11, %v4657_v11  ;;  %v2475_v9 = vadd.f32 %v2474_v3, %v2472_v63  ;;  %v2499_v25 = vsel %vm95_vm0, %v4657_v11, 0.0 }
 0x366   :  { %v2204_v50 = vpop.f32.mrf.mxu3  ;;  %v2036_v63 = vadd.f32 %v4580_v29, %v1917_v41 }
 0x367   :  { %v2224_v37 = vadd.f32 %v2204_v50, %v2129_v46  ;;  %v2516_v58 = vsel %vm95_vm0, %v2512_v35, 0.0  ;;  %v2476_v16 = vrot.slane %v2475_v9, 4 }
 0x369   :  { %v2344_v42 = vadd.f32 %v2324_v24, %v2224_v37  ;;  %v2329_v19 = vpop.f32.mrf.mxu0  ;;  %v2493_v37 = vrot.slane %v2492_v62, 4  ;;  %v2477_v60 = vadd.f32 %v2476_v16, %v2475_v9  ;;  %v1918_v9 = vadd.f32 %v4587_v36, %v4602_v55 }
 0x36a   :  { %v2112_v21 = vpop.f32.mrf.mxu2 }
 0x36b   :  { %v4648_v27 = vadd.f32 %v2443_v26, %v2344_v42  ;;  %v2130_v52 = vadd.f32 %v2112_v21, %v2034_v57  ;;  %v2448_v42 = vpop.f32.mrf.mxu1  ;;  %v2494_v23 = vadd.f32 %v2493_v37, %v2492_v62  ;;  %v2478_v17 = vrot.slane %v2477_v60, 2 }
 0x36d   :  { %v2513_v61 = vmul.f32 %v4648_v27, %v4648_v27  ;;  %v2500_v40 = vsel %vm95_vm0, %v4648_v27, 0.0  ;;  %v2495_v45 = vrot.slane %v2494_v23, 2  ;;  %v2479_v53 = vadd.f32 %v2478_v17, %v2477_v60 }
 0x36e   :  { %v2207_v10 = vpop.f32.mrf.mxu3  ;;  %v2501_v22 = vadd.f32 %v2500_v40, %v2499_v25 }
 0x36f   :  { %v2225_v51 = vadd.f32 %v2207_v10, %v2130_v52  ;;  %v2517_v7 = vsel %vm95_vm0, %v2513_v61, 0.0  ;;  %v2496_v3 = vadd.f32 %v2495_v45, %v2494_v23  ;;  %v2480_v18 = vrot.slane %v2479_v53, 1 }
 0x370   :  { %v2518_v46 = vadd.f32 %v2517_v7, %v2516_v58 }
 0x371   :  { %v2345_v30 = vadd.f32 %v2327_v8, %v2225_v51  ;;  %v2497_v35 = vrot.slane %v2496_v3, 1  ;;  %v2481_v32 = vadd.f32 %v2480_v18, %v2479_v53  ;;  %v4712_v53 = vld [vmem:[%s4889_s4] sm:$0xff] }
 0x372   :  { %v2114_v49 = vpop.f32.mrf.mxu2 }
 0x373   :  { %v4676_v31 = vadd.f32 %v2446_v14, %v2345_v30  ;;  %v2131_v47 = vadd.f32 %v2114_v49, %v2035_v39  ;;  %v2332_v39 = vpop.f32.mrf.mxu0  ;;  %v2451_v62 = vpop.f32.mrf.mxu1 }
 0x375   :  { %v2502_v44 = vsel %vm95_vm0, %v4676_v31, 0.0  ;;  %v2514_v24 = vmul.f32 %v4676_v31, %v4676_v31 }
 0x376   :  { %v2503_v1 = vadd.f32 %v2502_v44, %v2501_v22  ;;  %v2209_v26 = vpop.f32.mrf.mxu3  ;;  %v2498_v22 = vadd.f32 %v2497_v35, %v2496_v3 }
 0x377   :  { %v2519_v50 = vsel %vm95_vm0, %v2514_v24, 0.0  ;;  %v2226_v34 = vadd.f32 %v2209_v26, %v2131_v47  ;;  %v2037_v24 = vadd.f32 %v4589_v4, %v1918_v9  ;;  %v2619_v9 = vld [vmem:[%s4888_s3 + $0x50] sm:$0xff] }
 0x378   :  { %v2520_v33 = vadd.f32 %v2519_v50, %v2518_v46 }
 0x379   :  { %v2346_v21 = vadd.f32 %v2329_v19, %v2226_v34 }
 0x37a   :  { %v2117_v15 = vpop.f32.mrf.mxu2 }
 0x37b   :  { %v4684_v13 = vadd.f32 %v2448_v42, %v2346_v21  ;;  %v2132_v40 = vadd.f32 %v2117_v15, %v2036_v63  ;;  %v2334_v21 = vpop.f32.mrf.mxu0  ;;  %v2453_v60 = vpop.f32.mrf.mxu1  ;;  %v4715_v15 = vperm.slane %v4712_v53, 4 }
 0x37d   :  { %v2504_v59 = vsel %vm2473_vm1, %v4684_v13, 0.0  ;;  %v2515_v57 = vmul.f32 %v4684_v13, %v4684_v13 }
 0x37e   :  { %v2505_v56 = vadd.f32 %v2504_v59, %v2503_v1  ;;  %v2212_v20 = vpop.f32.mrf.mxu3 }
 0x37f   :  { %v2521_v5 = vsel %vm2473_vm1, %v2515_v57, 0.0  ;;  %v2227_v7 = vadd.f32 %v2212_v20, %v2132_v40  ;;  %v2620_v20 = vld [vmem:[%s4888_s3 + $0x58] sm:$0xff] }
 0x380   :  { %v2506_v52 = vrot.slane %v2505_v56, 4  ;;  %v2522_v8 = vadd.f32 %v2521_v5, %v2520_v33 }
 0x381   :  { %v2347_v44 = vadd.f32 %v2332_v39, %v2227_v7 }
 0x382   :  { %v2507_v10 = vadd.f32 %v2506_v52, %v2505_v56  ;;  %v2523_v28 = vrot.slane %v2522_v8, 4  ;;  %v2119_v29 = vpop.f32.mrf.mxu2 }
 0x383   :  { %v2466_v1 = vadd.f32 %v2451_v62, %v2347_v44  ;;  %v2133_v26 = vadd.f32 %v2119_v29, %v2037_v24 }
 0x384   :  { %v2508_v61 = vrot.slane %v2507_v10, 2  ;;  %v2524_v51 = vadd.f32 %v2523_v28, %v2522_v8 }
 0x386   :  { %v2509_v14 = vadd.f32 %v2508_v61, %v2507_v10  ;;  %v2525_v6 = vrot.slane %v2524_v51, 2  ;;  %v2214_v19 = vpop.f32.mrf.mxu3  ;;  %v4720_v10 = vperm.slane %v4712_v53, 5 }
 0x387   :  { %v2228_v33 = vadd.f32 %v2214_v19, %v2133_v26  ;;  %v3077_v26 = vld [vmem:[%s4888_s3 + $0xb8] sm:$0xff] }
 0x388   :  { %v2510_v30 = vrot.slane %v2509_v14, 1  ;;  %v2526_v43 = vadd.f32 %v2525_v6, %v2524_v51 }
 0x389   :  { %v2348_v42 = vadd.f32 %v2334_v21, %v2228_v33 }
 0x38a   :  { %v2511_v49 = vadd.f32 %v2510_v30, %v2509_v14  ;;  %v2527_v25 = vrot.slane %v2526_v43, 1 }
 0x38b   :  { %v2467_v59 = vadd.f32 %v2453_v60, %v2348_v42 }
 0x38c   :  { %v2528_v58 = vadd.f32 %v2527_v25, %v2526_v43  ;;  %v2529_v47 = vadd.f32 %v2511_v49, %v2481_v32  ;;  %v2618_v43 = vld [vmem:[%s4888_s3 + $0x48] sm:$0xff] }
 0x38e   :  { %v2530_v16 = vadd.f32 %v2528_v58, %v2498_v22  ;;  %v4697_v46 = vmul.f32 0.018518519, %v2529_v47 }
 0x390   :  { %v2532_v36 = vmul.f32 0.018518519, %v2530_v16  ;;  %v2533_v55 = vmul.f32 %v4697_v46, %v4697_v46  ;;  %v2545_v50 = vsub.f32 %v4684_v13, %v4697_v46  ;;  %v2546_v34 = vsub.f32 %v2466_v1, %v4697_v46  ;;  %v3076_v1 = vld [vmem:[%s4888_s3 + $0xb0] sm:$0xff] }
 0x391   :  { %v2547_v57 = vsub.f32 %v2467_v59, %v4697_v46  ;;  %v2543_v56 = vsub.f32 %v4648_v27, %v4697_v46  ;;  %v2544_v8 = vsub.f32 %v4676_v31, %v4697_v46  ;;  %v2542_v28 = vsub.f32 %v4657_v11, %v4697_v46 }
 0x392   :  { %v2534_v37 = vsub.f32 %v2532_v36, %v2533_v55  ;;  %v2540_v32 = vsub.f32 %v4612_v0, %v4697_v46  ;;  %v3075_v0 = vld [vmem:[%s4888_s3 + $0xa8] sm:$0xff]  ;;  %v2541_v55 = vsub.f32 %v4622_v2, %v4697_v46  ;;  %v2616_v2 = vld [vmem:[%s4888_s3 + $0x38] sm:$0xff] }
 0x394   :  { %v2535_v4 = vmax.f32 %v2534_v37, 0.0 }
 0x396   :  { %v2548_v23 = vadd.f32 1e-05, %v2535_v4 }
 0x398   :  { %3247 = vrsqrt.f32 %v2548_v23  ;;  %vm2555_vm2 = vweird.f32 %v2548_v23 }
 0x39e   :  { %v3248_v17 = vpop.eup %3247 }
 0x39f   :  { %v2550_v5 = vmul.f32 %v3248_v17, %v2548_v23  ;;  %vm2556_vm15 = vweird.f32 %v3248_v17 }
 0x3a0   :  { %vm2557_vm4 = vmor %vm2555_vm2, %vm2556_vm15 }
 0x3a1   :  { %v2551_v13 = vmul.f32 %v3248_v17, %v2550_v5  ;;  %v2617_v5 = vld [vmem:[%s4888_s3 + $0x40] sm:$0xff] }
 0x3a3   :  { %v2552_v45 = vmul.f32 0.5, %v2551_v13 }
 0x3a5   :  { %v2553_v52 = vsub.f32 1.5, %v2552_v45 }
 0x3a7   :  { %v2554_v41 = vmul.f32 %v3248_v17, %v2553_v52 }
 0x3a9   :  { %v4717_v27 = vsel %vm2557_vm4, %v3248_v17, %v2554_v41 }
 0x3aa   :  { %v2569_v31 = vmul.f32 %v4717_v27, %v2546_v34  ;;  %v2570_v3 = vmul.f32 %v4717_v27, %v2547_v57  ;;  %v2568_v61 = vmul.f32 %v4717_v27, %v2545_v50  ;;  %v2566_v51 = vmul.f32 %v4717_v27, %v2543_v56  ;;  %v3074_v56 = vld [vmem:[%s4888_s3 + $0xa0] sm:$0xff] }
 0x3ab   :  { %v2567_v18 = vmul.f32 %v4717_v27, %v2544_v8  ;;  %v2565_v63 = vmul.f32 %v4717_v27, %v2542_v28  ;;  %v2563_v39 = vmul.f32 %v4717_v27, %v2540_v32  ;;  %v2539_v50 = vsub.f32 %v4639_v54, %v4697_v46 }
 0x3ac   :  { %v2581_v14 = vmul.f32 %v4715_v15, %v2568_v61  ;;  %v2582_v6 = vmul.f32 %v4715_v15, %v2569_v31  ;;  %v2583_v35 = vmul.f32 %v4715_v15, %v2570_v3  ;;  %v2579_v47 = vmul.f32 %v4715_v15, %v2566_v51 }
 0x3ad   :  { %v2580_v16 = vmul.f32 %v4715_v15, %v2567_v18  ;;  %v2564_v21 = vmul.f32 %v4717_v27, %v2541_v55  ;;  %v2562_v60 = vmul.f32 %v4717_v27, %v2539_v50  ;;  %v2578_v42 = vmul.f32 %v4715_v15, %v2565_v63  ;;  %v2612_v55 = vld [vmem:[%s4888_s3 + $0x18] sm:$0xff]  ;;  %v3070_v50 = vld [vmem:[%s4888_s3 + $0x80] sm:$0xff] }
 0x3ae   :  { %v2594_v11 = vadd.f32 %v4720_v10, %v2581_v14  ;;  %v2595_v40 = vadd.f32 %v4720_v10, %v2582_v6  ;;  %v2596_v30 = vadd.f32 %v4720_v10, %v2583_v35  ;;  %v2592_v36 = vadd.f32 %v4720_v10, %v2579_v47  ;;  %v3072_v14 = vld [vmem:[%s4888_s3 + $0x90] sm:$0xff]  ;;  %v3073_v35 = vld [vmem:[%s4888_s3 + $0x98] sm:$0xff] }
 0x3af   :  { %v2593_v37 = vadd.f32 %v4720_v10, %v2580_v16  ;;  %v2537_v57 = vsub.f32 %v4631_v12, %v4697_v46  ;;  %v2591_v52 = vadd.f32 %v4720_v10, %v2578_v42  ;;  %v2538_v31 = vsub.f32 %v4635_v38, %v4697_v46  ;;  %v2615_v38 = vld [vmem:[%s4888_s3 + $0x30] sm:$0xff] }
 0x3b0   :  { %v2606_v49 = vmax.f32 %v2594_v11, 0.0  ;;  %v2607_v25 = vmax.f32 %v2595_v40, 0.0  ;;  %v2608_v7 = vmax.f32 %v2596_v30, 0.0  ;;  %v2604_v4 = vmax.f32 %v2592_v36, 0.0 }
 0x3b1   :  { %v2605_v54 = vmax.f32 %v2593_v37, 0.0  ;;  %v2560_v13 = vmul.f32 %v4717_v27, %v2537_v57  ;;  %v2603_v28 = vmax.f32 %v2591_v52, 0.0  ;;  %v2576_v61 = vmul.f32 %v4715_v15, %v2563_v39  ;;  %v3071_v39 = vld [vmem:[%s4888_s3 + $0x88] sm:$0xff]  ;;  %v3068_v57 = vld [vmem:[%s4888_s3 + $0x70] sm:$0xff] }
 0x3b2   :  { %v2630_v62 = vmul.f32 %v2618_v43, %v2606_v49  ;;  %v2631_v22 = vmul.f32 %v2619_v9, %v2607_v25  ;;  %v2632_v58 = vmul.f32 %v2620_v20, %v2608_v7  ;;  %v2691_v34 = vmul.f32 %v3075_v0, %v2606_v49  ;;  %v3069_v0 = vld [vmem:[%s4888_s3 + $0x78] sm:$0xff] }
 0x3b3   :  { %v2692_v19 = vmul.f32 %v3076_v1, %v2607_v25  ;;  %v2693_v33 = vmul.f32 %v3077_v26, %v2608_v7  ;;  %v2628_v45 = vmul.f32 %v2616_v2, %v2604_v4  ;;  %v2690_v8 = vmul.f32 %v3074_v56, %v2605_v54 }
 0x3b4   :  { %v2660_v29 = vsel %vm95_vm0, %v2630_v62, 0.0  ;;  %v2663_v44 = vsel %vm95_vm0, %v2631_v22, 0.0  ;;  %v2666_v24 = vsel %vm95_vm0, %v2632_v58, 0.0  ;;  %v2721_v23 = vsel %vm95_vm0, %v2691_v34, 0.0  ;;  %v2614_v62 = vld [vmem:[%s4888_s3 + $0x28] sm:$0xff] }
 0x3b5   :  { %2661 = vadd.xlane.f32.xlu2 %v2660_v29  ;;  %2664 = vadd.xlane.f32.xlu1 %v2663_v44  ;;  %v2724_v59 = vsel %vm95_vm0, %v2692_v19, 0.0  ;;  %v2727_v17 = vsel %vm95_vm0, %v2693_v33, 0.0  ;;  %v2629_v12 = vmul.f32 %v2617_v5, %v2605_v54  ;;  %v2654_v41 = vsel %vm95_vm0, %v2628_v45, 0.0  ;;  %v2610_v54 = vld [vmem:[%s4888_s3 + $0x8] sm:$0xff] }
 0x3b6   :  { %2667 = vadd.xlane.f32.xlu0 %v2666_v24  ;;  %v2718_v3 = vsel %vm95_vm0, %v2690_v8, 0.0  ;;  %v2577_v51 = vmul.f32 %v4715_v15, %v2564_v21  ;;  %v2536_v18 = vsub.f32 %v4604_v48, %v4697_v46  ;;  %v2561_v6 = vmul.f32 %v4717_v27, %v2538_v31 }
 0x3b7   :  { %v2657_v63 = vsel %vm95_vm0, %v2629_v12, 0.0  ;;  %v2688_v46 = vmul.f32 %v3072_v14, %v2603_v28  ;;  %v2627_v11 = vmul.f32 %v2615_v38, %v2603_v28  ;;  %v2589_v40 = vadd.f32 %v4720_v10, %v2576_v61  ;;  %v2609_v28 = vld [vmem:[%s4888_s3] sm:$0xff] }
 0x3b8   :  { %v2559_v48 = vmul.f32 %v4717_v27, %v2536_v18  ;;  %v2590_v30 = vadd.f32 %v4720_v10, %v2577_v51  ;;  %v2689_v43 = vmul.f32 %v3073_v35, %v2604_v4  ;;  %v2575_v9 = vmul.f32 %v4715_v15, %v2562_v60  ;;  %v2613_v27 = vld [vmem:[%s4888_s3 + $0x20] sm:$0xff] }
 0x3b9   :  { %v2712_v20 = vsel %vm95_vm0, %v2688_v46, 0.0  ;;  %v2651_v32 = vsel %vm95_vm0, %v2627_v11, 0.0  ;;  %v2601_v49 = vmax.f32 %v2589_v40, 0.0  ;;  %v2573_v1 = vmul.f32 %v4715_v15, %v2560_v13 }
 0x3ba   :  { %v2602_v25 = vmax.f32 %v2590_v30, 0.0  ;;  %v2715_v7 = vsel %vm95_vm0, %v2689_v43, 0.0  ;;  %v2588_v22 = vadd.f32 %v4720_v10, %v2575_v9  ;;  %v2574_v26 = vmul.f32 %v4715_v15, %v2561_v6 }
 0x3bb   :  { %v2625_v58 = vmul.f32 %v2613_v27, %v2601_v49  ;;  %v2586_v37 = vadd.f32 %v4720_v10, %v2573_v1  ;;  %v2686_v21 = vmul.f32 %v3070_v50, %v2601_v49 }
 0x3bc   :  { %v2687_v47 = vmul.f32 %v3071_v39, %v2602_v25  ;;  %v2626_v29 = vmul.f32 %v2614_v62, %v2602_v25  ;;  %v2600_v44 = vmax.f32 %v2588_v22, 0.0  ;;  %v2587_v33 = vadd.f32 %v4720_v10, %v2574_v26 }
 0x3bd   :  { %2722 = vadd.xlane.f32.xlu2 %v2721_v23  ;;  %2725 = vadd.xlane.f32.xlu1 %v2724_v59  ;;  %v2645_v24 = vsel %vm95_vm0, %v2625_v58, 0.0  ;;  %v2598_v42 = vmax.f32 %v2586_v37, 0.0  ;;  %v2572_v59 = vmul.f32 %v4715_v15, %v2559_v48  ;;  %v2706_v2 = vsel %vm95_vm0, %v2686_v21, 0.0 }
 0x3be   :  { %2728 = vadd.xlane.f32.xlu0 %v2727_v17  ;;  %v2709_v16 = vsel %vm95_vm0, %v2687_v47, 0.0  ;;  %v2648_v36 = vsel %vm95_vm0, %v2626_v29, 0.0  ;;  %v2685_v34 = vmul.f32 %v3069_v0, %v2600_v44  ;;  %v2624_v19 = vmul.f32 %v2612_v55, %v2600_v44  ;;  %v2611_v17 = vld [vmem:[%s4888_s3 + $0x10] sm:$0xff] }
 0x3bf   :  { %v2599_v23 = vmax.f32 %v2587_v33, 0.0  ;;  %v2622_v56 = vmul.f32 %v2610_v54, %v2598_v42  ;;  %v2585_v15 = vadd.f32 %v4720_v10, %v2572_v59  ;;  %v3067_v10 = vld [vmem:[%s4888_s3 + $0x68] sm:$0xff]  ;;  %v2743_v21 = vperm.slane %v4712_v53, 6 }
 0x3c0   :  { %v2703_v60 = vsel %vm95_vm0, %v2685_v34, 0.0  ;;  %v2642_v4 = vsel %vm95_vm0, %v2624_v19, 0.0  ;;  %v2683_v61 = vmul.f32 %v3067_v10, %v2598_v42 }
 0x3c1   :  { %v2684_v5 = vmul.f32 %v3068_v57, %v2599_v23  ;;  %v2623_v13 = vmul.f32 %v2611_v17, %v2599_v23  ;;  %v2636_v45 = vsel %vm95_vm0, %v2622_v56, 0.0  ;;  %v2597_v8 = vmax.f32 %v2585_v15, 0.0 }
 0x3c3   :  { %v2700_v52 = vsel %vm95_vm0, %v2684_v5, 0.0  ;;  %v2639_v12 = vsel %vm95_vm0, %v2623_v13, 0.0 }
 0x3c5   :  { %2655 = vadd.xlane.f32.xlu2 %v2654_v41  ;;  %2719 = vadd.xlane.f32.xlu1 %v2718_v3  ;;  %v3066_v41 = vld [vmem:[%s4888_s3 + $0x60] sm:$0xff]  ;;  %v2621_v3 = vmul.f32 %v2609_v28, %v2597_v8  ;;  %s3296_s3 = smov [#allocation4]  }
 0x3c6   :  { %2658 = vadd.xlane.f32.xlu0 %v2657_v63  ;;  %v2682_v31 = vmul.f32 %v3066_v41, %v2597_v8  ;;  %v2697_v63 = vsel %vm95_vm0, %v2683_v61, 0.0  ;;  %s2775_s13 = sshll.u32 %s3296_s3, 4  ;;  %s2776_s13 = int_to_ptr.vmem [resolvable:$true] %s2775_s13 }
 0x3c7   :  { %v2633_v18 = vsel %vm95_vm0, %v2621_v3, 0.0 }
 0x3c8   :  { %v2694_v51 = vsel %vm95_vm0, %v2682_v31, 0.0  ;;  %vm2744_vm0 = vcmask 785408  }
 0x3cd   :  { %2713 = vadd.xlane.f32.xlu2 %v2712_v20  ;;  %2652 = vadd.xlane.f32.xlu1 %v2651_v32 }
 0x3ce   :  { %2716 = vadd.xlane.f32.xlu0 %v2715_v7 }
 0x3d5   :  { %2646 = vadd.xlane.f32.xlu2 %v2645_v24  ;;  %2710 = vadd.xlane.f32.xlu1 %v2709_v16 }
 0x3d6   :  { %2649 = vadd.xlane.f32.xlu0 %v2648_v36 }
 0x3dd   :  { %2704 = vadd.xlane.f32.xlu2 %v2703_v60  ;;  %2643 = vadd.xlane.f32.xlu1 %v2642_v4 }
 0x3de   :  { %2707 = vadd.xlane.f32.xlu0 %v2706_v2 }
 0x3e5   :  { %2637 = vadd.xlane.f32.xlu2 %v2636_v45  ;;  %2701 = vadd.xlane.f32.xlu1 %v2700_v52 }
 0x3e6   :  { %2640 = vadd.xlane.f32.xlu0 %v2639_v12 }
 0x3ed   :  { %2695 = vadd.xlane.f32.xlu2 %v2694_v51  ;;  %2634 = vadd.xlane.f32.xlu1 %v2633_v18 }
 0x3ee   :  { %2698 = vadd.xlane.f32.xlu0 %v2697_v63 }
 0x428   :  { %v2662_v14 = vpop.xlane.xlu2 %2661  ;;  %v2665_v38 = vpop.xlane.xlu1 %2664 }
 0x429   :  { %v2668_v6 = vpop.xlane.xlu0 %2667 }
 0x430   :  { %v2723_v35 = vpop.xlane.xlu2 %2722  ;;  %v2726_v48 = vpop.xlane.xlu1 %2725 }
 0x431   :  { %v2729_v46 = vpop.xlane.xlu0 %2728  ;;  %v2741_v40 = vsel %vm2730_vm5, %v2665_v38, %v2726_v48  ;;  %v2740_v30 = vsel %vm2730_vm5, %v2662_v14, %v2723_v35 }
 0x432   :  { %v2742_v11 = vsel %vm2730_vm5, %v2668_v6, %v2729_v46 }
 0x433   :  { %2752 = vmatpush.msrb.mxu2 %v2742_v11 }
 0x435   :  { %2753 = vmatpush.msrb.mxu2 %v2741_v40 }
 0x437   :  { %2754 = vmatpush.msrb.mxu2 %v2740_v30 }
 0x438   :  { %v2656_v43 = vpop.xlane.xlu2 %2655  ;;  %v2720_v9 = vpop.xlane.xlu1 %2719 }
 0x439   :  { %v2659_v20 = vpop.xlane.xlu0 %2658 }
 0x43a   :  { %v2739_v32 = vsel %vm2730_vm5, %v2659_v20, %v2720_v9 }
 0x43b   :  { %2755 = vmatpush.msrb.mxu2 %v2739_v32 }
 0x440   :  { %v2714_v49 = vpop.xlane.xlu2 %2713  ;;  %v2653_v25 = vpop.xlane.xlu1 %2652 }
 0x441   :  { %v2717_v7 = vpop.xlane.xlu0 %2716  ;;  %v2737_v39 = vsel %vm2730_vm5, %v2653_v25, %v2714_v49 }
 0x442   :  { %v2738_v27 = vsel %vm2730_vm5, %v2656_v43, %v2717_v7 }
 0x443   :  { %2756 = vmatpush.msrb.mxu2 %v2738_v27 }
 0x445   :  { %2757 = vmatpush.msrb.mxu2 %v2737_v39 }
 0x448   :  { %v2647_v62 = vpop.xlane.xlu2 %2646  ;;  %v2711_v22 = vpop.xlane.xlu1 %2710 }
 0x449   :  { %v2650_v58 = vpop.xlane.xlu0 %2649 }
 0x44a   :  { %v2736_v47 = vsel %vm2730_vm5, %v2650_v58, %v2711_v22 }
 0x44b   :  { %2758 = vmatpush.msrb.mxu2 %v2736_v47 }
 0x450   :  { %v2705_v29 = vpop.xlane.xlu2 %2704  ;;  %v2644_v44 = vpop.xlane.xlu1 %2643 }
 0x451   :  { %v2708_v24 = vpop.xlane.xlu0 %2707  ;;  %v2734_v0 = vsel %vm2730_vm5, %v2644_v44, %v2705_v29 }
 0x452   :  { %v2735_v16 = vsel %vm2730_vm5, %v2647_v62, %v2708_v24 }
 0x453   :  { %2759 = vmatpush.msrb.mxu2 %v2735_v16 }
 0x455   :  { %2760 = vmatpush.msrb.mxu2 %v2734_v0 }
 0x458   :  { %v2638_v1 = vpop.xlane.xlu2 %2637  ;;  %v2702_v26 = vpop.xlane.xlu1 %2701 }
 0x459   :  { %v2641_v36 = vpop.xlane.xlu0 %2640 }
 0x45a   :  { %v2733_v55 = vsel %vm2730_vm5, %v2641_v36, %v2702_v26 }
 0x45b   :  { %2761 = vmatpush.msrb.mxu2 %v2733_v55 }
 0x460   :  { %v2696_v50 = vpop.xlane.xlu2 %2695  ;;  %v2635_v34 = vpop.xlane.xlu1 %2634 }
 0x461   :  { %v2699_v19 = vpop.xlane.xlu0 %2698  ;;  %v2731_v33 = vsel %vm2730_vm5, %v2635_v34, %v2696_v50 }
 0x462   :  { %v2732_v37 = vsel %vm2730_vm5, %v2638_v1, %v2699_v19 }
 0x463   :  { %2762 = vmatpush.msrb.mxu2 %v2732_v37 }
 0x465   :  { %2763 = vmatpush.msrb.mxu2 %v2731_v33 }
 0x466   :  { %3078 = vmatmul.msk.f32.vlgmr.msrb.gmra.mxu2 %vm2744_vm0, %v4712_v53 }
 0x4e9   :  { %v2765_v60 = vpop.f32.mrf.mxu2 }
 0x4ea   :  { %v2766_v4 = vadd.f32 %v2765_v60, %v2743_v21 }
 0x4ec   :  { %2769 = vst.msk [vmem:[#allocation4] sm:$0x3] %vm2768_vm6, %v2766_v4 }
 0x4ed   :  { %2780 = dma.vmem_to_hbm [thread:$0]  %s2776_s13, 32, %s2778_s15, [#allocation5]  }
 0x4ee   :  { %3279 = dma.done.wait [#allocation5], 32  }
 0x4ef   :  { %3280 = vsyncadd [#allocation5], 4294967264 }
 0x4f0   :  { %2785 = vsyncpa [#allocation5], 1 }

</bundles_post_ra>
